<compile_context>
chip_gen: v7x
topology: tpu7x:2x2x1
jax: 0.10.0
libtpu: 0.0.40
codegen_flags: <defaults>
</compile_context>

<pallas_src>
import functools

import jax
import jax.numpy as jnp
from jax.experimental import pallas as pl
from jax.experimental.pallas import tpu as pltpu

EPS = 1e-5
ACT_DTYPE = jnp.bfloat16   # MXU operand / HBM activation dtype


# ------------------------------- Pallas kernel -------------------------------

def _res_block_kernel(xpad_ref, w1_ref, w2_ref, o_ref, h1p_ref, *, H, W):
    # xpad_ref: (1, H+2, W+2, C) bf16 reflection-padded sample, NHWC
    # w1_ref / w2_ref: (3, 3*C, C) bf16; slab dh has rows ordered [dw*C + ci], cols co
    # o_ref: (1, H, W, C) f32
    # h1p_ref: (H+2, W+2, C) bf16 VMEM scratch (stage-1 activation, reflection-padded)
    HW = H * W
    Hp, Wp = H + 2, W + 2
    C = o_ref.shape[-1]

    def conv3x3(strip_of, w_ref):
        # 3x3 "valid" conv as 3 matmuls with K = 3*C (one per kernel row dh):
        #   slab[h, w, dw*C + c] = padded[h+dh, w+dw, c]
        acc = None
        for dh in range(3):
            strip = strip_of(dh)                               # (H, W+2, C) bf16
            slab = jnp.concatenate(
                [strip[:, 0:W, :], strip[:, 1:W + 1, :], strip[:, 2:W + 2, :]],
                axis=-1).reshape(HW, 3 * C)                    # (HW, 3C) bf16
            part = jnp.dot(slab, w_ref[dh],
                           preferred_element_type=jnp.float32)
            acc = part if acc is None else acc + part
        return acc                                             # (HW, C) f32

    def instance_norm(y):
        # one-pass per-channel biased stats over HW (InstanceNorm2d, affine=False)
        mean = jnp.mean(y, axis=0, keepdims=True)
        mean_sq = jnp.mean(y * y, axis=0, keepdims=True)
        var = mean_sq - mean * mean
        return (y - mean) * jax.lax.rsqrt(var + EPS)

    # ---- stage 1: conv -> IN -> ReLU (conv bias is a no-op under IN; omitted) ----
    y1 = conv3x3(lambda dh: xpad_ref[0, dh:dh + H], w1_ref)
    h1 = jnp.maximum(instance_norm(y1), 0.0)                   # (HW, C) f32

    # ---- reflection-pad h1 into VMEM scratch: interior write + mirrored 1-px border ----
    h1p_ref[1:1 + H, 1:1 + W, :] = h1.astype(h1p_ref.dtype).reshape(H, W, C)
    h1p_ref[1:1 + H, 0:1, :] = h1p_ref[1:1 + H, 2:3, :]                 # left  col
    h1p_ref[1:1 + H, Wp - 1:Wp, :] = h1p_ref[1:1 + H, Wp - 3:Wp - 2, :]  # right col
    h1p_ref[0:1, :, :] = h1p_ref[2:3, :, :]                              # top row (+corners)
    h1p_ref[Hp - 1:Hp, :, :] = h1p_ref[Hp - 3:Hp - 2, :, :]              # bottom row

    # ---- stage 2: conv -> IN, then residual add ----
    y2 = instance_norm(conv3x3(lambda dh: h1p_ref[dh:dh + H], w2_ref))   # (HW, C) f32

    x_res = xpad_ref[0, 1:1 + H, 1:1 + W, :].astype(jnp.float32).reshape(HW, C)
    o_ref[0] = (x_res + y2).reshape(H, W, C).astype(o_ref.dtype)


# ------------------------------- wrapper -------------------------------

def _w_slabs(w):
    # (C_out, C_in, 3, 3) OIHW -> (3, 3*C_in, C_out); slab dh rows ordered [dw*C_in + ci]
    c_out, c_in = w.shape[0], w.shape[1]
    return jnp.transpose(w, (2, 3, 1, 0)).reshape(3, 3 * c_in, c_out).astype(ACT_DTYPE)


def residual_block(x, params):
    """x: (N, C, H, W) float32; params = (w1, b1, w2, b2), w*: (C, C, 3, 3), b*: (C,).

    Biases are accepted for API parity but unused: InstanceNorm subtracts the
    per-channel mean, which removes a constant per-channel bias exactly (this
    relies on affine=False IN immediately following each conv).
    """
    N, C, H, W = x.shape
    w1, _b1, w2, _b2 = params
    Hp, Wp = H + 2, W + 2

    # NHWC + reflection pad + bf16 cast in the wrapper (one fused XLA pass).
    # TODO(synk): if the surrounding network is already NHWC, drop the two transposes
    # and feed/emit NHWC directly (the kernel is layout-native NHWC).
    xpad = jnp.pad(jnp.transpose(x, (0, 2, 3, 1)),
                   ((0, 0), (1, 1), (1, 1), (0, 0)),
                   mode="reflect").astype(ACT_DTYPE)            # (N, Hp, Wp, C) bf16

    w1_slabs = _w_slabs(w1)                                      # (3, 3C, C) bf16
    w2_slabs = _w_slabs(w2)

    kernel = functools.partial(_res_block_kernel, H=H, W=W)

    # VMEM budget: double-buffered xpad/out blocks, resident bf16 weights (x2 bufs),
    # plus the h1 pad scratch; clamp the scoped limit to [32 MiB, 64 MiB].
    act_b = jnp.dtype(ACT_DTYPE).itemsize
    est = (2 * Hp * Wp * C * act_b          # xpad block (double-buffered)
           + 2 * H * W * C * 4              # f32 output block (double-buffered)
           + 2 * 2 * 9 * C * C * act_b      # both weight slabs (double-buffered)
           + Hp * Wp * C * act_b)           # h1p scratch
    vmem_limit = int(min(64 * 1024 * 1024, max(32 * 1024 * 1024, 4 * est)))

    out = pl.pallas_call(
        kernel,
        out_shape=jax.ShapeDtypeStruct((N, H, W, C), jnp.float32),
        grid=(N,),
        in_specs=[
            pl.BlockSpec((1, Hp, Wp, C), lambda n: (n, 0, 0, 0)),
            # constant block index -> weights stay resident in VMEM across grid steps
            pl.BlockSpec((3, 3 * C, C), lambda n: (0, 0, 0)),
            pl.BlockSpec((3, 3 * C, C), lambda n: (0, 0, 0)),
        ],
        out_specs=pl.BlockSpec((1, H, W, C), lambda n: (n, 0, 0, 0)),
        scratch_shapes=[pltpu.VMEM((Hp, Wp, C), ACT_DTYPE)],
        compiler_params=pltpu.CompilerParams(
            dimension_semantics=("parallel",),
            vmem_limit_bytes=vmem_limit),
    )(xpad, w1_slabs, w2_slabs)

    return jnp.transpose(out, (0, 3, 1, 2))                     # back to NCHW


# ------------------------------- reference (pure JAX, f32) -------------------------------

def _reflect_pad_nchw(x):
    return jnp.pad(x, ((0, 0), (0, 0), (1, 1), (1, 1)), mode="reflect")


def _ref_block(x, params):
    w1, b1, w2, b2 = params

    def conv_in(h, w, b):
        hp = _reflect_pad_nchw(h)
        y = jax.lax.conv_general_dilated(
            hp, w, (1, 1), "VALID", dimension_numbers=("NCHW", "OIHW", "NCHW"))
        y = y + b[None, :, None, None]
        m = jnp.mean(y, axis=(2, 3), keepdims=True)
        v = jnp.mean((y - m) ** 2, axis=(2, 3), keepdims=True)
        return (y - m) / jnp.sqrt(v + EPS)

    h = jax.nn.relu(conv_in(x, w1, b1))
    return x + conv_in(h, w2, b2)


# ------------------------------- main -------------------------------

if __name__ == "__main__":
    N, C, H, W = 2, 4, 16, 16

    key = jax.random.PRNGKey(0)
    k1, k2, k3, k4, kx = jax.random.split(key, 5)
    fan_in = C * 3 * 3
    bound = 1.0 / (fan_in ** 0.5)
    w1 = jax.random.uniform(k1, (C, C, 3, 3), jnp.float32, -bound, bound)
    b1 = jax.random.uniform(k2, (C,), jnp.float32, -bound, bound)
    w2 = jax.random.uniform(k3, (C, C, 3, 3), jnp.float32, -bound, bound)
    b2 = jax.random.uniform(k4, (C,), jnp.float32, -bound, bound)
    params = (w1, b1, w2, b2)

    x = jax.random.normal(kx, (N, C, H, W), jnp.float32)

    out = jax.block_until_ready(residual_block(x, params))
    ref = _ref_block(x, params)

    assert out.shape == x.shape
    # bf16 MXU operands (activations + weights) vs f32 reference: loosened tolerance.
    max_err = float(jnp.max(jnp.abs(out - ref)))
    assert max_err < 7.5e-2, f"mismatch vs reference: {max_err}"

    print("KERNEL_OK")
</pallas_src>

<mosaic_0001>
module attributes {stable_mosaic.version = 11 : i64} {
  func.func @_res_block_kernel(%arg0: i32, %arg1: memref<1x18x18x4xbf16, #tpu.memory_space<vmem>>, %arg2: memref<3x12x4xbf16, #tpu.memory_space<vmem>>, %arg3: memref<3x12x4xbf16, #tpu.memory_space<vmem>>, %arg4: memref<1x16x16x4xf32, #tpu.memory_space<vmem>>, %arg5: memref<18x18x4xbf16, #tpu.memory_space<vmem>>) attributes {dimension_semantics = [#tpu.dimension_semantics<parallel>], iteration_bounds = array<i64: 2>, scalar_prefetch = 0 : i64, scratch_operands = 1 : i64, tpu.core_type = #tpu.core_type<tc>, window_params = [{transform_indices = @transform_0, window_bounds = array<i64: 1, 18, 18, 4>}, {pipeline_mode = #tpu.pipeline_mode<synchronous>, transform_indices = @transform_1, window_bounds = array<i64: 3, 12, 4>}, {pipeline_mode = #tpu.pipeline_mode<synchronous>, transform_indices = @transform_2, window_bounds = array<i64: 3, 12, 4>}, {transform_indices = @transform_3, window_bounds = array<i64: 1, 16, 16, 4>}]} {
    %c0 = arith.constant 0 : index
    %c0_0 = arith.constant 0 : index
    %c0_1 = arith.constant 0 : index
    %c0_2 = arith.constant 0 : index
    %0 = vector.load %arg1[%c0, %c0_0, %c0_1, %c0_2] : memref<1x18x18x4xbf16, #tpu.memory_space<vmem>>, vector<1x16x18x4xbf16>
    %1 = vector.shape_cast %0 : vector<1x16x18x4xbf16> to vector<16x18x4xbf16>
    %2 = vector.extract_strided_slice %1 {offsets = [0, 0, 0], sizes = [16, 16, 4], strides = [1, 1, 1]} : vector<16x18x4xbf16> to vector<16x16x4xbf16>
    %3 = vector.extract_strided_slice %1 {offsets = [0, 1, 0], sizes = [16, 16, 4], strides = [1, 1, 1]} : vector<16x18x4xbf16> to vector<16x16x4xbf16>
    %4 = vector.extract_strided_slice %1 {offsets = [0, 2, 0], sizes = [16, 16, 4], strides = [1, 1, 1]} : vector<16x18x4xbf16> to vector<16x16x4xbf16>
    %5 = tpu.concatenate %2, %3, %4 in 2 : vector<16x16x4xbf16>, vector<16x16x4xbf16>, vector<16x16x4xbf16> -> vector<16x16x12xbf16>
    %6 = vector.shape_cast %5 : vector<16x16x12xbf16> to vector<256x12xbf16>
    %c0_3 = arith.constant 0 : index
    %c0_4 = arith.constant 0 : index
    %c0_5 = arith.constant 0 : index
    %7 = vector.load %arg2[%c0_3, %c0_4, %c0_5] : memref<3x12x4xbf16, #tpu.memory_space<vmem>>, vector<1x12x4xbf16>
    %8 = vector.shape_cast %7 : vector<1x12x4xbf16> to vector<12x4xbf16>
    %cst = arith.constant dense<0.000000e+00> : vector<256x4xf32>
    %9 = tpu.matmul %6, %8, %cst {dimension_numbers = #tpu.dot_dimension_numbers<[1], [0], [0], [1], [0, 0, 1, 1], [], []>} : vector<256x12xbf16>, vector<12x4xbf16>, vector<256x4xf32> -> vector<256x4xf32>
    %c0_6 = arith.constant 0 : index
    %c1 = arith.constant 1 : index
    %c0_7 = arith.constant 0 : index
    %c0_8 = arith.constant 0 : index
    %10 = vector.load %arg1[%c0_6, %c1, %c0_7, %c0_8] : memref<1x18x18x4xbf16, #tpu.memory_space<vmem>>, vector<1x16x18x4xbf16>
    %11 = vector.shape_cast %10 : vector<1x16x18x4xbf16> to vector<16x18x4xbf16>
    %12 = vector.extract_strided_slice %11 {offsets = [0, 0, 0], sizes = [16, 16, 4], strides = [1, 1, 1]} : vector<16x18x4xbf16> to vector<16x16x4xbf16>
    %13 = vector.extract_strided_slice %11 {offsets = [0, 1, 0], sizes = [16, 16, 4], strides = [1, 1, 1]} : vector<16x18x4xbf16> to vector<16x16x4xbf16>
    %14 = vector.extract_strided_slice %11 {offsets = [0, 2, 0], sizes = [16, 16, 4], strides = [1, 1, 1]} : vector<16x18x4xbf16> to vector<16x16x4xbf16>
    %15 = tpu.concatenate %12, %13, %14 in 2 : vector<16x16x4xbf16>, vector<16x16x4xbf16>, vector<16x16x4xbf16> -> vector<16x16x12xbf16>
    %16 = vector.shape_cast %15 : vector<16x16x12xbf16> to vector<256x12xbf16>
    %c1_9 = arith.constant 1 : index
    %c0_10 = arith.constant 0 : index
    %c0_11 = arith.constant 0 : index
    %17 = vector.load %arg2[%c1_9, %c0_10, %c0_11] : memref<3x12x4xbf16, #tpu.memory_space<vmem>>, vector<1x12x4xbf16>
    %18 = vector.shape_cast %17 : vector<1x12x4xbf16> to vector<12x4xbf16>
    %cst_12 = arith.constant dense<0.000000e+00> : vector<256x4xf32>
    %19 = tpu.matmul %16, %18, %cst_12 {dimension_numbers = #tpu.dot_dimension_numbers<[1], [0], [0], [1], [0, 0, 1, 1], [], []>} : vector<256x12xbf16>, vector<12x4xbf16>, vector<256x4xf32> -> vector<256x4xf32>
    %20 = arith.addf %9, %19 : vector<256x4xf32>
    %c0_13 = arith.constant 0 : index
    %c2 = arith.constant 2 : index
    %c0_14 = arith.constant 0 : index
    %c0_15 = arith.constant 0 : index
    %21 = vector.load %arg1[%c0_13, %c2, %c0_14, %c0_15] : memref<1x18x18x4xbf16, #tpu.memory_space<vmem>>, vector<1x16x18x4xbf16>
    %22 = vector.shape_cast %21 : vector<1x16x18x4xbf16> to vector<16x18x4xbf16>
    %23 = vector.extract_strided_slice %22 {offsets = [0, 0, 0], sizes = [16, 16, 4], strides = [1, 1, 1]} : vector<16x18x4xbf16> to vector<16x16x4xbf16>
    %24 = vector.extract_strided_slice %22 {offsets = [0, 1, 0], sizes = [16, 16, 4], strides = [1, 1, 1]} : vector<16x18x4xbf16> to vector<16x16x4xbf16>
    %25 = vector.extract_strided_slice %22 {offsets = [0, 2, 0], sizes = [16, 16, 4], strides = [1, 1, 1]} : vector<16x18x4xbf16> to vector<16x16x4xbf16>
    %26 = tpu.concatenate %23, %24, %25 in 2 : vector<16x16x4xbf16>, vector<16x16x4xbf16>, vector<16x16x4xbf16> -> vector<16x16x12xbf16>
    %27 = vector.shape_cast %26 : vector<16x16x12xbf16> to vector<256x12xbf16>
    %c2_16 = arith.constant 2 : index
    %c0_17 = arith.constant 0 : index
    %c0_18 = arith.constant 0 : index
    %28 = vector.load %arg2[%c2_16, %c0_17, %c0_18] : memref<3x12x4xbf16, #tpu.memory_space<vmem>>, vector<1x12x4xbf16>
    %29 = vector.shape_cast %28 : vector<1x12x4xbf16> to vector<12x4xbf16>
    %cst_19 = arith.constant dense<0.000000e+00> : vector<256x4xf32>
    %30 = tpu.matmul %27, %29, %cst_19 {dimension_numbers = #tpu.dot_dimension_numbers<[1], [0], [0], [1], [0, 0, 1, 1], [], []>} : vector<256x12xbf16>, vector<12x4xbf16>, vector<256x4xf32> -> vector<256x4xf32>
    %31 = arith.addf %20, %30 : vector<256x4xf32>
    %cst_20 = arith.constant dense<0.000000e+00> : vector<4xf32>
    %32 = vector.multi_reduction <add>, %31, %cst_20 [0] : vector<256x4xf32> to vector<4xf32>
    %33 = vector.shape_cast %32 : vector<4xf32> to vector<1x4xf32>
    %cst_21 = arith.constant 2.560000e+02 : f32
    %34 = vector.broadcast %cst_21 : f32 to vector<1x4xf32>
    %35 = arith.divf %33, %34 : vector<1x4xf32>
    %36 = arith.mulf %31, %31 : vector<256x4xf32>
    %cst_22 = arith.constant dense<0.000000e+00> : vector<4xf32>
    %37 = vector.multi_reduction <add>, %36, %cst_22 [0] : vector<256x4xf32> to vector<4xf32>
    %38 = vector.shape_cast %37 : vector<4xf32> to vector<1x4xf32>
    %cst_23 = arith.constant 2.560000e+02 : f32
    %39 = vector.broadcast %cst_23 : f32 to vector<1x4xf32>
    %40 = arith.divf %38, %39 : vector<1x4xf32>
    %41 = arith.mulf %35, %35 : vector<1x4xf32>
    %42 = arith.subf %40, %41 : vector<1x4xf32>
    %43 = vector.broadcast %35 : vector<1x4xf32> to vector<256x4xf32>
    %44 = arith.subf %31, %43 : vector<256x4xf32>
    %cst_24 = arith.constant 9.99999974E-6 : f32
    %45 = vector.broadcast %cst_24 : f32 to vector<1x4xf32>
    %46 = arith.addf %42, %45 : vector<1x4xf32>
    %47 = math.rsqrt %46 : vector<1x4xf32>
    %48 = vector.broadcast %47 : vector<1x4xf32> to vector<256x4xf32>
    %49 = arith.mulf %44, %48 : vector<256x4xf32>
    %cst_25 = arith.constant 0.000000e+00 : f32
    %50 = vector.broadcast %cst_25 : f32 to vector<256x4xf32>
    %51 = arith.maximumf %49, %50 : vector<256x4xf32>
    %52 = arith.truncf %51 : vector<256x4xf32> to vector<256x4xbf16>
    %53 = vector.shape_cast %52 : vector<256x4xbf16> to vector<16x16x4xbf16>
    %c1_26 = arith.constant 1 : index
    %c1_27 = arith.constant 1 : index
    %c0_28 = arith.constant 0 : index
    %54 = vector.load %arg5[%c1_26, %c1_27, %c0_28] : memref<18x18x4xbf16, #tpu.memory_space<vmem>>, vector<16x16x4xbf16>
    tpu.vector_store %arg5[%c1_26, %c1_27, %c0_28], %53 {strides = array<i32>} : memref<18x18x4xbf16, #tpu.memory_space<vmem>>, vector<16x16x4xbf16>,
    %c1_29 = arith.constant 1 : index
    %c2_30 = arith.constant 2 : index
    %c0_31 = arith.constant 0 : index
    %55 = vector.load %arg5[%c1_29, %c2_30, %c0_31] : memref<18x18x4xbf16, #tpu.memory_space<vmem>>, vector<16x1x4xbf16>
    %c1_32 = arith.constant 1 : index
    %c0_33 = arith.constant 0 : index
    %c0_34 = arith.constant 0 : index
    %56 = vector.load %arg5[%c1_32, %c0_33, %c0_34] : memref<18x18x4xbf16, #tpu.memory_space<vmem>>, vector<16x1x4xbf16>
    tpu.vector_store %arg5[%c1_32, %c0_33, %c0_34], %55 {strides = array<i32>} : memref<18x18x4xbf16, #tpu.memory_space<vmem>>, vector<16x1x4xbf16>,
    %c1_35 = arith.constant 1 : index
    %c15 = arith.constant 15 : index
    %c0_36 = arith.constant 0 : index
    %57 = vector.load %arg5[%c1_35, %c15, %c0_36] : memref<18x18x4xbf16, #tpu.memory_space<vmem>>, vector<16x1x4xbf16>
    %c1_37 = arith.constant 1 : index
    %c17 = arith.constant 17 : index
    %c0_38 = arith.constant 0 : index
    %58 = vector.load %arg5[%c1_37, %c17, %c0_38] : memref<18x18x4xbf16, #tpu.memory_space<vmem>>, vector<16x1x4xbf16>
    tpu.vector_store %arg5[%c1_37, %c17, %c0_38], %57 {strides = array<i32>} : memref<18x18x4xbf16, #tpu.memory_space<vmem>>, vector<16x1x4xbf16>,
    %c2_39 = arith.constant 2 : index
    %c0_40 = arith.constant 0 : index
    %c0_41 = arith.constant 0 : index
    %59 = vector.load %arg5[%c2_39, %c0_40, %c0_41] : memref<18x18x4xbf16, #tpu.memory_space<vmem>>, vector<1x18x4xbf16>
    %c0_42 = arith.constant 0 : index
    %c0_43 = arith.constant 0 : index
    %c0_44 = arith.constant 0 : index
    %60 = vector.load %arg5[%c0_42, %c0_43, %c0_44] : memref<18x18x4xbf16, #tpu.memory_space<vmem>>, vector<1x18x4xbf16>
    tpu.vector_store %arg5[%c0_42, %c0_43, %c0_44], %59 {strides = array<i32>} : memref<18x18x4xbf16, #tpu.memory_space<vmem>>, vector<1x18x4xbf16>,
    %c15_45 = arith.constant 15 : index
    %c0_46 = arith.constant 0 : index
    %c0_47 = arith.constant 0 : index
    %61 = vector.load %arg5[%c15_45, %c0_46, %c0_47] : memref<18x18x4xbf16, #tpu.memory_space<vmem>>, vector<1x18x4xbf16>
    %c17_48 = arith.constant 17 : index
    %c0_49 = arith.constant 0 : index
    %c0_50 = arith.constant 0 : index
    %62 = vector.load %arg5[%c17_48, %c0_49, %c0_50] : memref<18x18x4xbf16, #tpu.memory_space<vmem>>, vector<1x18x4xbf16>
    tpu.vector_store %arg5[%c17_48, %c0_49, %c0_50], %61 {strides = array<i32>} : memref<18x18x4xbf16, #tpu.memory_space<vmem>>, vector<1x18x4xbf16>,
    %c0_51 = arith.constant 0 : index
    %c0_52 = arith.constant 0 : index
    %c0_53 = arith.constant 0 : index
    %63 = vector.load %arg5[%c0_51, %c0_52, %c0_53] : memref<18x18x4xbf16, #tpu.memory_space<vmem>>, vector<16x18x4xbf16>
    %64 = vector.extract_strided_slice %63 {offsets = [0, 0, 0], sizes = [16, 16, 4], strides = [1, 1, 1]} : vector<16x18x4xbf16> to vector<16x16x4xbf16>
    %65 = vector.extract_strided_slice %63 {offsets = [0, 1, 0], sizes = [16, 16, 4], strides = [1, 1, 1]} : vector<16x18x4xbf16> to vector<16x16x4xbf16>
    %66 = vector.extract_strided_slice %63 {offsets = [0, 2, 0], sizes = [16, 16, 4], strides = [1, 1, 1]} : vector<16x18x4xbf16> to vector<16x16x4xbf16>
    %67 = tpu.concatenate %64, %65, %66 in 2 : vector<16x16x4xbf16>, vector<16x16x4xbf16>, vector<16x16x4xbf16> -> vector<16x16x12xbf16>
    %68 = vector.shape_cast %67 : vector<16x16x12xbf16> to vector<256x12xbf16>
    %c0_54 = arith.constant 0 : index
    %c0_55 = arith.constant 0 : index
    %c0_56 = arith.constant 0 : index
    %69 = vector.load %arg3[%c0_54, %c0_55, %c0_56] : memref<3x12x4xbf16, #tpu.memory_space<vmem>>, vector<1x12x4xbf16>
    %70 = vector.shape_cast %69 : vector<1x12x4xbf16> to vector<12x4xbf16>
    %cst_57 = arith.constant dense<0.000000e+00> : vector<256x4xf32>
    %71 = tpu.matmul %68, %70, %cst_57 {dimension_numbers = #tpu.dot_dimension_numbers<[1], [0], [0], [1], [0, 0, 1, 1], [], []>} : vector<256x12xbf16>, vector<12x4xbf16>, vector<256x4xf32> -> vector<256x4xf32>
    %c1_58 = arith.constant 1 : index
    %c0_59 = arith.constant 0 : index
    %c0_60 = arith.constant 0 : index
    %72 = vector.load %arg5[%c1_58, %c0_59, %c0_60] : memref<18x18x4xbf16, #tpu.memory_space<vmem>>, vector<16x18x4xbf16>
    %73 = vector.extract_strided_slice %72 {offsets = [0, 0, 0], sizes = [16, 16, 4], strides = [1, 1, 1]} : vector<16x18x4xbf16> to vector<16x16x4xbf16>
    %74 = vector.extract_strided_slice %72 {offsets = [0, 1, 0], sizes = [16, 16, 4], strides = [1, 1, 1]} : vector<16x18x4xbf16> to vector<16x16x4xbf16>
    %75 = vector.extract_strided_slice %72 {offsets = [0, 2, 0], sizes = [16, 16, 4], strides = [1, 1, 1]} : vector<16x18x4xbf16> to vector<16x16x4xbf16>
    %76 = tpu.concatenate %73, %74, %75 in 2 : vector<16x16x4xbf16>, vector<16x16x4xbf16>, vector<16x16x4xbf16> -> vector<16x16x12xbf16>
    %77 = vector.shape_cast %76 : vector<16x16x12xbf16> to vector<256x12xbf16>
    %c1_61 = arith.constant 1 : index
    %c0_62 = arith.constant 0 : index
    %c0_63 = arith.constant 0 : index
    %78 = vector.load %arg3[%c1_61, %c0_62, %c0_63] : memref<3x12x4xbf16, #tpu.memory_space<vmem>>, vector<1x12x4xbf16>
    %79 = vector.shape_cast %78 : vector<1x12x4xbf16> to vector<12x4xbf16>
    %cst_64 = arith.constant dense<0.000000e+00> : vector<256x4xf32>
    %80 = tpu.matmul %77, %79, %cst_64 {dimension_numbers = #tpu.dot_dimension_numbers<[1], [0], [0], [1], [0, 0, 1, 1], [], []>} : vector<256x12xbf16>, vector<12x4xbf16>, vector<256x4xf32> -> vector<256x4xf32>
    %81 = arith.addf %71, %80 : vector<256x4xf32>
    %c2_65 = arith.constant 2 : index
    %c0_66 = arith.constant 0 : index
    %c0_67 = arith.constant 0 : index
    %82 = vector.load %arg5[%c2_65, %c0_66, %c0_67] : memref<18x18x4xbf16, #tpu.memory_space<vmem>>, vector<16x18x4xbf16>
    %83 = vector.extract_strided_slice %82 {offsets = [0, 0, 0], sizes = [16, 16, 4], strides = [1, 1, 1]} : vector<16x18x4xbf16> to vector<16x16x4xbf16>
    %84 = vector.extract_strided_slice %82 {offsets = [0, 1, 0], sizes = [16, 16, 4], strides = [1, 1, 1]} : vector<16x18x4xbf16> to vector<16x16x4xbf16>
    %85 = vector.extract_strided_slice %82 {offsets = [0, 2, 0], sizes = [16, 16, 4], strides = [1, 1, 1]} : vector<16x18x4xbf16> to vector<16x16x4xbf16>
    %86 = tpu.concatenate %83, %84, %85 in 2 : vector<16x16x4xbf16>, vector<16x16x4xbf16>, vector<16x16x4xbf16> -> vector<16x16x12xbf16>
    %87 = vector.shape_cast %86 : vector<16x16x12xbf16> to vector<256x12xbf16>
    %c2_68 = arith.constant 2 : index
    %c0_69 = arith.constant 0 : index
    %c0_70 = arith.constant 0 : index
    %88 = vector.load %arg3[%c2_68, %c0_69, %c0_70] : memref<3x12x4xbf16, #tpu.memory_space<vmem>>, vector<1x12x4xbf16>
    %89 = vector.shape_cast %88 : vector<1x12x4xbf16> to vector<12x4xbf16>
    %cst_71 = arith.constant dense<0.000000e+00> : vector<256x4xf32>
    %90 = tpu.matmul %87, %89, %cst_71 {dimension_numbers = #tpu.dot_dimension_numbers<[1], [0], [0], [1], [0, 0, 1, 1], [], []>} : vector<256x12xbf16>, vector<12x4xbf16>, vector<256x4xf32> -> vector<256x4xf32>
    %91 = arith.addf %81, %90 : vector<256x4xf32>
    %cst_72 = arith.constant dense<0.000000e+00> : vector<4xf32>
    %92 = vector.multi_reduction <add>, %91, %cst_72 [0] : vector<256x4xf32> to vector<4xf32>
    %93 = vector.shape_cast %92 : vector<4xf32> to vector<1x4xf32>
    %cst_73 = arith.constant 2.560000e+02 : f32
    %94 = vector.broadcast %cst_73 : f32 to vector<1x4xf32>
    %95 = arith.divf %93, %94 : vector<1x4xf32>
    %96 = arith.mulf %91, %91 : vector<256x4xf32>
    %cst_74 = arith.constant dense<0.000000e+00> : vector<4xf32>
    %97 = vector.multi_reduction <add>, %96, %cst_74 [0] : vector<256x4xf32> to vector<4xf32>
    %98 = vector.shape_cast %97 : vector<4xf32> to vector<1x4xf32>
    %cst_75 = arith.constant 2.560000e+02 : f32
    %99 = vector.broadcast %cst_75 : f32 to vector<1x4xf32>
    %100 = arith.divf %98, %99 : vector<1x4xf32>
    %101 = arith.mulf %95, %95 : vector<1x4xf32>
    %102 = arith.subf %100, %101 : vector<1x4xf32>
    %103 = vector.broadcast %95 : vector<1x4xf32> to vector<256x4xf32>
    %104 = arith.subf %91, %103 : vector<256x4xf32>
    %cst_76 = arith.constant 9.99999974E-6 : f32
    %105 = vector.broadcast %cst_76 : f32 to vector<1x4xf32>
    %106 = arith.addf %102, %105 : vector<1x4xf32>
    %107 = math.rsqrt %106 : vector<1x4xf32>
    %108 = vector.broadcast %107 : vector<1x4xf32> to vector<256x4xf32>
    %109 = arith.mulf %104, %108 : vector<256x4xf32>
    %c0_77 = arith.constant 0 : index
    %c1_78 = arith.constant 1 : index
    %c1_79 = arith.constant 1 : index
    %c0_80 = arith.constant 0 : index
    %110 = vector.load %arg1[%c0_77, %c1_78, %c1_79, %c0_80] : memref<1x18x18x4xbf16, #tpu.memory_space<vmem>>, vector<1x16x16x4xbf16>
    %111 = vector.shape_cast %110 : vector<1x16x16x4xbf16> to vector<16x16x4xbf16>
    %112 = arith.extf %111 : vector<16x16x4xbf16> to vector<16x16x4xf32>
    %113 = vector.shape_cast %112 : vector<16x16x4xf32> to vector<256x4xf32>
    %114 = arith.addf %113, %109 : vector<256x4xf32>
    %115 = vector.shape_cast %114 : vector<256x4xf32> to vector<16x16x4xf32>
    %c0_81 = arith.constant 0 : index
    %c0_82 = arith.constant 0 : index
    %c0_83 = arith.constant 0 : index
    %c0_84 = arith.constant 0 : index
    %116 = vector.load %arg4[%c0_81, %c0_82, %c0_83, %c0_84] : memref<1x16x16x4xf32, #tpu.memory_space<vmem>>, vector<1x16x16x4xf32>
    %117 = vector.shape_cast %116 : vector<1x16x16x4xf32> to vector<16x16x4xf32>
    %118 = vector.shape_cast %115 : vector<16x16x4xf32> to vector<1x16x16x4xf32>
    tpu.vector_store %arg4[%c0_81, %c0_82, %c0_83, %c0_84], %118 {strides = array<i32>} : memref<1x16x16x4xf32, #tpu.memory_space<vmem>>, vector<1x16x16x4xf32>,
    return
  }
  func.func @transform_0(%arg0: i32) -> (i32, i32, i32, i32) {
    %c0_i32 = arith.constant 0 : i32
    %c0_i32_0 = arith.constant 0 : i32
    %c0_i32_1 = arith.constant 0 : i32
    %c0_i32_2 = arith.constant 0 : i32
    return %arg0, %c0_i32, %c0_i32_0, %c0_i32_1 : i32, i32, i32, i32
  }
  func.func @transform_1(%arg0: i32) -> (i32, i32, i32) {
    %c0_i32 = arith.constant 0 : i32
    %c0_i32_0 = arith.constant 0 : i32
    %c0_i32_1 = arith.constant 0 : i32
    %c0_i32_2 = arith.constant 0 : i32
    return %c0_i32, %c0_i32_0, %c0_i32_1 : i32, i32, i32
  }
  func.func @transform_2(%arg0: i32) -> (i32, i32, i32) {
    %c0_i32 = arith.constant 0 : i32
    %c0_i32_0 = arith.constant 0 : i32
    %c0_i32_1 = arith.constant 0 : i32
    %c0_i32_2 = arith.constant 0 : i32
    return %c0_i32, %c0_i32_0, %c0_i32_1 : i32, i32, i32
  }
  func.func @transform_3(%arg0: i32) -> (i32, i32, i32, i32) {
    %c0_i32 = arith.constant 0 : i32
    %c0_i32_0 = arith.constant 0 : i32
    %c0_i32_1 = arith.constant 0 : i32
    %c0_i32_2 = arith.constant 0 : i32
    return %arg0, %c0_i32, %c0_i32_0, %c0_i32_1 : i32, i32, i32, i32
  }
}

</mosaic_0001>

<bundles_post_ra>
// kernel: tpu_custom_call.1
= control target key start
LH: loop header
LB: loop body
LE: loop exit
PB: predicated region body
PF: predicated region fallthrough
CT: control target
= control target key end

     0   :  { %s7759_s12 = smov 0   ;;  %s11154_s0 = inlined_call_operand.vmem [shape: bf16[2,18,18,4], index: 0, kind: input, shape index: {}]   ;;  %s11155_s1 = inlined_call_operand.vmem [shape: bf16[3,12,4], index: 1, kind: input, shape index: {}]   ;;  %s11156_s2 = inlined_call_operand.vmem [shape: bf16[3,12,4], index: 2, kind: input, shape index: {}]   ;;  %s11157_s3 = inlined_call_operand.vmem [shape: f32[2,16,16,4], index: 3, kind: output, shape index: {}]  }
   0x1 LB: > { %s6430_s13 = sadd.s32 4294967295, %s7735_s12   ;;  %p6434_p0 = scmp.ge.s32.totalorder %s7735_s12, 1  ;;  %s7735_s12 = sphi %s7759_s12, %s13_s12  }
   0x2   : > { %p137_p1 = scmp.lt.s32.totalorder %s7735_s12, 3 }
   0x4   : > { %p138_p2 = pnand %p6434_p0, %p137_p1 }
   0x6   : > { %141 = sbr.rel (%p138_p2) target bundleno = 1300 (0x514), region = 32 }
   0xd   : > { %p161_p3 = scmp.lt.s32.totalorder %s6430_s13, 1  ;;  %vm573_vm0 = vcmask 1046528   ;;  %v7534_v0 = vld [vmem:[%s11155_s1 + $0x8] sm:$0x3f]   ;;  %vm1308_vm1 = vcmask 1045504   ;;  %s7737_s20 = smov 8  }
   0xe   : > { %vm348_vm2 = vsmask.f32 7424  ;;  %7457 = vmatprep.subr.msk.bf16.mxu0 %vm1308_vm1, %v7534_v0  ;;  %v1310_v1 = vsel %vm1308_vm1, %v7534_v0, 0  ;;  %s7738_s21 = smov 4   ;;  %vm654_vm3 = vcmask 31744   ;;  %vm687_vm4 = vcmask 64512  }
   0xf   : > { %s11416_s13 = smov (!%p161_p3, %s6430_s13), 1  ;;  %7126 = vmatpush3.bf16.msra.mxu0 %v1310_v1  ;;  %vm1275_vm5 = vcmask 97280   ;;  %vm3148_vm6 = vcmask 27648   ;;  %vm3149_vm7 = vsmask.f32 7938  ;;  %vm3156_vm8 = vcmask 24576  }
  0x10   : > { %s7463_s14 = smul.u32 216, %s11416_s13  ;;  %vm2824_vm9 = vsmask.f32 256  ;;  %vm2825_vm10 = vsmask.f32 4368  ;;  %vm8933_vm13 = vmand %vm3148_vm6, %vm3149_vm7  ;;  %s6950_s5 = sshll.u32 %s11416_s13, 8 }
  0x11   : > { %vm8909_vm11 = vmor %vm2824_vm9, %vm2825_vm10  ;;  %s11041_s8 = scalar_lea.vmem %s11157_s3, %s6950_s5 }
  0x12   : > { %s7776_s19 = scalar_lea.vmem %s11154_s0, %s7463_s14  ;;  %vm8921_vm12 = vmand %vm3156_vm8, %vm2824_vm9 }
  0x13   : > { %v7474_v2 = vld [vmem:[%s7776_s19 + $0xc] sm:$0xff]   ;;  %v7475_v3 = vld [vmem:[%s7776_s19 + $0x14] ss:$0 sps:$4 sm:$0x11]   ;;  %v7476_v4 = vld [vmem:[%s7776_s19 + $0x18] sm:$0xff]  }
  0x14   : > { %v1123_v5 = vrot.slane %v7474_v2, 1  ;;  %v1124_v6 = vrot.slane %v7475_v3, 1  ;;  %v900_v7 = vshrl.u32 %v7474_v2, 16  ;;  %v902_v8 = vshll.u32 %v7474_v2, 16  ;;  %v7478_v19 = vld [vmem:[%s7776_s19 + $0x30] sm:$0xff]   ;;  %v7480_v27 = vld [vmem:[%s7776_s19 + $0x24] sm:$0xff]   ;;  %vm9034_vm14 = vmand %vm3156_vm8, %vm3149_vm7 }
  0x15   : > { %v907_v9 = vshll.u32 %v7475_v3, 16  ;;  %v7477_v10 = vld [vmem:[%s7776_s19 + $0x20] ss:$0 sps:$4 sm:$0x11]   ;;  %v1126_v11 = vrot.slane %v7476_v4, 1  ;;  %v912_v12 = vshrl.u32 %v7476_v4, 16 }
  0x16   : > { %v1125_v13 = vsel %vm573_vm0, %v1123_v5, %v1124_v6  ;;  %v904_v14 = vrot.slane %v902_v8, 1  ;;  %v914_v15 = vshll.u32 %v7476_v4, 16  ;;  %v1127_v17 = vrot.slane %v7477_v10, 1  ;;  %v7479_v22 = vld [vmem:[%s7776_s19 + $0x38] ss:$0 sps:$4 sm:$0x11]  }
  0x17   : > { %1171 = vrot.lane.b32.xlu1 %v1125_v13, %s7737_s20  ;;  %v909_v16 = vrot.slane %v907_v9, 1  ;;  %v919_v18 = vshll.u32 %v7477_v10, 16  ;;  %v936_v25 = vshrl.u32 %v7478_v19, 16  ;;  %v938_v26 = vshll.u32 %v7478_v19, 16  ;;  %v7793_v32 = vld [vmem:[%s7776_s19 + $0x48] sm:$0xff]   ;;  %v7799_v41 = vld [vmem:[%s7776_s19 + $0x3c] sm:$0xff]  }
  0x18   : > { %v905_v20 = vor.u32 %v904_v14, %v900_v7  ;;  %v916_v21 = vrot.slane %v914_v15, 1  ;;  %v1128_v23 = vsel %vm573_vm0, %v1126_v11, %v1127_v17  ;;  %v943_v30 = vshll.u32 %v7479_v22, 16  ;;  %v7481_v31 = vld [vmem:[%s7776_s19 + $0x2c] ss:$0 sps:$4 sm:$0x11]   ;;  %v7486_v59 = vld [vmem:[%s7776_s19 + $0x60] sm:$0xff]  }
  0x19   : > { %v921_v24 = vrot.slane %v919_v18, 1  ;;  %v940_v33 = vrot.slane %v938_v26, 1  ;;  %v924_v34 = vshrl.u32 %v7480_v27, 16  ;;  %v926_v35 = vshll.u32 %v7480_v27, 16  ;;  %v7814_v0 = vld [vmem:[%s7776_s19 + $0x54] sm:$0xff]  }
  0x1a   : > { %v910_v28 = vsel %vm348_vm2, %v905_v20, %v909_v16  ;;  %v917_v29 = vor.u32 %v916_v21, %v912_v12  ;;  %v1132_v36 = vrot.slane %v7478_v19, 1  ;;  %v945_v38 = vrot.slane %v943_v30, 1  ;;  %v7483_v46 = vld [vmem:[%s7776_s19 + $0x50] ss:$0 sps:$4 sm:$0x11]   ;;  %v7823_v11 = vld [vmem:[%s7776_s19 + $0x78] sm:$0xff]  }
  0x1b   : > { %1091 = vrot.lane.b32.xlu0 %v910_v28, %s7738_s21  ;;  %1173 = vrot.lane.b32.xlu1 %v1128_v23, %s7737_s20  ;;  %v931_v39 = vshll.u32 %v7481_v31, 16  ;;  %v1133_v40 = vrot.slane %v7479_v22, 1  ;;  %v941_v42 = vor.u32 %v940_v33, %v936_v25  ;;  %v928_v43 = vrot.slane %v926_v35, 1  ;;  %v7485_v55 = vld [vmem:[%s7776_s19 + $0x44] ss:$0 sps:$4 sm:$0x11]  }
  0x1c   : > { %v922_v37 = vsel %vm348_vm2, %v917_v29, %v921_v24  ;;  %v1129_v44 = vrot.slane %v7480_v27, 1  ;;  %v960_v47 = vshrl.u32 %v7793_v32, 16  ;;  %v962_v48 = vshll.u32 %v7793_v32, 16  ;;  %v7487_v2 = vld [vmem:[%s7776_s19 + $0x68] ss:$0 sps:$4 sm:$0x11]  }
  0x1d   : > { %v933_v45 = vrot.slane %v931_v39, 1  ;;  %v946_v49 = vsel %vm348_vm2, %v941_v42, %v945_v38  ;;  %v929_v50 = vor.u32 %v928_v43, %v924_v34  ;;  %v1130_v51 = vrot.slane %v7481_v31, 1  ;;  %v7489_v12 = vld [vmem:[%s7776_s19 + $0x5c] ss:$0 sps:$4 sm:$0x11]   ;;  %v7833_v22 = vld [vmem:[%s7776_s19 + $0x6c] sm:$0xff]  }
  0x1e   : > { %v948_v52 = vshrl.u32 %v7799_v41, 16  ;;  %v964_v53 = vrot.slane %v962_v48, 1  ;;  %v967_v54 = vshll.u32 %v7483_v46, 16  ;;  %v950_v56 = vshll.u32 %v7799_v41, 16  ;;  %v7845_v35 = vld [vmem:[%s7776_s19 + $0x90] sm:$0xff]  }
  0x1f   : > { %1093 = vrot.lane.b32.xlu0 %v922_v37, %s7738_s21  ;;  %1097 = vrot.lane.b32.xlu1 %v946_v49, %s7738_s21  ;;  %v934_v57 = vsel %vm348_vm2, %v929_v50, %v933_v45  ;;  %v1134_v58 = vsel %vm573_vm0, %v1132_v36, %v1133_v40  ;;  %v955_v63 = vshll.u32 %v7485_v55, 16  ;;  %v1138_v1 = vrot.slane %v7793_v32, 1  ;;  %v7491_v25 = vld [vmem:[%s7776_s19 + $0x80] ss:$0 sps:$4 sm:$0x11]  }
  0x20   : > { %v965_v60 = vor.u32 %v964_v53, %v960_v47  ;;  %v969_v61 = vrot.slane %v967_v54, 1  ;;  %v952_v62 = vrot.slane %v950_v56, 1  ;;  %v1131_v3 = vsel %vm573_vm0, %v1129_v44, %v1130_v51  ;;  %v7493_v33 = vld [vmem:[%s7776_s19 + $0x74] ss:$0 sps:$4 sm:$0x11]  }
  0x21   : > { %v957_v5 = vrot.slane %v955_v63, 1  ;;  %v1139_v6 = vrot.slane %v7483_v46, 1  ;;  %v984_v8 = vshrl.u32 %v7486_v59, 16  ;;  %v986_v9 = vshll.u32 %v7486_v59, 16  ;;  %v7857_v46 = vld [vmem:[%s7776_s19 + $0x84] sm:$0xff]  }
  0x22   : > { %v953_v4 = vor.u32 %v952_v62, %v948_v52  ;;  %v970_v7 = vsel %vm348_vm2, %v965_v60, %v969_v61  ;;  %v991_v10 = vshll.u32 %v7487_v2, 16  ;;  %v974_v13 = vshll.u32 %v7814_v0, 16  ;;  %v7852_v43 = vld [vmem:[%s7776_s19 + $0x98] ss:$0 sps:$4 sm:$0x11]   ;;  %v7871_v62 = vld [vmem:[%s7776_s19 + $0xa8] sm:$0xff]  }
  0x23   : > { %1095 = vrot.lane.b32.xlu0 %v934_v57, %s7738_s21  ;;  %1177 = vrot.lane.b32.xlu1 %v1134_v58, %s7737_s20  ;;  %v1135_v14 = vrot.slane %v7799_v41, 1  ;;  %v1136_v15 = vrot.slane %v7485_v55, 1  ;;  %v988_v16 = vrot.slane %v986_v9, 1  ;;  %v972_v17 = vshrl.u32 %v7814_v0, 16 }
  0x24   : > { %v958_v18 = vsel %vm348_vm2, %v953_v4, %v957_v5  ;;  %v993_v19 = vrot.slane %v991_v10, 1  ;;  %v976_v20 = vrot.slane %v974_v13, 1  ;;  %v979_v21 = vshll.u32 %v7489_v12, 16  ;;  %v7497_v58 = vld [vmem:[%s7776_s19 + $0x8c] ss:$0 sps:$4 sm:$0x11]  }
  0x25   : > { %v1140_v23 = vsel %vm573_vm0, %v1138_v1, %v1139_v6  ;;  %v989_v24 = vor.u32 %v988_v16, %v984_v8  ;;  %v1010_v26 = vshll.u32 %v7823_v11, 16  ;;  %v1144_v27 = vrot.slane %v7486_v59, 1  ;;  %v7499_v9 = vld [vmem:[%s7776_s19 + $0xb0] ss:$0 sps:$4 sm:$0x11]  }
  0x26   : > { %v1145_v28 = vrot.slane %v7487_v2, 1  ;;  %v1008_v29 = vshrl.u32 %v7823_v11, 16  ;;  %v1137_v30 = vsel %vm573_vm0, %v1135_v14, %v1136_v15  ;;  %v977_v31 = vor.u32 %v976_v20, %v972_v17  ;;  %v7877_v2 = vld [vmem:[%s7776_s19 + $0x9c] sm:$0xff]   ;;  %v7501_v17 = vld [vmem:[%s7776_s19 + $0xa4] ss:$0 sps:$4 sm:$0x11]  }
  0x27   : > { %1175 = vrot.lane.b32.xlu0 %v1131_v3, %s7737_s20  ;;  %1101 = vrot.lane.b32.xlu1 %v970_v7, %s7738_s21  ;;  %v981_v32 = vrot.slane %v979_v21, 1  ;;  %v998_v34 = vshll.u32 %v7833_v22, 16  ;;  %v994_v36 = vsel %vm348_vm2, %v989_v24, %v993_v19  ;;  %v1012_v37 = vrot.slane %v1010_v26, 1 }
  0x28   : > { %v1015_v38 = vshll.u32 %v7491_v25, 16  ;;  %v1141_v39 = vrot.slane %v7814_v0, 1  ;;  %v1142_v40 = vrot.slane %v7489_v12, 1  ;;  %v996_v41 = vshrl.u32 %v7833_v22, 16 }
  0x29   : > { %v1003_v42 = vshll.u32 %v7493_v33, 16  ;;  %v982_v44 = vsel %vm348_vm2, %v977_v31, %v981_v32  ;;  %v1000_v45 = vrot.slane %v998_v34, 1  ;;  %v1146_v47 = vsel %vm573_vm0, %v1144_v27, %v1145_v28  ;;  %v7900_v27 = vld [vmem:[%s7776_s19 + $0xb4] sm:$0xff]  }
  0x2a   : > { %v1013_v48 = vor.u32 %v1012_v37, %v1008_v29  ;;  %v1017_v49 = vrot.slane %v1015_v38, 1  ;;  %v1034_v50 = vshll.u32 %v7845_v35, 16  ;;  %v1150_v51 = vrot.slane %v7823_v11, 1  ;;  %v7505_v37 = vld [vmem:[%s7776_s19 + $0xbc] ss:$0 sps:$4 sm:$0x11]  }
  0x2b   : > { %1099 = vrot.lane.b32.xlu0 %v958_v18, %s7738_s21  ;;  %1181 = vrot.lane.b32.xlu1 %v1140_v23, %s7737_s20  ;;  %v1005_v52 = vrot.slane %v1003_v42, 1  ;;  %v1151_v53 = vrot.slane %v7491_v25, 1  ;;  %v1032_v54 = vshrl.u32 %v7845_v35, 16  ;;  %v1039_v55 = vshll.u32 %v7852_v43, 16 }
  0x2c   : > { %v1143_v56 = vsel %vm573_vm0, %v1141_v39, %v1142_v40  ;;  %v1001_v57 = vor.u32 %v1000_v45, %v996_v41  ;;  %v1022_v59 = vshll.u32 %v7857_v46, 16  ;;  %v1018_v60 = vsel %vm348_vm2, %v1013_v48, %v1017_v49 }
  0x2d   : > { %v1036_v61 = vrot.slane %v1034_v50, 1  ;;  %v1147_v63 = vrot.slane %v7833_v22, 1  ;;  %v1148_v0 = vrot.slane %v7493_v33, 1  ;;  %v1020_v1 = vshrl.u32 %v7857_v46, 16  ;;  %v7894_v22 = vld [vmem:[%s7776_s19 + $0xc0] sm:$0xff]  }
  0x2e   : > { %v1006_v3 = vsel %vm348_vm2, %v1001_v57, %v1005_v52  ;;  %v1041_v4 = vrot.slane %v1039_v55, 1  ;;  %v1024_v5 = vrot.slane %v1022_v59, 1  ;;  %v1027_v6 = vshll.u32 %v7497_v58, 16 }
  0x2f   : > { %1179 = vrot.lane.b32.xlu0 %v1137_v30, %s7737_s20  ;;  %1105 = vrot.lane.b32.xlu1 %v994_v36, %s7738_s21  ;;  %v1152_v7 = vsel %vm573_vm0, %v1150_v51, %v1151_v53  ;;  %v1037_v8 = vor.u32 %v1036_v61, %v1032_v54  ;;  %v1058_v10 = vshll.u32 %v7871_v62, 16  ;;  %v1156_v11 = vrot.slane %v7845_v35, 1  ;;  %v7503_v30 = vld [vmem:[%s7776_s19 + $0xc8] ss:$0 sps:$4 sm:$0x11]   ;;  %v7925_v54 = vld [vmem:[%s7776_s19] sm:$0xff]  }
  0x30   : > { %v1157_v12 = vrot.slane %v7852_v43, 1  ;;  %v1046_v13 = vshll.u32 %v7877_v2, 16  ;;  %v1149_v14 = vsel %vm573_vm0, %v1147_v63, %v1148_v0  ;;  %v1025_v15 = vor.u32 %v1024_v5, %v1020_v1  ;;  %v7507_v53 = vld [vmem:[%s7776_s19 + $0x14] ss:$0 sps:$4 sm:$0x11]  }
  0x31   : > { %v1029_v16 = vrot.slane %v1027_v6, 1  ;;  %v1042_v18 = vsel %vm348_vm2, %v1037_v8, %v1041_v4  ;;  %v1056_v19 = vshrl.u32 %v7871_v62, 16  ;;  %v1060_v20 = vrot.slane %v1058_v10, 1  ;;  %v7509_v61 = vld [vmem:[%s7776_s19 + $0x8] ss:$0 sps:$4 sm:$0x11]  }
  0x32   : > { %v1063_v21 = vshll.u32 %v7499_v9, 16  ;;  %v1153_v23 = vrot.slane %v7857_v46, 1  ;;  %v1154_v24 = vrot.slane %v7497_v58, 1  ;;  %v1044_v25 = vshrl.u32 %v7877_v2, 16  ;;  %v7916_v46 = vld [vmem:[%s7776_s19 + $0xc] sm:$0xff]   ;;  %v7938_v6 = vld [vmem:[%s7776_s19 + $0x24] sm:$0xff]  }
  0x33   : > { %1103 = vrot.lane.b32.xlu0 %v982_v44, %s7738_s21  ;;  %1185 = vrot.lane.b32.xlu1 %v1146_v47, %s7737_s20  ;;  %v1048_v26 = vrot.slane %v1046_v13, 1  ;;  %v1030_v28 = vsel %vm348_vm2, %v1025_v15, %v1029_v16  ;;  %v1051_v29 = vshll.u32 %v7501_v17, 16  ;;  %v1158_v31 = vsel %vm573_vm0, %v1156_v11, %v1157_v12 }
  0x34   : > { %v1061_v32 = vor.u32 %v1060_v20, %v1056_v19  ;;  %v1065_v33 = vrot.slane %v1063_v21, 1  ;;  %v1082_v34 = vshll.u32 %v7894_v22, 16  ;;  %v1155_v35 = vsel %vm573_vm0, %v1153_v23, %v1154_v24  ;;  %v7513_v21 = vld [vmem:[%s7776_s19 + $0x20] ss:$0 sps:$4 sm:$0x11]  }
  0x35   : > { %v1162_v36 = vrot.slane %v7871_v62, 1  ;;  %v1049_v38 = vor.u32 %v1048_v26, %v1044_v25  ;;  %v1053_v39 = vrot.slane %v1051_v29, 1  ;;  %v1163_v40 = vrot.slane %v7499_v9, 1 }
  0x36   : > { %v1070_v41 = vshll.u32 %v7900_v27, 16  ;;  %v1066_v42 = vsel %vm348_vm2, %v1061_v32, %v1065_v33  ;;  %v1080_v43 = vshrl.u32 %v7894_v22, 16  ;;  %v1084_v44 = vrot.slane %v1082_v34, 1 }
  0x37   : > { %1183 = vrot.lane.b32.xlu0 %v1143_v56, %s7737_s20  ;;  %1109 = vrot.lane.b32.xlu1 %v1018_v60, %s7738_s21  ;;  %v1087_v45 = vshll.u32 %v7503_v30, 16  ;;  %v1159_v47 = vrot.slane %v7877_v2, 1  ;;  %v1160_v48 = vrot.slane %v7501_v17, 1  ;;  %v1075_v49 = vshll.u32 %v7505_v37, 16 }
  0x38   : > { %v1054_v50 = vsel %vm348_vm2, %v1049_v38, %v1053_v39  ;;  %v1068_v51 = vshrl.u32 %v7900_v27, 16  ;;  %v1072_v52 = vrot.slane %v1070_v41, 1  ;;  %v1164_v55 = vsel %vm573_vm0, %v1162_v36, %v1163_v40  ;;  %v7511_v17 = vld [vmem:[%s7776_s19 + $0x2c] ss:$0 sps:$4 sm:$0x11]   ;;  %v7971_v38 = vld [vmem:[%s7776_s19 + $0x30] sm:$0xff]  }
  0x39   : > { %v1085_v56 = vor.u32 %v1084_v44, %v1080_v43  ;;  %v1089_v57 = vrot.slane %v1087_v45, 1  ;;  %v364_v58 = vshll.u32 %v7916_v46, 16  ;;  %v1168_v59 = vrot.slane %v7894_v22, 1 }
  0x3a   : > { %v1077_v60 = vrot.slane %v1075_v49, 1  ;;  %v1161_v62 = vsel %vm573_vm0, %v1159_v47, %v1160_v48  ;;  %v1073_v63 = vor.u32 %v1072_v52, %v1068_v51  ;;  %v369_v0 = vshll.u32 %v7507_v53, 16 }
  0x3b   : > { %1107 = vrot.lane.b32.xlu0 %v1006_v3, %s7738_s21  ;;  %1189 = vrot.lane.b32.xlu1 %v1152_v7, %s7737_s20  ;;  %v352_v1 = vshll.u32 %v7925_v54, 16  ;;  %v1090_v2 = vsel %vm348_vm2, %v1085_v56, %v1089_v57  ;;  %v1169_v3 = vrot.slane %v7503_v30, 1  ;;  %v362_v4 = vshrl.u32 %v7916_v46, 16  ;;  %v7960_v30 = vld [vmem:[%s7776_s19 + $0x3c] sm:$0xff]  }
  0x3c   : > { %v366_v5 = vrot.slane %v364_v58, 1  ;;  %v1165_v7 = vrot.slane %v7900_v27, 1  ;;  %v1166_v8 = vrot.slane %v7505_v37, 1  ;;  %v350_v9 = vshrl.u32 %v7925_v54, 16 }
  0x3d   : > { %v1078_v10 = vsel %vm348_vm2, %v1073_v63, %v1077_v60  ;;  %v371_v11 = vrot.slane %v369_v0, 1  ;;  %v354_v12 = vrot.slane %v352_v1, 1  ;;  %v357_v13 = vshll.u32 %v7509_v61, 16  ;;  %v7519_v1 = vld [vmem:[%s7776_s19 + $0x5c] ss:$0 sps:$4 sm:$0x11]  }
  0x3e   : > { %v1170_v15 = vsel %vm573_vm0, %v1168_v59, %v1169_v3  ;;  %v367_v16 = vor.u32 %v366_v5, %v362_v4  ;;  %v1167_v19 = vsel %vm573_vm0, %v1165_v7, %v1166_v8  ;;  %v577_v20 = vrot.slane %v7916_v46, 1  ;;  %v7991_v59 = vld [vmem:[%s7776_s19 + $0x48] sm:$0xff]   ;;  %v7521_v8 = vld [vmem:[%s7776_s19 + $0x50] ss:$0 sps:$4 sm:$0x11]  }
  0x3f   : > { %1187 = vrot.lane.b32.xlu0 %v1149_v14, %s7737_s20  ;;  %1113 = vrot.lane.b32.xlu1 %v1042_v18, %s7738_s21  ;;  %v7946_v14 = vld [vmem:[%s7776_s19 + $0x18] sm:$0xff]   ;;  %v388_v18 = vshll.u32 %v7938_v6, 16  ;;  %v355_v22 = vor.u32 %v354_v12, %v350_v9  ;;  %v359_v23 = vrot.slane %v357_v13, 1  ;;  %v578_v24 = vrot.slane %v7507_v53, 1 }
  0x40   : > { %v376_v25 = vshll.u32 %v7946_v14, 16  ;;  %v372_v26 = vsel %vm348_vm2, %v367_v16, %v371_v11  ;;  %v386_v27 = vshrl.u32 %v7938_v6, 16  ;;  %v393_v29 = vshll.u32 %v7511_v17, 16 }
  0x41   : > { %v574_v32 = vrot.slane %v7925_v54, 1  ;;  %v381_v33 = vshll.u32 %v7513_v21, 16  ;;  %v360_v34 = vsel %vm348_vm2, %v355_v22, %v359_v23  ;;  %v374_v36 = vshrl.u32 %v7946_v14, 16  ;;  %v7985_v54 = vld [vmem:[%s7776_s19 + $0x54] sm:$0xff]   ;;  %v8024_v23 = vld [vmem:[%s11155_s1] sm:$0x3f]  }
  0x42   : > { %v378_v37 = vrot.slane %v376_v25, 1  ;;  %v579_v39 = vsel %vm573_vm0, %v577_v20, %v578_v24  ;;  %v395_v41 = vrot.slane %v393_v29, 1  ;;  %v583_v43 = vrot.slane %v7938_v6, 1  ;;  %7458 = vmatprep.subr.msk.bf16.mxu0 %vm1308_vm1, %v8024_v23 }
  0x43   : > { %1111 = vrot.lane.b32.xlu0 %v1030_v28, %s7738_s21  ;;  %1193 = vrot.lane.b32.xlu1 %v1158_v31, %s7737_s20  ;;  %v390_v28 = vrot.slane %v388_v18, 1  ;;  %v7963_v31 = vld [vmem:[%s7776_s19 + $0x44] ss:$0 sps:$4 sm:$0x11]   ;;  %v383_v44 = vrot.slane %v381_v33, 1  ;;  %v584_v45 = vrot.slane %v7511_v17, 1 }
  0x44   : > { %v410_v46 = vshrl.u32 %v7960_v30, 16  ;;  %v417_v47 = vshll.u32 %v7963_v31, 16  ;;  %v379_v49 = vor.u32 %v378_v37, %v374_v36  ;;  %v400_v51 = vshll.u32 %v7971_v38, 16  ;;  %v8014_v18 = vld [vmem:[%s7776_s19 + $0x74] ss:$0 sps:$4 sm:$0x11]  }
  0x45   : > { %v391_v40 = vor.u32 %v390_v28, %v386_v27  ;;  %v581_v56 = vrot.slane %v7513_v21, 1  ;;  %v398_v58 = vshrl.u32 %v7971_v38, 16  ;;  %v585_v63 = vsel %vm573_vm0, %v583_v43, %v584_v45 }
  0x46   : > { %v419_v57 = vrot.slane %v417_v47, 1  ;;  %v384_v60 = vsel %vm348_vm2, %v379_v49, %v383_v44  ;;  %v589_v4 = vrot.slane %v7960_v30, 1  ;;  %v590_v7 = vrot.slane %v7963_v31, 1  ;;  %v8046_v44 = vld [vmem:[%s7776_s19 + $0x78] sm:$0xff]  }
  0x47   : > { %1191 = vrot.lane.b32.xlu0 %v1155_v35, %s7737_s20  ;;  %1117 = vrot.lane.b32.xlu1 %v1066_v42, %s7738_s21  ;;  %v575_v35 = vrot.slane %v7509_v61, 1  ;;  %v412_v42 = vshll.u32 %v7960_v30, 16  ;;  %v396_v52 = vsel %vm348_vm2, %v391_v40, %v395_v41  ;;  %v402_v61 = vrot.slane %v400_v51, 1  ;;  %v7525_v30 = vld [vmem:[%s7776_s19 + $0x68] ss:$0 sps:$4 sm:$0x11]  }
  0x48   : > { %v424_v9 = vshll.u32 %v7991_v59, 16  ;;  %v434_v11 = vshrl.u32 %v7985_v54, 16  ;;  %v441_v13 = vshll.u32 %v7519_v1, 16  ;;  %v422_v17 = vshrl.u32 %v7991_v59, 16 }
  0x49   : > { %v576_v48 = vsel %vm573_vm0, %v574_v32, %v575_v35  ;;  %v414_v53 = vrot.slane %v412_v42, 1  ;;  %v403_v5 = vor.u32 %v402_v61, %v398_v58  ;;  %v429_v22 = vshll.u32 %v7521_v8, 16  ;;  %v7527_v47 = vld [vmem:[%s7776_s19 + $0x8c] ss:$0 sps:$4 sm:$0x11]  }
  0x4a   : > { %v426_v21 = vrot.slane %v424_v9, 1  ;;  %v591_v24 = vsel %vm573_vm0, %v589_v4, %v590_v7  ;;  %v595_v29 = vrot.slane %v7985_v54, 1  ;;  %v596_v33 = vrot.slane %v7519_v1, 1  ;;  %v8071_v7 = vld [vmem:[%s7776_s19 + $0x90] sm:$0xff]  }
  0x4b   : > { %1115 = vrot.lane.b32.xlu0 %v1054_v50, %s7738_s21  ;;  %1197 = vrot.lane.b32.xlu1 %v1164_v55, %s7737_s20  ;;  %v7517_v50 = vld [vmem:[%s7776_s19 + $0x38] ss:$0 sps:$4 sm:$0x11]   ;;  %v580_v55 = vrot.slane %v7946_v14, 1  ;;  %v415_v0 = vor.u32 %v414_v53, %v410_v46  ;;  %v8008_v14 = vld [vmem:[%s7776_s19 + $0x6c] sm:$0xff]   ;;  %v431_v32 = vrot.slane %v429_v22, 1 }
  0x4c   : > { %v587_v16 = vrot.slane %v7517_v50, 1  ;;  %v460_v27 = vshll.u32 %v8008_v14, 16  ;;  %v427_v31 = vor.u32 %v426_v21, %v422_v17  ;;  %v458_v36 = vshrl.u32 %v8008_v14, 16 }
  0x4d   : > { %v582_v3 = vsel %vm573_vm0, %v580_v55, %v581_v56  ;;  %v592_v40 = vrot.slane %v7991_v59, 1  ;;  %v593_v41 = vrot.slane %v7521_v8, 1  ;;  %v453_v43 = vshll.u32 %v7525_v30, 16 }
  0x4e   : > { %v462_v37 = vrot.slane %v460_v27, 1  ;;  %v432_v45 = vsel %vm348_vm2, %v427_v31, %v431_v32  ;;  %v601_v53 = vrot.slane %v8008_v14, 1  ;;  %v472_v58 = vshll.u32 %v8046_v44, 16  ;;  %v7533_v14 = vld [vmem:[%s7776_s19 + $0x98] ss:$0 sps:$4 sm:$0x11]  }
  0x4f   : > { %1195 = vrot.lane.b32.xlu0 %v1161_v62, %s7737_s20  ;;  %1121 = vrot.lane.b32.xlu1 %v1090_v2, %s7738_s21  ;;  %v405_v62 = vshll.u32 %v7517_v50, 16  ;;  %v436_v2 = vshll.u32 %v7985_v54, 16  ;;  %v7529_v54 = vld [vmem:[%s7776_s19 + $0x80] ss:$0 sps:$4 sm:$0x11]   ;;  %v594_v55 = vsel %vm573_vm0, %v592_v40, %v593_v41  ;;  %v599_v1 = vrot.slane %v7525_v30, 1 }
  0x50   : > { %v463_v49 = vor.u32 %v462_v37, %v458_v36  ;;  %v608_v17 = vrot.slane %v7527_v47, 1  ;;  %v501_v27 = vshll.u32 %v7533_v14, 16  ;;  %v494_v30 = vshrl.u32 %v8071_v7, 16  ;;  %v8096_v32 = vld [vmem:[%s7776_s19 + $0xa8] sm:$0xff]  }
  0x51   : > { %v407_v6 = vrot.slane %v405_v62, 1  ;;  %v438_v12 = vrot.slane %v436_v2, 1  ;;  %v470_v2 = vshrl.u32 %v8046_v44, 16  ;;  %v8104_v41 = vld [vmem:[%s7776_s19 + $0x24] sm:$0xff]  }
  0x53   : > { %1119 = vrot.lane.b32.xlu0 %v1078_v10, %s7738_s21  ;;  %1201 = vrot.lane.b32.xlu1 %v1170_v15, %s7737_s20  ;;  %v420_v10 = vsel %vm348_vm2, %v415_v0, %v419_v57  ;;  %v586_v15 = vrot.slane %v7971_v38, 1  ;;  %v408_v20 = vsel %vm348_vm2, %v403_v5, %v407_v6  ;;  %v439_v25 = vor.u32 %v438_v12, %v434_v11 }
  0x54   : > { %v465_v38 = vshll.u32 %v8014_v18, 16  ;;  %v489_v57 = vshll.u32 %v7527_v47, 16  ;;  %v474_v5 = vrot.slane %v472_v58, 1  ;;  %v477_v6 = vshll.u32 %v7529_v54, 16 }
  0x55   : > { %v588_v28 = vsel %vm573_vm0, %v586_v15, %v587_v16 }
  0x56   : > { %v467_v50 = vrot.slane %v465_v38, 1  ;;  %v491_v4 = vrot.slane %v489_v57, 1  ;;  %v475_v15 = vor.u32 %v474_v5, %v470_v2  ;;  %v479_v16 = vrot.slane %v477_v6, 1 }
  0x57   : > { %1199 = vrot.lane.b32.xlu0 %v1167_v19, %s7737_s20  ;;  %543 = vrot.lane.b32.xlu1 %v372_v26, %s7738_s21  ;;  %v8017_v19 = vld [vmem:[%s7776_s19 + $0x60] sm:$0xff]   ;;  %v443_v26 = vrot.slane %v441_v13, 1  ;;  %v503_v38 = vrot.slane %v501_v27, 1 }
  0x58   : > { %v446_v42 = vshrl.u32 %v8017_v19, 16  ;;  %v468_v59 = vsel %vm348_vm2, %v463_v49, %v467_v50  ;;  %v598_v0 = vrot.slane %v8017_v19, 1  ;;  %v610_v49 = vrot.slane %v8071_v7, 1 }
  0x59   : > { %v444_v35 = vsel %vm348_vm2, %v439_v25, %v443_v26  ;;  %v8088_v25 = vld [vmem:[%s7776_s19 + $0xbc] ss:$0 sps:$4 sm:$0x11]   ;;  %v604_v26 = vrot.slane %v8046_v44, 1  ;;  %v611_v50 = vrot.slane %v7533_v14, 1  ;;  %v7676_v14 = vld [vmem:[%s7776_s19 + $0xc] sm:$0xff]  }
  0x5a   : > { %v600_v12 = vsel %vm573_vm0, %v598_v0, %v599_v1  ;;  %v537_v40 = vshll.u32 %v8088_v25, 16  ;;  %v8109_v44 = vld [vmem:[%s7776_s19 + $0xb0] ss:$0 sps:$4 sm:$0x11]   ;;  %v620_v5 = vrot.slane %v8088_v25, 1 }
  0x5b   : > { %541 = vrot.lane.b32.xlu0 %v360_v34, %s7738_s21  ;;  %624 = vrot.lane.b32.xlu1 %v579_v39, %s7737_s20  ;;  %v448_v34 = vshll.u32 %v8017_v19, 16  ;;  %v8040_v39 = vld [vmem:[%s7776_s19 + $0x84] sm:$0xff]   ;;  %v612_v0 = vsel %vm573_vm0, %v610_v49, %v611_v50  ;;  %v617_v25 = vrot.slane %v8109_v44, 1  ;;  %v8181_v50 = vld [vmem:[%s7776_s19 + $0x54] sm:$0xff]  }
  0x5c   : > { %v484_v51 = vshll.u32 %v8040_v39, 16  ;;  %v482_v61 = vshrl.u32 %v8040_v39, 16  ;;  %v607_v13 = vrot.slane %v8040_v39, 1 }
  0x5d   : > { %v450_v46 = vrot.slane %v448_v34, 1 }
  0x5e   : > { %v486_v62 = vrot.slane %v484_v51, 1  ;;  %v539_v51 = vrot.slane %v537_v40, 1 }
  0x5f   : > { %622 = vrot.lane.b32.xlu0 %v576_v48, %s7737_s20  ;;  %547 = vrot.lane.b32.xlu1 %v396_v52, %s7738_s21  ;;  %v597_v48 = vsel %vm573_vm0, %v595_v29, %v596_v33  ;;  %v455_v52 = vrot.slane %v453_v43, 1  ;;  %v451_v56 = vor.u32 %v450_v46, %v446_v42  ;;  %v605_v29 = vrot.slane %v7529_v54, 1 }
  0x60   : > { %v487_v9 = vor.u32 %v486_v62, %v482_v61  ;;  %v609_v33 = vsel %vm573_vm0, %v607_v13, %v608_v17  ;;  %v1866_v61 = vshll.u32 %v8104_v41, 16  ;;  %v8129_v62 = vld [vmem:[%s7776_s19 + $0x20] ss:$0 sps:$4 sm:$0x11]  }
  0x61   : > { %v606_v42 = vsel %vm573_vm0, %v604_v26, %v605_v29  ;;  %v8141_v13 = vld [vmem:[%s7776_s19 + $0x3c] sm:$0xff]   ;;  %v8158_v26 = vld [vmem:[%s7776_s19 + $0x30] sm:$0xff]  }
  0x62   : > { %v492_v19 = vsel %vm348_vm2, %v487_v9, %v491_v4 }
  0x63   : > { %545 = vrot.lane.b32.xlu0 %v384_v60, %s7738_s21  ;;  %628 = vrot.lane.b32.xlu1 %v585_v63, %s7737_s20  ;;  %v602_v60 = vrot.slane %v8014_v18, 1  ;;  %v8063_v63 = vld [vmem:[%s7776_s19 + $0x9c] sm:$0xff]   ;;  %v496_v18 = vshll.u32 %v8071_v7, 16 }
  0x64   : > { %v508_v11 = vshll.u32 %v8063_v63, 16  ;;  %v613_v37 = vrot.slane %v8063_v63, 1 }
  0x65   : > { %v603_v8 = vsel %vm573_vm0, %v601_v53, %v602_v60  ;;  %v498_v31 = vrot.slane %v496_v18, 1  ;;  %v8118_v53 = vld [vmem:[%s7776_s19 + $0x18] sm:$0xff]   ;;  %v8125_v60 = vld [vmem:[%s7776_s19 + $0x2c] ss:$0 sps:$4 sm:$0x11]  }
  0x66   : > { %v510_v21 = vrot.slane %v508_v11, 1  ;;  %v1854_v1 = vshll.u32 %v8118_v53, 16  ;;  %v1868_v11 = vrot.slane %v1866_v61, 1  ;;  %v1852_v18 = vshrl.u32 %v8118_v53, 16 }
  0x67   : > { %626 = vrot.lane.b32.xlu0 %v582_v3, %s7737_s20  ;;  %551 = vrot.lane.b32.xlu1 %v420_v10, %s7738_s21  ;;  %v456_v3 = vsel %vm348_vm2, %v451_v56, %v455_v52  ;;  %v7531_v10 = vld [vmem:[%s7776_s19 + $0xa4] ss:$0 sps:$4 sm:$0x11]   ;;  %v499_v43 = vor.u32 %v498_v31, %v494_v30  ;;  %v518_v52 = vshrl.u32 %v8096_v32, 16  ;;  %v525_v56 = vshll.u32 %v8109_v44, 16 }
  0x68   : > { %v513_v22 = vshll.u32 %v7531_v10, 16  ;;  %v614_v39 = vrot.slane %v7531_v10, 1  ;;  %v1864_v10 = vshrl.u32 %v8104_v41, 16  ;;  %v1890_v31 = vshll.u32 %v8141_v13, 16 }
  0x69   : > { %v504_v54 = vsel %vm348_vm2, %v499_v43, %v503_v38  ;;  %v8174_v44 = vld [vmem:[%s7776_s19 + $0x38] ss:$0 sps:$4 sm:$0x11]  }
  0x6a   : > { %v615_v58 = vsel %vm573_vm0, %v613_v37, %v614_v39  ;;  %v1869_v29 = vor.u32 %v1868_v11, %v1864_v10  ;;  %v2078_v37 = vrot.slane %v8104_v41, 1  ;;  %v1892_v49 = vrot.slane %v1890_v31, 1 }
  0x6b   : > { %549 = vrot.lane.b32.xlu0 %v408_v20, %s7738_s21  ;;  %632 = vrot.lane.b32.xlu1 %v591_v24, %s7737_s20  ;;  %v506_v20 = vshrl.u32 %v8063_v63, 16  ;;  %v8085_v24 = vld [vmem:[%s7776_s19 + $0xb4] sm:$0xff]   ;;  %v2081_v31 = vrot.slane %v8158_v26, 1 }
  0x6c   : > { %v532_v36 = vshll.u32 %v8085_v24, 16  ;;  %v530_v47 = vshrl.u32 %v8085_v24, 16  ;;  %v619_v4 = vrot.slane %v8085_v24, 1 }
  0x6d   : > { %v511_v34 = vor.u32 %v510_v21, %v506_v20  ;;  %v1859_v20 = vshll.u32 %v8129_v62, 16  ;;  %v8151_v21 = vld [vmem:[%s7776_s19 + $0x44] ss:$0 sps:$4 sm:$0x11]  }
  0x6f   : > { %630 = vrot.lane.b32.xlu0 %v588_v28, %s7737_s20  ;;  %555 = vrot.lane.b32.xlu1 %v444_v35, %s7738_s21  ;;  %v480_v28 = vsel %vm348_vm2, %v475_v15, %v479_v16  ;;  %v515_v35 = vrot.slane %v513_v22, 1  ;;  %v616_v16 = vrot.slane %v8096_v32, 1  ;;  %v1861_v40 = vrot.slane %v1859_v20, 1 }
  0x71   : > { %v516_v46 = vsel %vm348_vm2, %v511_v34, %v515_v35  ;;  %v618_v43 = vsel %vm573_vm0, %v616_v16, %v617_v25  ;;  %v1912_v25 = vshrl.u32 %v8181_v50, 16 }
  0x73   : > { %553 = vrot.lane.b32.xlu0 %v432_v45, %s7738_s21  ;;  %636 = vrot.lane.b32.xlu1 %v597_v48, %s7737_s20  ;;  %v520_v45 = vshll.u32 %v8096_v32, 16  ;;  %v534_v48 = vrot.slane %v532_v36, 1  ;;  %v1511_v36 = vsel %vm1308_vm1, %v8024_v23, 0  ;;  %v1878_v23 = vshll.u32 %v8158_v26, 16 }
  0x75   : > { %v1880_v61 = vrot.slane %v1878_v23, 1 }
  0x77   : > { %634 = vrot.lane.b32.xlu0 %v594_v55, %s7737_s20  ;;  %559 = vrot.lane.b32.xlu1 %v468_v59, %s7738_s21  ;;  %v522_v55 = vrot.slane %v520_v45, 1  ;;  %v535_v59 = vor.u32 %v534_v48, %v530_v47  ;;  %v2079_v47 = vrot.slane %v8125_v60, 1  ;;  %v1888_v48 = vshrl.u32 %v8141_v13, 16 }
  0x79   : > { %v523_v2 = vor.u32 %v522_v55, %v518_v52  ;;  %v540_v9 = vsel %vm348_vm2, %v535_v59, %v539_v51  ;;  %v2075_v52 = vrot.slane %v8118_v53, 1 }
  0x7b   : > { %557 = vrot.lane.b32.xlu0 %v456_v3, %s7738_s21  ;;  %640 = vrot.lane.b32.xlu1 %v603_v8, %s7737_s20  ;;  %v527_v3 = vrot.slane %v525_v56, 1  ;;  %v2076_v56 = vrot.slane %v8129_v62, 1 }
  0x7d   : > { %v528_v22 = vsel %vm348_vm2, %v523_v2, %v527_v3  ;;  %v7679_v2 = vld [vmem:[%s7776_s19 + $0x24] sm:$0xff]  }
  0x7f   : > { %638 = vrot.lane.b32.xlu0 %v600_v12, %s7737_s20  ;;  %563 = vrot.lane.b32.xlu1 %v492_v19, %s7738_s21  ;;  %v1871_v12 = vshll.u32 %v8125_v60, 16  ;;  %v1856_v19 = vrot.slane %v1854_v1, 1  ;;  %v8198_v1 = vld [vmem:[%s7776_s19 + $0x48] sm:$0xff]  }
  0x81   : > { %v1873_v30 = vrot.slane %v1871_v12, 1  ;;  %v1857_v39 = vor.u32 %v1856_v19, %v1852_v18  ;;  %v2084_v12 = vrot.slane %v8141_v13, 1  ;;  %v8219_v18 = vld [vmem:[%s7776_s19 + $0x50] ss:$0 sps:$4 sm:$0x11]   ;;  %v1902_v19 = vshll.u32 %v8198_v1, 16 }
  0x83   : > { %561 = vrot.lane.b32.xlu0 %v480_v28, %s7738_s21  ;;  %644 = vrot.lane.b32.xlu1 %v609_v33, %s7737_s20  ;;  %v621_v28 = vsel %vm573_vm0, %v619_v4, %v620_v5  ;;  %v7677_v33 = vld [vmem:[%s7776_s19 + $0x18] sm:$0xff]   ;;  %v1862_v55 = vsel %vm348_vm2, %v1857_v39, %v1861_v40  ;;  %v2080_v4 = vsel %vm573_vm0, %v2078_v37, %v2079_v47  ;;  %v1907_v39 = vshll.u32 %v8219_v18, 16  ;;  %v8239_v40 = vld [vmem:[%s7776_s19 + $0x60] sm:$0xff]  }
  0x84   : > { %v1893_v5 = vor.u32 %v1892_v49, %v1888_v48 }
  0x87   : > { %642 = vrot.lane.b32.xlu0 %v606_v42, %s7737_s20  ;;  %567 = vrot.lane.b32.xlu1 %v516_v46, %s7738_s21  ;;  %v1895_v42 = vshll.u32 %v8151_v21, 16  ;;  %v1874_v46 = vsel %vm348_vm2, %v1869_v29, %v1873_v30 }
  0x89   : > { %v1172_v57 = vpop.permute.xlu1 %1171  ;;  %v1897_v60 = vrot.slane %v1895_v42, 1  ;;  %v7681_v42 = vld [vmem:[%s7776_s19 + $0x3c] sm:$0xff]  }
  0x8b   : > { %565 = vrot.lane.b32.xlu0 %v504_v54, %s7738_s21  ;;  %648 = vrot.lane.b32.xlu1 %v615_v58, %s7737_s20  ;;  %v8187_v54 = vld [vmem:[%s11155_s1 + $0x10] sm:$0x3f]  }
  0x8c   : > { %v7678_v58 = vld [vmem:[%s7776_s19 + $0x30] sm:$0xff]  }
  0x8d   : > { %v1092_v6 = vpop.permute.xlu0 %1091  ;;  %v1174_v8 = vpop.permute.xlu1 %1173 }
  0x8e   : > { %v1204_v15 = vsel %vm654_vm3, %v7676_v14, %v1092_v6  ;;  %v8206_v6 = vld [vmem:[%s7776_s19 + $0x5c] ss:$0 sps:$4 sm:$0x11]   ;;  %v2085_v14 = vrot.slane %v8151_v21, 1 }
  0x8f   : > { %646 = vrot.lane.b32.xlu0 %v612_v0, %s7737_s20  ;;  %v1236_v17 = vsel %vm687_vm4, %v1204_v15, %v1172_v57  ;;  %571 = vrot.lane.b32.xlu1 %v540_v9, %s7738_s21  ;;  %v1876_v57 = vshrl.u32 %v8158_v26, 16  ;;  %v1883_v0 = vshll.u32 %v8174_v44, 16  ;;  %v2077_v15 = vsel %vm573_vm0, %v2075_v52, %v2076_v56 }
  0x90   : > { %7127 = vmatprep.mubr.msk.bf16.mxu0 %vm1275_vm5, %v1236_v17  ;;  %v2086_v30 = vsel %vm573_vm0, %v2084_v12, %v2085_v14  ;;  %v2090_v52 = vrot.slane %v8181_v50, 1 }
  0x91   : > { %v1094_v27 = vpop.permute.xlu0 %1093  ;;  %v1098_v35 = vpop.permute.xlu1 %1097  ;;  %v1881_v16 = vor.u32 %v1880_v61, %v1876_v57  ;;  %v1885_v17 = vrot.slane %v1883_v0, 1 }
  0x92   : > { %v1206_v34 = vsel %vm654_vm3, %v7677_v33, %v1094_v27  ;;  %v1210_v59 = vsel %vm654_vm3, %v7678_v58, %v1098_v35  ;;  %v1919_v27 = vshll.u32 %v8206_v6, 16  ;;  %v2082_v33 = vrot.slane %v8174_v44, 1  ;;  %v7680_v35 = vld [vmem:[%s7776_s19 + $0x48] sm:$0xff]  }
  0x93   : > { %569 = vrot.lane.b32.xlu0 %v528_v22, %s7738_s21  ;;  %v1238_v38 = vsel %vm687_vm4, %v1206_v34, %v1174_v8  ;;  %652 = vrot.lane.b32.xlu1 %v621_v28, %s7737_s20  ;;  %v1914_v8 = vshll.u32 %v8181_v50, 16  ;;  %v1898_v22 = vsel %vm348_vm2, %v1893_v5, %v1897_v60  ;;  %v8226_v28 = vld [vmem:[%s7776_s19 + $0x6c] sm:$0xff]   ;;  %v1900_v34 = vshrl.u32 %v8198_v1, 16 }
  0x94   : > { %7128 = vmatmul.mubr.msk.bf16.vlgmr.msra.gmra.mrb[0].mxu0 %vm1275_vm5, %v1238_v38  ;;  %v1886_v37 = vsel %vm348_vm2, %v1881_v16, %v1885_v17  ;;  %v1904_v38 = vrot.slane %v1902_v19, 1  ;;  %v1921_v44 = vrot.slane %v1919_v27, 1  ;;  %v1938_v47 = vshll.u32 %v8226_v28, 16  ;;  %v8277_v17 = vld [vmem:[%s7776_s19 + $0x78] sm:$0xff]  }
  0x95   : > { %7160 = vmatpush3.bf16.msra.mxu0 %v1511_v36  ;;  %v1096_v45 = vpop.permute.xlu0 %1095  ;;  %v1178_v51 = vpop.permute.xlu1 %1177  ;;  %v1916_v21 = vrot.slane %v1914_v8, 1  ;;  %v2083_v56 = vsel %vm573_vm0, %v2081_v31, %v2082_v33  ;;  %v1909_v58 = vrot.slane %v1907_v39, 1  ;;  %v1926_v60 = vshll.u32 %v8239_v40, 16  ;;  %v7683_v19 = vld [vmem:[%s7776_s19 + $0x54] sm:$0xff]  }
  0x96   : > { %7459 = vmatprep.subr.msk.bf16.mxu0 %vm1308_vm1, %v8187_v54  ;;  %v1208_v3 = vsel %vm654_vm3, %v7679_v2, %v1096_v45  ;;  %v1242_v11 = vsel %vm687_vm4, %v1210_v59, %v1178_v51  ;;  %v1905_v57 = vor.u32 %v1904_v38, %v1900_v34  ;;  %v8257_v59 = vld [vmem:[%s7776_s19 + $0x68] ss:$0 sps:$4 sm:$0x11]   ;;  %v1936_v2 = vshrl.u32 %v8226_v28, 16 }
  0x97   : > { %650 = vrot.lane.b32.xlu0 %v618_v43, %s7737_s20  ;;  %2045 = vrot.lane.b32.xlu1 %v1874_v46, %s7738_s21  ;;  %v1917_v45 = vor.u32 %v1916_v21, %v1912_v25  ;;  %v8244_v46 = vld [vmem:[%s7776_s19 + $0x74] ss:$0 sps:$4 sm:$0x11]   ;;  %v2087_v8 = vrot.slane %v8198_v1, 1  ;;  %v1931_v16 = vshll.u32 %v8257_v59, 16  ;;  %v2096_v33 = vrot.slane %v8226_v28, 1 }
  0x98   : > { %v1910_v14 = vsel %vm348_vm2, %v1905_v57, %v1909_v58  ;;  %v8282_v21 = vld [vmem:[%s7776_s19 + $0x8c] ss:$0 sps:$4 sm:$0x11]   ;;  %v2097_v34 = vrot.slane %v8244_v46, 1  ;;  %v1950_v39 = vshll.u32 %v8277_v17, 16 }
  0x99   : > { %v1176_v62 = vpop.permute.xlu0 %1175  ;;  %v1102_v10 = vpop.permute.xlu1 %1101  ;;  %v1922_v0 = vsel %vm348_vm2, %v1917_v45, %v1921_v44  ;;  %v8295_v38 = vld [vmem:[%s7776_s19 + $0x80] ss:$0 sps:$4 sm:$0x11]   ;;  %v1967_v44 = vshll.u32 %v8282_v21, 16 }
  0x9a   : > { %v1240_v9 = vsel %vm687_vm4, %v1208_v3, %v1176_v62  ;;  %v1214_v36 = vsel %vm654_vm3, %v7680_v35, %v1102_v10  ;;  %v1940_v3 = vrot.slane %v1938_v47, 1  ;;  %v1943_v62 = vshll.u32 %v8244_v46, 16  ;;  %v8302_v46 = vld [vmem:[%s7776_s19 + $0x9c] sm:$0xff]  }
  0x9b   : > { %7131 = vmatprep.mubr.msk.bf16.mxu0 %vm1275_vm5, %v1240_v9  ;;  %2043 = vrot.lane.b32.xlu0 %v1862_v55, %s7738_s21  ;;  %v2091_v55 = vrot.slane %v8206_v6, 1  ;;  %v2088_v9 = vrot.slane %v8219_v18, 1  ;;  %v1924_v10 = vshrl.u32 %v8239_v40, 16  ;;  %v1952_v58 = vrot.slane %v1950_v39, 1 }
  0x9c   : > { %7132 = vmatmul.mubr.msk.bf16.gmra.mrb[4].mxu0 %vm1275_vm5, %v1242_v11  ;;  %2125 = vrot.lane.b32.xlu1 %v2080_v4, %s7737_s20  ;;  %v8264_v4 = vld [vmem:[%s7776_s19 + $0x84] sm:$0xff]   ;;  %v1941_v25 = vor.u32 %v1940_v3, %v1936_v2  ;;  %v1945_v18 = vrot.slane %v1943_v62, 1 }
  0x9d   : > { %v1100_v20 = vpop.permute.xlu0 %1099  ;;  %v1182_v29 = vpop.permute.xlu1 %1181  ;;  %v2092_v6 = vsel %vm573_vm0, %v2090_v52, %v2091_v55  ;;  %v7682_v11 = vld [vmem:[%s7776_s19 + $0x60] sm:$0xff]   ;;  %v1962_v27 = vshll.u32 %v8264_v4, 16  ;;  %v2089_v35 = vsel %vm573_vm0, %v2087_v8, %v2088_v9  ;;  %v1948_v52 = vshrl.u32 %v8277_v17, 16  ;;  %v7684_v55 = vld [vmem:[%s7776_s19 + $0x78] sm:$0xff]  }
  0x9e   : > { %v1212_v43 = vsel %vm654_vm3, %v7681_v42, %v1100_v20  ;;  %v1246_v51 = vsel %vm687_vm4, %v1214_v36, %v1182_v29 }
  0x9f   : > { %2123 = vrot.lane.b32.xlu0 %v2077_v15, %s7737_s20  ;;  %v1928_v15 = vrot.slane %v1926_v60, 1  ;;  %v1964_v45 = vrot.slane %v1962_v27, 1  ;;  %v1955_v60 = vshll.u32 %v8295_v38, 16 }
  0xa0   : > { %2049 = vrot.lane.b32.xlu1 %v1898_v22, %s7738_s21 }
  0xa1   : > { %v1180_v23 = vpop.permute.xlu0 %1179  ;;  %v1106_v49 = vpop.permute.xlu1 %1105  ;;  %v1929_v36 = vor.u32 %v1928_v15, %v1924_v10  ;;  %v1953_v15 = vor.u32 %v1952_v58, %v1948_v52  ;;  %v8367_v58 = vld [vmem:[%s7776_s19 + $0xb0] ss:$0 sps:$4 sm:$0x11]  }
  0xa2   : > { %v1244_v48 = vsel %vm687_vm4, %v1212_v43, %v1180_v23  ;;  %v1218_v12 = vsel %vm654_vm3, %v7682_v11, %v1106_v49  ;;  %v1946_v43 = vsel %vm348_vm2, %v1941_v25, %v1945_v18  ;;  %v1960_v23 = vshrl.u32 %v8264_v4, 16 }
  0xa3   : > { %7135 = vmatprep.mubr.msk.bf16.mxu0 %vm1275_vm5, %v1244_v48  ;;  %2047 = vrot.lane.b32.xlu0 %v1886_v37, %s7738_s21  ;;  %v1933_v37 = vrot.slane %v1931_v16, 1  ;;  %v2098_v48 = vsel %vm573_vm0, %v2096_v33, %v2097_v34  ;;  %v2093_v49 = vrot.slane %v8239_v40, 1  ;;  %v2102_v11 = vrot.slane %v8264_v4, 1 }
  0xa4   : > { %7136 = vmatmul.mubr.msk.bf16.gmra.mrb[8].mxu0 %vm1275_vm5, %v1246_v51  ;;  %2129 = vrot.lane.b32.xlu1 %v2086_v30, %s7737_s20  ;;  %v2094_v51 = vrot.slane %v8257_v59, 1  ;;  %v1965_v62 = vor.u32 %v1964_v45, %v1960_v23  ;;  %v1969_v59 = vrot.slane %v1967_v44, 1  ;;  %v1957_v16 = vrot.slane %v1955_v60, 1  ;;  %v7687_v45 = vld [vmem:[%s7776_s19 + $0x84] sm:$0xff]  }
  0xa5   : > { %v1104_v61 = vpop.permute.xlu0 %1103  ;;  %v1186_v5 = vpop.permute.xlu1 %1185  ;;  %v1934_v57 = vsel %vm348_vm2, %v1929_v36, %v1933_v37  ;;  %v1984_v18 = vshrl.u32 %v8302_v46, 16  ;;  %v2099_v33 = vrot.slane %v8277_v17, 1  ;;  %v2100_v34 = vrot.slane %v8295_v38, 1  ;;  %v8348_v36 = vld [vmem:[%s7776_s19 + $0xa8] sm:$0xff]   ;;  %v7686_v37 = vld [vmem:[%s7776_s19 + $0x90] sm:$0xff]  }
  0xa6   : > { %v1216_v20 = vsel %vm654_vm3, %v7683_v19, %v1104_v61  ;;  %v1250_v31 = vsel %vm687_vm4, %v1218_v12, %v1186_v5  ;;  %v8315_v61 = vld [vmem:[%s7776_s19 + $0x90] sm:$0xff]   ;;  %v8320_v5 = vld [vmem:[%s7776_s19 + $0xa4] ss:$0 sps:$4 sm:$0x11]   ;;  %v2103_v12 = vrot.slane %v8282_v21, 1  ;;  %v1970_v25 = vsel %vm348_vm2, %v1965_v62, %v1969_v59 }
  0xa7   : > { %2127 = vrot.lane.b32.xlu0 %v2083_v56, %s7737_s20  ;;  %v8333_v19 = vld [vmem:[%s7776_s19 + $0x98] ss:$0 sps:$4 sm:$0x11]   ;;  %v1991_v27 = vshll.u32 %v8320_v5, 16  ;;  %v1998_v60 = vshll.u32 %v8348_v36, 16  ;;  %v2109_v62 = vrot.slane %v8320_v5, 1 }
  0xa8   : > { %2053 = vrot.lane.b32.xlu1 %v1922_v0, %s7738_s21  ;;  %v7685_v0 = vld [vmem:[%s7776_s19 + $0x6c] sm:$0xff]   ;;  %v1979_v23 = vshll.u32 %v8333_v19, 16  ;;  %v1996_v5 = vshrl.u32 %v8348_v36, 16 }
  0xa9   : > { %v1184_v22 = vpop.permute.xlu0 %1183  ;;  %v1110_v30 = vpop.permute.xlu1 %1109 }
  0xaa   : > { %v1248_v29 = vsel %vm687_vm4, %v1216_v20, %v1184_v22  ;;  %v1222_v56 = vsel %vm654_vm3, %v7684_v55, %v1110_v30  ;;  %v1974_v20 = vshll.u32 %v8315_v61, 16 }
  0xab   : > { %7139 = vmatprep.mubr.msk.bf16.mxu0 %vm1275_vm5, %v1248_v29  ;;  %2051 = vrot.lane.b32.xlu0 %v1910_v14, %s7738_s21  ;;  %v2095_v14 = vsel %vm573_vm0, %v2093_v49, %v2094_v51  ;;  %v8340_v29 = vld [vmem:[%s7776_s19 + $0xb4] sm:$0xff]   ;;  %v8358_v49 = vld [vmem:[%s7776_s19 + $0xbc] ss:$0 sps:$4 sm:$0x11]  }
  0xac   : > { %7140 = vmatmul.mubr.msk.bf16.gmra.mrb[12].mxu0 %vm1275_vm5, %v1250_v31  ;;  %2133 = vrot.lane.b32.xlu1 %v2092_v6, %s7737_s20  ;;  %v1986_v6 = vshll.u32 %v8302_v46, 16  ;;  %v2104_v31 = vsel %vm573_vm0, %v2102_v11, %v2103_v12  ;;  %v2010_v51 = vshll.u32 %v8340_v29, 16  ;;  %v8378_v11 = vld [vmem:[%s7776_s19 + $0xcc] sm:$0xff]  }
  0xad   : > { %v1108_v42 = vpop.permute.xlu0 %1107  ;;  %v1190_v47 = vpop.permute.xlu1 %1189 }
  0xae   : > { %v1220_v2 = vsel %vm654_vm3, %v7685_v0, %v1108_v42  ;;  %v1254_v10 = vsel %vm687_vm4, %v1222_v56, %v1190_v47  ;;  %v1988_v21 = vrot.slane %v1986_v6, 1  ;;  %v1958_v42 = vsel %vm348_vm2, %v1953_v15, %v1957_v16 }
  0xaf   : > { %2131 = vrot.lane.b32.xlu0 %v2089_v35, %s7737_s20  ;;  %v1972_v35 = vshrl.u32 %v8315_v61, 16  ;;  %v2000_v15 = vrot.slane %v1998_v60, 1  ;;  %v2003_v16 = vshll.u32 %v8367_v58, 16 }
  0xb0   : > { %2057 = vrot.lane.b32.xlu1 %v1946_v43, %s7738_s21  ;;  %v1976_v43 = vrot.slane %v1974_v20, 1  ;;  %v1989_v38 = vor.u32 %v1988_v21, %v1984_v18  ;;  %v7688_v20 = vld [vmem:[%s7776_s19 + $0xa8] sm:$0xff]   ;;  %v2106_v21 = vrot.slane %v8333_v19, 1 }
  0xb1   : > { %v1188_v3 = vpop.permute.xlu0 %1187  ;;  %v1114_v9 = vpop.permute.xlu1 %1113  ;;  %v2001_v19 = vor.u32 %v2000_v15, %v1996_v5 }
  0xb2   : > { %v1252_v8 = vsel %vm687_vm4, %v1220_v2, %v1188_v3  ;;  %v1226_v39 = vsel %vm654_vm3, %v7686_v37, %v1114_v9  ;;  %v1977_v0 = vor.u32 %v1976_v43, %v1972_v35  ;;  %v1981_v2 = vrot.slane %v1979_v23, 1  ;;  %v8396_v37 = vld [vmem:[%s7776_s19 + $0xd4] ss:$0 sps:$4 sm:$0x11]  }
  0xb3   : > { %7143 = vmatprep.mubr.msk.bf16.mxu0 %vm1275_vm5, %v1252_v8  ;;  %2055 = vrot.lane.b32.xlu0 %v1934_v57, %s7738_s21  ;;  %v2101_v57 = vsel %vm573_vm0, %v2099_v33, %v2100_v34  ;;  %v2108_v3 = vrot.slane %v8302_v46, 1  ;;  %v2008_v8 = vshrl.u32 %v8340_v29, 16  ;;  %v2012_v9 = vrot.slane %v2010_v51, 1 }
  0xb4   : > { %7144 = vmatmul.mubr.msk.bf16.gmra.mrb[16].mxu0 %vm1275_vm5, %v1254_v10  ;;  %2137 = vrot.lane.b32.xlu1 %v2098_v48, %s7737_s20  ;;  %v1993_v48 = vrot.slane %v1991_v27, 1  ;;  %v2015_v10 = vshll.u32 %v8358_v49, 16  ;;  %v8391_v27 = vld [vmem:[%s7776_s19 + $0xc0] sm:$0xff]   ;;  %v2039_v60 = vshll.u32 %v8396_v37, 16 }
  0xb5   : > { %v1112_v22 = vpop.permute.xlu0 %1111  ;;  %v1194_v30 = vpop.permute.xlu1 %1193  ;;  %v2110_v18 = vsel %vm573_vm0, %v2108_v3, %v2109_v62  ;;  %v2013_v34 = vor.u32 %v2012_v9, %v2008_v8  ;;  %v2022_v51 = vshll.u32 %v8391_v27, 16  ;;  %v2111_v3 = vrot.slane %v8348_v36, 1  ;;  %v7690_v62 = vld [vmem:[%s7776_s19 + $0xc0] sm:$0xff]  }
  0xb6   : > { %v1224_v44 = vsel %vm654_vm3, %v7687_v45, %v1112_v22  ;;  %v1258_v56 = vsel %vm687_vm4, %v1226_v39, %v1194_v30  ;;  %v1994_v6 = vsel %vm348_vm2, %v1989_v38, %v1993_v48  ;;  %v7689_v30 = vld [vmem:[%s7776_s19 + $0x9c] sm:$0xff]   ;;  %v2017_v35 = vrot.slane %v2015_v10, 1  ;;  %v7572_v48 = vld [vmem:[%s7776_s19 + $0xc8] ss:$0 sps:$4 sm:$0x11]   ;;  %v7691_v10 = vld [vmem:[%s7776_s19 + $0xb4] sm:$0xff]  }
  0xb7   : > { %2135 = vrot.lane.b32.xlu0 %v2095_v14, %s7737_s20  ;;  %v2105_v14 = vrot.slane %v8315_v61, 1  ;;  %v2034_v39 = vshll.u32 %v8378_v11, 16  ;;  %v2005_v45 = vrot.slane %v2003_v16, 1  ;;  %v2115_v38 = vrot.slane %v8358_v49, 1 }
  0xb8   : > { %2061 = vrot.lane.b32.xlu1 %v1970_v25, %s7738_s21  ;;  %v1982_v25 = vsel %vm348_vm2, %v1977_v0, %v1981_v2  ;;  %v2112_v49 = vrot.slane %v8367_v58, 1  ;;  %v2024_v8 = vrot.slane %v2022_v51, 1  ;;  %v2027_v9 = vshll.u32 %v7572_v48, 16 }
  0xb9   : > { %v1192_v47 = vpop.permute.xlu0 %1191  ;;  %v1118_v55 = vpop.permute.xlu1 %1117  ;;  %v2006_v2 = vsel %vm348_vm2, %v2001_v19, %v2005_v45  ;;  %v2041_v16 = vrot.slane %v2039_v60, 1  ;;  %v2118_v19 = vrot.slane %v7572_v48, 1  ;;  %v7693_v45 = vld [vmem:[%s7776_s19] sm:$0xff]  }
  0xba   : > { %v1256_v52 = vsel %vm687_vm4, %v1224_v44, %v1192_v47  ;;  %v1230_v22 = vsel %vm654_vm3, %v7688_v20, %v1118_v55  ;;  %v2107_v44 = vsel %vm573_vm0, %v2105_v14, %v2106_v21  ;;  %v2114_v47 = vrot.slane %v8340_v29, 1 }
  0xbb   : > { %7147 = vmatprep.mubr.msk.bf16.mxu0 %vm1275_vm5, %v1256_v52  ;;  %2059 = vrot.lane.b32.xlu0 %v1958_v42, %s7738_s21  ;;  %v2018_v55 = vsel %vm348_vm2, %v2013_v34, %v2017_v35  ;;  %v2029_v21 = vrot.slane %v2027_v9, 1  ;;  %v2121_v34 = vrot.slane %v8396_v37, 1  ;;  %v7696_v9 = vld [vmem:[%s7776_s19 + $0x3c] sm:$0xff]  }
  0xbc   : > { %7148 = vmatmul.mubr.msk.bf16.gmra.mrb[20].mxu0 %vm1275_vm5, %v1258_v56  ;;  %2141 = vrot.lane.b32.xlu1 %v2104_v31, %s7737_s20  ;;  %v2032_v56 = vshrl.u32 %v8378_v11, 16  ;;  %v2116_v5 = vsel %vm573_vm0, %v2114_v47, %v2115_v38 }
  0xbd   : > { %v1116_v59 = vpop.permute.xlu0 %1115  ;;  %v1198_v12 = vpop.permute.xlu1 %1197 }
  0xbe   : > { %v1228_v31 = vsel %vm654_vm3, %v7689_v30, %v1116_v59  ;;  %v1262_v23 = vsel %vm687_vm4, %v1230_v22, %v1198_v12 }
  0xbf   : > { %2139 = vrot.lane.b32.xlu0 %v2101_v57, %s7737_s20  ;;  %v2036_v57 = vrot.slane %v2034_v39, 1  ;;  %v7692_v39 = vld [vmem:[%s7776_s19 + $0xc] sm:$0xff]  }
  0xc0   : > { %2065 = vrot.lane.b32.xlu1 %v1994_v6, %s7738_s21  ;;  %v2020_v6 = vshrl.u32 %v8391_v27, 16 }
  0xc1   : > { %v1196_v33 = vpop.permute.xlu0 %1195  ;;  %v1122_v43 = vpop.permute.xlu1 %1121  ;;  %v2037_v15 = vor.u32 %v2036_v57, %v2032_v56 }
  0xc2   : > { %v1260_v42 = vsel %vm687_vm4, %v1228_v31, %v1196_v33  ;;  %v1234_v59 = vsel %vm654_vm3, %v7690_v62, %v1122_v43  ;;  %v2120_v33 = vrot.slane %v8378_v11, 1 }
  0xc3   : > { %7151 = vmatprep.mubr.msk.bf16.mxu0 %vm1275_vm5, %v1260_v42  ;;  %2063 = vrot.lane.b32.xlu0 %v1982_v25, %s7738_s21  ;;  %v2113_v25 = vsel %vm573_vm0, %v2111_v3, %v2112_v49  ;;  %v2042_v31 = vsel %vm348_vm2, %v2037_v15, %v2041_v16 }
  0xc4   : > { %7152 = vmatmul.mubr.msk.bf16.gmra.mrb[24].mxu0 %vm1275_vm5, %v1262_v23  ;;  %2145 = vrot.lane.b32.xlu1 %v2110_v18, %s7737_s20  ;;  %v2025_v18 = vor.u32 %v2024_v8, %v2020_v6  ;;  %v2117_v23 = vrot.slane %v8391_v27, 1  ;;  %v2122_v37 = vsel %vm573_vm0, %v2120_v33, %v2121_v34 }
  0xc5   : > { %v1120_v52 = vpop.permute.xlu0 %1119  ;;  %v1202_v0 = vpop.permute.xlu1 %1201 }
  0xc6   : > { %v1232_v12 = vsel %vm654_vm3, %v7691_v10, %v1120_v52  ;;  %v1266_v22 = vsel %vm687_vm4, %v1234_v59, %v1202_v0  ;;  %v2030_v43 = vsel %vm348_vm2, %v2025_v18, %v2029_v21  ;;  %v2260_v52 = vsel %vm1308_vm1, %v8187_v54, 0  ;;  %v7694_v54 = vld [vmem:[%s7776_s19 + $0x24] sm:$0xff]   ;;  %v7695_v0 = vld [vmem:[%s7776_s19 + $0x18] sm:$0xff]  }
  0xc7   : > { %2143 = vrot.lane.b32.xlu0 %v2107_v44, %s7737_s20  ;;  %v2119_v48 = vsel %vm573_vm0, %v2117_v23, %v2118_v19  ;;  %v7699_v21 = vld [vmem:[%s7776_s19 + $0x48] sm:$0xff]   ;;  %v7701_v19 = vld [vmem:[%s7776_s19 + $0x60] sm:$0xff]  }
  0xc8   : > { %2069 = vrot.lane.b32.xlu1 %v2018_v55, %s7738_s21 }
  0xc9   : > { %v1200_v14 = vpop.permute.xlu0 %1199  ;;  %v544_v58 = vpop.permute.xlu1 %543 }
  0xca   : > { %v1264_v20 = vsel %vm687_vm4, %v1232_v12, %v1200_v14  ;;  %v658_v42 = vsel %vm654_vm3, %v7692_v39, %v544_v58  ;;  %v7697_v12 = vld [vmem:[%s7776_s19 + $0x30] sm:$0xff]  }
  0xcb   : > { %7155 = vmatprep.mubr.msk.bf16.mxu0 %vm1275_vm5, %v1264_v20  ;;  %2067 = vrot.lane.b32.xlu0 %v2006_v2, %s7738_s21 }
  0xcc   : > { %7156 = vmatmul.mubr.msk.bf16.gmra.mrb[28].mxu0 %vm1275_vm5, %v1266_v22  ;;  %2149 = vrot.lane.b32.xlu1 %v2116_v5, %s7737_s20 }
  0xcd   : > { %v542_v30 = vpop.permute.xlu0 %541  ;;  %v625_v35 = vpop.permute.xlu1 %624 }
  0xce   : > { %v656_v44 = vsel %vm654_vm3, %v7693_v45, %v542_v30  ;;  %v691_v55 = vsel %vm687_vm4, %v658_v42, %v625_v35 }
  0xcf   : > { %2147 = vrot.lane.b32.xlu0 %v2113_v25, %s7737_s20  ;;  %v7698_v25 = vld [vmem:[%s7776_s19 + $0x54] sm:$0xff]  }
  0xd0   : > { %2073 = vrot.lane.b32.xlu1 %v2042_v31, %s7738_s21 }
  0xd1   : > { %v623_v47 = vpop.permute.xlu0 %622  ;;  %v548_v51 = vpop.permute.xlu1 %547 }
  0xd2   : > { %v689_v38 = vsel %vm687_vm4, %v656_v44, %v623_v47  ;;  %v662_v60 = vsel %vm654_vm3, %v7694_v54, %v548_v51 }
  0xd3   : > { %2071 = vrot.lane.b32.xlu0 %v2030_v43, %s7738_s21  ;;  %7161 = vmatprep.mubr.msk.bf16.mxu0 %vm1275_vm5, %v689_v38  ;;  %v7700_v43 = vld [vmem:[%s7776_s19 + $0x6c] sm:$0xff]  }
  0xd4   : > { %7162 = vmatmul.mubr.msk.bf16.vlgmr.msra.gmra.mrb[0].mxu0 %vm1275_vm5, %v691_v55  ;;  %2153 = vrot.lane.b32.xlu1 %v2122_v37, %s7737_s20  ;;  %v7702_v55 = vld [vmem:[%s7776_s19 + $0x84] sm:$0xff]  }
  0xd5   : > { %7194 = vmatpush3.bf16.msra.mxu0 %v2260_v52  ;;  %v546_v56 = vpop.permute.xlu0 %545  ;;  %v629_v57 = vpop.permute.xlu1 %628 }
  0xd6   : > { %v660_v2 = vsel %vm654_vm3, %v7695_v0, %v546_v56  ;;  %v695_v59 = vsel %vm687_vm4, %v662_v60, %v629_v57  ;;  %v7703_v56 = vld [vmem:[%s7776_s19 + $0x78] sm:$0xff]  }
  0xd7   : > { %2151 = vrot.lane.b32.xlu0 %v2119_v48, %s7737_s20 }
  0xd9   : > { %v627_v3 = vpop.permute.xlu0 %626  ;;  %v552_v62 = vpop.permute.xlu1 %551 }
  0xda   : > { %v693_v49 = vsel %vm687_vm4, %v660_v2, %v627_v3  ;;  %v666_v10 = vsel %vm654_vm3, %v7696_v9, %v552_v62 }
  0xdb   : > { %7165 = vmatprep.mubr.msk.bf16.mxu0 %vm1275_vm5, %v693_v49 }
  0xdc   : > { %7166 = vmatmul.mubr.msk.bf16.gmra.mrb[4].mxu0 %vm1275_vm5, %v695_v59 }
  0xdd   : > { %v550_v6 = vpop.permute.xlu0 %549  ;;  %v633_v8 = vpop.permute.xlu1 %632 }
  0xde   : > { %v664_v14 = vsel %vm654_vm3, %v7697_v12, %v550_v6  ;;  %v699_v20 = vsel %vm687_vm4, %v666_v10, %v633_v8 }
  0xe1   : > { %v631_v5 = vpop.permute.xlu0 %630  ;;  %v556_v16 = vpop.permute.xlu1 %555 }
  0xe2   : > { %v697_v15 = vsel %vm687_vm4, %v664_v14, %v631_v5  ;;  %v670_v18 = vsel %vm654_vm3, %v7698_v25, %v556_v16 }
  0xe3   : > { %7169 = vmatprep.mubr.msk.bf16.mxu0 %vm1275_vm5, %v697_v15 }
  0xe4   : > { %7170 = vmatmul.mubr.msk.bf16.gmra.mrb[8].mxu0 %vm1275_vm5, %v699_v20 }
  0xe5   : > { %v554_v58 = vpop.permute.xlu0 %553  ;;  %v637_v22 = vpop.permute.xlu1 %636 }
  0xe6   : > { %v668_v30 = vsel %vm654_vm3, %v7699_v21, %v554_v58  ;;  %v703_v35 = vsel %vm687_vm4, %v670_v18, %v637_v22 }
  0xe9   : > { %v635_v31 = vpop.permute.xlu0 %634  ;;  %v560_v34 = vpop.permute.xlu1 %559 }
  0xea   : > { %v701_v33 = vsel %vm687_vm4, %v668_v30, %v635_v31  ;;  %v674_v23 = vsel %vm654_vm3, %v7700_v43, %v560_v34 }
  0xeb   : > { %7173 = vmatprep.mubr.msk.bf16.mxu0 %vm1275_vm5, %v701_v33 }
  0xec   : > { %7174 = vmatmul.mubr.msk.bf16.gmra.mrb[12].mxu0 %vm1275_vm5, %v703_v35 }
  0xed   : > { %v558_v39 = vpop.permute.xlu0 %557  ;;  %v641_v42 = vpop.permute.xlu1 %640 }
  0xee   : > { %v672_v45 = vsel %vm654_vm3, %v7701_v19, %v558_v39  ;;  %v707_v38 = vsel %vm687_vm4, %v674_v23, %v641_v42 }
  0xf1   : > { %v639_v44 = vpop.permute.xlu0 %638  ;;  %v564_v37 = vpop.permute.xlu1 %563 }
  0xf2   : > { %v705_v47 = vsel %vm687_vm4, %v672_v45, %v639_v44  ;;  %v678_v48 = vsel %vm654_vm3, %v7702_v55, %v564_v37 }
  0xf3   : > { %7177 = vmatprep.mubr.msk.bf16.mxu0 %vm1275_vm5, %v705_v47 }
  0xf4   : > { %7178 = vmatmul.mubr.msk.bf16.gmra.mrb[16].mxu0 %vm1275_vm5, %v707_v38 }
  0xf5   : > { %v562_v51 = vpop.permute.xlu0 %561  ;;  %v645_v52 = vpop.permute.xlu1 %644 }
  0xf6   : > { %v676_v57 = vsel %vm654_vm3, %v7703_v56, %v562_v51  ;;  %v711_v2 = vsel %vm687_vm4, %v678_v48, %v645_v52 }
  0xf9   : > { %v643_v54 = vpop.permute.xlu0 %642  ;;  %v568_v0 = vpop.permute.xlu1 %567 }
  0xfa   : > { %v709_v60 = vsel %vm687_vm4, %v676_v57, %v643_v54  ;;  %v682_v62 = vsel %vm654_vm3, %v8063_v63, %v568_v0 }
  0xfb   : > { %7181 = vmatprep.mubr.msk.bf16.mxu0 %vm1275_vm5, %v709_v60 }
  0xfc   : > { %7182 = vmatmul.mubr.msk.bf16.gmra.mrb[20].mxu0 %vm1275_vm5, %v711_v2 }
  0xfd   : > { %v566_v3 = vpop.permute.xlu0 %565  ;;  %v649_v49 = vpop.permute.xlu1 %648 }
  0xfe   : > { %v680_v59 = vsel %vm654_vm3, %v8071_v7, %v566_v3  ;;  %v715_v10 = vsel %vm687_vm4, %v682_v62, %v649_v49 }
 0x101   : > { %v647_v6 = vpop.permute.xlu0 %646  ;;  %v572_v9 = vpop.permute.xlu1 %571 }
 0x102   : > { %v713_v8 = vsel %vm687_vm4, %v680_v59, %v647_v6  ;;  %v686_v5 = vsel %vm654_vm3, %v8085_v24, %v572_v9 }
 0x103   : > { %7185 = vmatprep.mubr.msk.bf16.mxu0 %vm1275_vm5, %v713_v8 }
 0x104   : > { %7186 = vmatmul.mubr.msk.bf16.gmra.mrb[24].mxu0 %vm1275_vm5, %v715_v10 }
 0x105   : > { %v570_v12 = vpop.permute.xlu0 %569  ;;  %v653_v14 = vpop.permute.xlu1 %652 }
 0x106   : > { %v684_v63 = vsel %vm654_vm3, %v8096_v32, %v570_v12  ;;  %v719_v20 = vsel %vm687_vm4, %v686_v5, %v653_v14 }
 0x109   : > { %v651_v15 = vpop.permute.xlu0 %650  ;;  %v2046_v16 = vpop.permute.xlu1 %2045 }
 0x10a   : > { %v717_v7 = vsel %vm687_vm4, %v684_v63, %v651_v15  ;;  %v2158_v25 = vsel %vm654_vm3, %v8104_v41, %v2046_v16 }
 0x10b   : > { %7189 = vmatprep.mubr.msk.bf16.mxu0 %vm1275_vm5, %v717_v7 }
 0x10c   : > { %7190 = vmatmul.mubr.msk.bf16.gmra.mrb[28].mxu0 %vm1275_vm5, %v719_v20 }
 0x10d   : > { %v2044_v58 = vpop.permute.xlu0 %2043 }
 0x10e   : > { %v2126_v22 = vpop.permute.xlu1 %2125  ;;  %v2156_v24 = vsel %vm654_vm3, %v8118_v53, %v2044_v58 }
 0x10f   : > { %v2190_v30 = vsel %vm687_vm4, %v2158_v25, %v2126_v22 }
 0x111   : > { %v2124_v18 = vpop.permute.xlu0 %2123 }
 0x112   : > { %v2188_v32 = vsel %vm687_vm4, %v2156_v24, %v2124_v18  ;;  %v2050_v21 = vpop.permute.xlu1 %2049 }
 0x113   : > { %7195 = vmatprep.mubr.msk.bf16.mxu0 %vm1275_vm5, %v2188_v32  ;;  %v2162_v34 = vsel %vm654_vm3, %v8141_v13, %v2050_v21 }
 0x114   : > { %7196 = vmatmul.mubr.msk.bf16.vlgmr.msra.gmra.mrb[0].mxu0 %vm1275_vm5, %v2190_v30 }
 0x115   : > { %v2048_v31 = vpop.permute.xlu0 %2047 }
 0x116   : > { %v2130_v33 = vpop.permute.xlu1 %2129  ;;  %v2160_v41 = vsel %vm654_vm3, %v8158_v26, %v2048_v31 }
 0x117   : > { %v2194_v42 = vsel %vm687_vm4, %v2162_v34, %v2130_v33 }
 0x119   : > { %v2128_v35 = vpop.permute.xlu0 %2127 }
 0x11a   : > { %v2192_v53 = vsel %vm687_vm4, %v2160_v41, %v2128_v35  ;;  %v2054_v39 = vpop.permute.xlu1 %2053 }
 0x11b   : > { %7199 = vmatprep.mubr.msk.bf16.mxu0 %vm1275_vm5, %v2192_v53  ;;  %v2166_v19 = vsel %vm654_vm3, %v8181_v50, %v2054_v39 }
 0x11c   : > { %7200 = vmatmul.mubr.msk.bf16.gmra.mrb[4].mxu0 %vm1275_vm5, %v2194_v42 }
 0x11d   : > { %v2052_v43 = vpop.permute.xlu0 %2051 }
 0x11e   : > { %v2134_v23 = vpop.permute.xlu1 %2133  ;;  %v2164_v13 = vsel %vm654_vm3, %v8198_v1, %v2052_v43 }
 0x11f   : > { %v2198_v47 = vsel %vm687_vm4, %v2166_v19, %v2134_v23 }
 0x121   : > { %v2132_v45 = vpop.permute.xlu0 %2131 }
 0x122   : > { %v2196_v26 = vsel %vm687_vm4, %v2164_v13, %v2132_v45  ;;  %v2058_v44 = vpop.permute.xlu1 %2057 }
 0x123   : > { %7203 = vmatprep.mubr.msk.bf16.mxu0 %vm1275_vm5, %v2196_v26  ;;  %v2170_v51 = vsel %vm654_vm3, %v8226_v28, %v2058_v44 }
 0x124   : > { %7204 = vmatmul.mubr.msk.bf16.gmra.mrb[8].mxu0 %vm1275_vm5, %v2198_v47 }
 0x125   : > { %v2056_v37 = vpop.permute.xlu0 %2055 }
 0x126   : > { %v2138_v38 = vpop.permute.xlu1 %2137  ;;  %v2168_v50 = vsel %vm654_vm3, %v8239_v40, %v2056_v37 }
 0x127   : > { %v2202_v48 = vsel %vm687_vm4, %v2170_v51, %v2138_v38 }
 0x129   : > { %v2136_v52 = vpop.permute.xlu0 %2135 }
 0x12a   : > { %v2200_v1 = vsel %vm687_vm4, %v2168_v50, %v2136_v52  ;;  %v2062_v55 = vpop.permute.xlu1 %2061 }
 0x12b   : > { %7207 = vmatprep.mubr.msk.bf16.mxu0 %vm1275_vm5, %v2200_v1  ;;  %v2174_v54 = vsel %vm654_vm3, %v8264_v4, %v2062_v55 }
 0x12c   : > { %7208 = vmatmul.mubr.msk.bf16.gmra.mrb[12].mxu0 %vm1275_vm5, %v2202_v48 }
 0x12d   : > { %v2060_v56 = vpop.permute.xlu0 %2059 }
 0x12e   : > { %v2142_v57 = vpop.permute.xlu1 %2141  ;;  %v2172_v28 = vsel %vm654_vm3, %v8277_v17, %v2060_v56 }
 0x12f   : > { %v2206_v2 = vsel %vm687_vm4, %v2174_v54, %v2142_v57 }
 0x131   : > { %v2140_v60 = vpop.permute.xlu0 %2139 }
 0x132   : > { %v2204_v40 = vsel %vm687_vm4, %v2172_v28, %v2140_v60  ;;  %v2066_v0 = vpop.permute.xlu1 %2065 }
 0x133   : > { %7211 = vmatprep.mubr.msk.bf16.mxu0 %vm1275_vm5, %v2204_v40  ;;  %v2178_v62 = vsel %vm654_vm3, %v8302_v46, %v2066_v0 }
 0x134   : > { %7212 = vmatmul.mubr.msk.bf16.gmra.mrb[16].mxu0 %vm1275_vm5, %v2206_v2 }
 0x135   : > { %v2064_v3 = vpop.permute.xlu0 %2063 }
 0x136   : > { %v2146_v49 = vpop.permute.xlu1 %2145  ;;  %v2176_v4 = vsel %vm654_vm3, %v8315_v61, %v2064_v3 }
 0x137   : > { %v2210_v8 = vsel %vm687_vm4, %v2178_v62, %v2146_v49 }
 0x139   : > { %v2144_v59 = vpop.permute.xlu0 %2143 }
 0x13a   : > { %v2208_v17 = vsel %vm687_vm4, %v2176_v4, %v2144_v59  ;;  %v2070_v6 = vpop.permute.xlu1 %2069 }
 0x13b   : > { %7215 = vmatprep.mubr.msk.bf16.mxu0 %vm1275_vm5, %v2208_v17  ;;  %v2182_v12 = vsel %vm654_vm3, %v8340_v29, %v2070_v6 }
 0x13c   : > { %7216 = vmatmul.mubr.msk.bf16.gmra.mrb[20].mxu0 %vm1275_vm5, %v2210_v8 }
 0x13d   : > { %v2068_v9 = vpop.permute.xlu0 %2067 }
 0x13e   : > { %v2150_v10 = vpop.permute.xlu1 %2149  ;;  %v2180_v46 = vsel %vm654_vm3, %v8348_v36, %v2068_v9 }
 0x13f   : > { %v2214_v63 = vsel %vm687_vm4, %v2182_v12, %v2150_v10 }
 0x141   : > { %v2148_v14 = vpop.permute.xlu0 %2147 }
 0x142   : > { %v2212_v61 = vsel %vm687_vm4, %v2180_v46, %v2148_v14  ;;  %v2074_v5 = vpop.permute.xlu1 %2073 }
 0x143   : > { %7219 = vmatprep.mubr.msk.bf16.mxu0 %vm1275_vm5, %v2212_v61  ;;  %v2186_v7 = vsel %vm654_vm3, %v8378_v11, %v2074_v5 }
 0x144   : > { %7220 = vmatmul.mubr.msk.bf16.gmra.mrb[24].mxu0 %vm1275_vm5, %v2214_v63 }
 0x145   : > { %v2072_v15 = vpop.permute.xlu0 %2071 }
 0x146   : > { %v2154_v16 = vpop.permute.xlu1 %2153  ;;  %v2184_v29 = vsel %vm654_vm3, %v8391_v27, %v2072_v15 }
 0x147   : > { %v2218_v58 = vsel %vm687_vm4, %v2186_v7, %v2154_v16 }
 0x149   : > { %v2152_v20 = vpop.permute.xlu0 %2151 }
 0x14a   : > { %v2216_v36 = vsel %vm687_vm4, %v2184_v29, %v2152_v20 }
 0x14b   : > { %7223 = vmatprep.mubr.msk.bf16.mxu0 %vm1275_vm5, %v2216_v36 }
 0x14c   : > { %7224 = vmatmul.mubr.msk.bf16.gmra.mrb[28].mxu0 %vm1275_vm5, %v2218_v58 }
 0x1e7   : > { %v8573_v22 = vpop.f32.mrb[0].mxu0 }
 0x1e8   : > { %v8575_v25 = vpop.f32.mrb[1].mxu0  ;;  %v2528_v27 = vmul.f32 %v8573_v22, %v8573_v22  ;;  %v2458_v33 = vsel %vm654_vm3, %v8573_v22, 0.0 }
 0x1e9   : > { %v2526_v11 = vmul.f32 %v8575_v25, %v8575_v25  ;;  %v8579_v24 = vpop.f32.mrb[2].mxu0  ;;  %v2455_v32 = vsel %vm654_vm3, %v8575_v25, 0.0 }
 0x1ea   : > { %v8581_v18 = vpop.f32.mrb[3].mxu0  ;;  %v2529_v41 = vmul.f32 %v8579_v24, %v8579_v24  ;;  %v2561_v42 = vsel %vm654_vm3, %v2528_v27, 0.0  ;;  %v2460_v43 = vsel %vm654_vm3, %v8579_v24, 0.0 }
 0x1eb   : > { %v2456_v21 = vsel %vm654_vm3, %v8581_v18, 0.0  ;;  %v2527_v30 = vmul.f32 %v8581_v18, %v8581_v18  ;;  %v2558_v34 = vsel %vm654_vm3, %v2526_v11, 0.0 }
 0x1ec   : > { %v2457_v31 = vadd.f32 %v2456_v21, %v2455_v32  ;;  %v2563_v26 = vsel %vm654_vm3, %v2529_v41, 0.0 }
 0x1ed   : > { %v2559_v35 = vsel %vm654_vm3, %v2527_v30, 0.0 }
 0x1ee   : > { %v2459_v53 = vadd.f32 %v2458_v33, %v2457_v31  ;;  %v2560_v39 = vadd.f32 %v2559_v35, %v2558_v34 }
 0x1ef   : > { %v8600_v23 = vpop.f32.mrb[4].mxu0 }
 0x1f0   : > { %v2562_v19 = vadd.f32 %v2561_v42, %v2560_v39  ;;  %v8602_v13 = vpop.f32.mrb[5].mxu0  ;;  %v2461_v45 = vadd.f32 %v2460_v43, %v2459_v53  ;;  %v2532_v52 = vmul.f32 %v8600_v23, %v8600_v23  ;;  %v2466_v54 = vsel %vm654_vm3, %v8600_v23, 0.0 }
 0x1f1   : > { %v2462_v44 = vsel %vm654_vm3, %v8602_v13, 0.0  ;;  %v2530_v47 = vmul.f32 %v8602_v13, %v8602_v13  ;;  %v8609_v37 = vpop.f32.mrb[6].mxu0 }
 0x1f2   : > { %v2463_v38 = vadd.f32 %v2462_v44, %v2461_v45  ;;  %v2564_v51 = vadd.f32 %v2563_v26, %v2562_v19  ;;  %v8611_v50 = vpop.f32.mrb[7].mxu0  ;;  %v2533_v28 = vmul.f32 %v8609_v37, %v8609_v37  ;;  %v2569_v2 = vsel %vm654_vm3, %v2532_v52, 0.0 }
 0x1f3   : > { %v2565_v1 = vsel %vm654_vm3, %v2530_v47, 0.0  ;;  %v2464_v55 = vsel %vm654_vm3, %v8611_v50, 0.0  ;;  %v2531_v48 = vmul.f32 %v8611_v50, %v8611_v50  ;;  %v2468_v3 = vsel %vm654_vm3, %v8609_v37, 0.0 }
 0x1f4   : > { %v2566_v56 = vadd.f32 %v2565_v1, %v2564_v51  ;;  %v2465_v57 = vadd.f32 %v2464_v55, %v2463_v38  ;;  %v2571_v17 = vsel %vm654_vm3, %v2533_v28, 0.0 }
 0x1f5   : > { %v2567_v60 = vsel %vm654_vm3, %v2531_v48, 0.0 }
 0x1f6   : > { %v2467_v40 = vadd.f32 %v2466_v54, %v2465_v57  ;;  %v2568_v0 = vadd.f32 %v2567_v60, %v2566_v56 }
 0x1f7   : > { %v8628_v49 = vpop.f32.mrb[8].mxu0 }
 0x1f8   : > { %v2570_v62 = vadd.f32 %v2569_v2, %v2568_v0  ;;  %v8630_v4 = vpop.f32.mrb[9].mxu0  ;;  %v2469_v59 = vadd.f32 %v2468_v3, %v2467_v40  ;;  %v2536_v14 = vmul.f32 %v8628_v49, %v8628_v49  ;;  %v2474_v16 = vsel %vm654_vm3, %v8628_v49, 0.0 }
 0x1f9   : > { %v2470_v6 = vsel %vm654_vm3, %v8630_v4, 0.0  ;;  %v2534_v8 = vmul.f32 %v8630_v4, %v8630_v4  ;;  %v8637_v9 = vpop.f32.mrb[10].mxu0 }
 0x1fa   : > { %v2471_v10 = vadd.f32 %v2470_v6, %v2469_v59  ;;  %v2572_v12 = vadd.f32 %v2571_v17, %v2570_v62  ;;  %v8639_v46 = vpop.f32.mrb[11].mxu0  ;;  %v2537_v29 = vmul.f32 %v8637_v9, %v8637_v9  ;;  %v2577_v11 = vsel %vm654_vm3, %v2536_v14, 0.0 }
 0x1fb   : > { %v2573_v61 = vsel %vm654_vm3, %v2534_v8, 0.0  ;;  %v2472_v5 = vsel %vm654_vm3, %v8639_v46, 0.0  ;;  %v2535_v63 = vmul.f32 %v8639_v46, %v8639_v46  ;;  %v2476_v27 = vsel %vm654_vm3, %v8637_v9, 0.0 }
 0x1fc   : > { %v2574_v15 = vadd.f32 %v2573_v61, %v2572_v12  ;;  %v2473_v7 = vadd.f32 %v2472_v5, %v2471_v10  ;;  %v2579_v33 = vsel %vm654_vm3, %v2537_v29, 0.0 }
 0x1fd   : > { %v2575_v20 = vsel %vm654_vm3, %v2535_v63, 0.0 }
 0x1fe   : > { %v2475_v36 = vadd.f32 %v2474_v16, %v2473_v7  ;;  %v2576_v58 = vadd.f32 %v2575_v20, %v2574_v15 }
 0x1ff   : > { %v8656_v32 = vpop.f32.mrb[12].mxu0 }
 0x200   : > { %v2578_v21 = vadd.f32 %v2577_v11, %v2576_v58  ;;  %v8658_v30 = vpop.f32.mrb[13].mxu0  ;;  %v2477_v31 = vadd.f32 %v2476_v27, %v2475_v36  ;;  %v2540_v43 = vmul.f32 %v8656_v32, %v8656_v32  ;;  %v2482_v38 = vsel %vm654_vm3, %v8656_v32, 0.0 }
 0x201   : > { %v2478_v34 = vsel %vm654_vm3, %v8658_v30, 0.0  ;;  %v2538_v41 = vmul.f32 %v8658_v30, %v8658_v30  ;;  %v8665_v35 = vpop.f32.mrb[14].mxu0 }
 0x202   : > { %v2479_v53 = vadd.f32 %v2478_v34, %v2477_v31  ;;  %v2580_v39 = vadd.f32 %v2579_v33, %v2578_v21  ;;  %v8667_v42 = vpop.f32.mrb[15].mxu0  ;;  %v2541_v51 = vmul.f32 %v8665_v35, %v8665_v35  ;;  %v2585_v48 = vsel %vm654_vm3, %v2540_v43, 0.0 }
 0x203   : > { %v2581_v19 = vsel %vm654_vm3, %v2538_v41, 0.0  ;;  %v2480_v45 = vsel %vm654_vm3, %v8667_v42, 0.0  ;;  %v2539_v26 = vmul.f32 %v8667_v42, %v8667_v42  ;;  %v2484_v56 = vsel %vm654_vm3, %v8665_v35, 0.0 }
 0x204   : > { %v2582_v44 = vadd.f32 %v2581_v19, %v2580_v39  ;;  %v2481_v47 = vadd.f32 %v2480_v45, %v2479_v53  ;;  %v2587_v40 = vsel %vm654_vm3, %v2541_v51, 0.0 }
 0x205   : > { %v2583_v52 = vsel %vm654_vm3, %v2539_v26, 0.0 }
 0x206   : > { %v2483_v1 = vadd.f32 %v2482_v38, %v2481_v47  ;;  %v2584_v55 = vadd.f32 %v2583_v52, %v2582_v44 }
 0x207   : > { %v8684_v57 = vpop.f32.mrb[16].mxu0 }
 0x208   : > { %v2586_v54 = vadd.f32 %v2585_v48, %v2584_v55  ;;  %v8686_v28 = vpop.f32.mrb[17].mxu0  ;;  %v2485_v60 = vadd.f32 %v2484_v56, %v2483_v1  ;;  %v2544_v6 = vmul.f32 %v8684_v57, %v8684_v57  ;;  %v2490_v5 = vsel %vm654_vm3, %v8684_v57, 0.0 }
 0x209   : > { %v2486_v0 = vsel %vm654_vm3, %v8686_v28, 0.0  ;;  %v2542_v2 = vmul.f32 %v8686_v28, %v8686_v28  ;;  %v8693_v3 = vpop.f32.mrb[18].mxu0 }
 0x20a   : > { %v2487_v62 = vadd.f32 %v2486_v0, %v2485_v60  ;;  %v2588_v59 = vadd.f32 %v2587_v40, %v2586_v54  ;;  %v8695_v17 = vpop.f32.mrb[19].mxu0  ;;  %v2545_v63 = vmul.f32 %v8693_v3, %v8693_v3  ;;  %v2593_v29 = vsel %vm654_vm3, %v2544_v6, 0.0 }
 0x20b   : > { %v2589_v8 = vsel %vm654_vm3, %v2542_v2, 0.0  ;;  %v2488_v10 = vsel %vm654_vm3, %v8695_v17, 0.0  ;;  %v2543_v12 = vmul.f32 %v8695_v17, %v8695_v17  ;;  %v2492_v20 = vsel %vm654_vm3, %v8693_v3, 0.0 }
 0x20c   : > { %v2590_v14 = vadd.f32 %v2589_v8, %v2588_v59  ;;  %v2489_v61 = vadd.f32 %v2488_v10, %v2487_v62  ;;  %v2595_v21 = vsel %vm654_vm3, %v2545_v63, 0.0 }
 0x20d   : > { %v2591_v15 = vsel %vm654_vm3, %v2543_v12, 0.0 }
 0x20e   : > { %v2491_v7 = vadd.f32 %v2490_v5, %v2489_v61  ;;  %v2592_v16 = vadd.f32 %v2591_v15, %v2590_v14 }
 0x20f   : > { %v8712_v36 = vpop.f32.mrb[20].mxu0 }
 0x210   : > { %v2594_v58 = vadd.f32 %v2593_v29, %v2592_v16  ;;  %v8714_v11 = vpop.f32.mrb[21].mxu0  ;;  %v2493_v27 = vadd.f32 %v2492_v20, %v2491_v7  ;;  %v2548_v43 = vmul.f32 %v8712_v36, %v8712_v36  ;;  %v2498_v38 = vsel %vm654_vm3, %v8712_v36, 0.0 }
 0x211   : > { %v2494_v31 = vsel %vm654_vm3, %v8714_v11, 0.0  ;;  %v2546_v33 = vmul.f32 %v8714_v11, %v8714_v11  ;;  %v8721_v34 = vpop.f32.mrb[22].mxu0 }
 0x212   : > { %v2495_v41 = vadd.f32 %v2494_v31, %v2493_v27  ;;  %v2596_v53 = vadd.f32 %v2595_v21, %v2594_v58  ;;  %v8723_v39 = vpop.f32.mrb[23].mxu0  ;;  %v2549_v51 = vmul.f32 %v8721_v34, %v8721_v34  ;;  %v2601_v48 = vsel %vm654_vm3, %v2548_v43, 0.0 }
 0x213   : > { %v2597_v19 = vsel %vm654_vm3, %v2546_v33, 0.0  ;;  %v2496_v45 = vsel %vm654_vm3, %v8723_v39, 0.0  ;;  %v2547_v26 = vmul.f32 %v8723_v39, %v8723_v39  ;;  %v2500_v56 = vsel %vm654_vm3, %v8721_v34, 0.0 }
 0x214   : > { %v2598_v44 = vadd.f32 %v2597_v19, %v2596_v53  ;;  %v2497_v47 = vadd.f32 %v2496_v45, %v2495_v41  ;;  %v2603_v2 = vsel %vm654_vm3, %v2549_v51, 0.0 }
 0x215   : > { %v2599_v52 = vsel %vm654_vm3, %v2547_v26, 0.0 }
 0x216   : > { %v2499_v1 = vadd.f32 %v2498_v38, %v2497_v47  ;;  %v2600_v55 = vadd.f32 %v2599_v52, %v2598_v44 }
 0x217   : > { %v8740_v54 = vpop.f32.mrb[24].mxu0 }
 0x218   : > { %v2602_v60 = vadd.f32 %v2601_v48, %v2600_v55  ;;  %v8742_v40 = vpop.f32.mrb[25].mxu0  ;;  %v2501_v0 = vadd.f32 %v2500_v56, %v2499_v1  ;;  %v2552_v14 = vmul.f32 %v8740_v54, %v8740_v54  ;;  %v2506_v16 = vsel %vm654_vm3, %v8740_v54, 0.0 }
 0x219   : > { %v2502_v62 = vsel %vm654_vm3, %v8742_v40, 0.0  ;;  %v2550_v59 = vmul.f32 %v8742_v40, %v8742_v40  ;;  %v8749_v6 = vpop.f32.mrb[26].mxu0 }
 0x21a   : > { %v2503_v8 = vadd.f32 %v2502_v62, %v2501_v0  ;;  %v2604_v10 = vadd.f32 %v2603_v2, %v2602_v60  ;;  %v8751_v12 = vpop.f32.mrb[27].mxu0  ;;  %v2553_v29 = vmul.f32 %v8749_v6, %v8749_v6  ;;  %v2609_v21 = vsel %vm654_vm3, %v2552_v14, 0.0 }
 0x21b   : > { %v2605_v61 = vsel %vm654_vm3, %v2550_v59, 0.0  ;;  %v2504_v5 = vsel %vm654_vm3, %v8751_v12, 0.0  ;;  %v2551_v63 = vmul.f32 %v8751_v12, %v8751_v12  ;;  %v2508_v31 = vsel %vm654_vm3, %v8749_v6, 0.0 }
 0x21c   : > { %v2606_v15 = vadd.f32 %v2605_v61, %v2604_v10  ;;  %v2505_v7 = vadd.f32 %v2504_v5, %v2503_v8  ;;  %v2611_v19 = vsel %vm654_vm3, %v2553_v29, 0.0 }
 0x21d   : > { %v2607_v20 = vsel %vm654_vm3, %v2551_v63, 0.0 }
 0x21e   : > { %v2507_v58 = vadd.f32 %v2506_v16, %v2505_v7  ;;  %v2608_v27 = vadd.f32 %v2607_v20, %v2606_v15 }
 0x21f   : > { %v8768_v33 = vpop.f32.mrb[28].mxu0 }
 0x220   : > { %v2610_v41 = vadd.f32 %v2609_v21, %v2608_v27  ;;  %v8770_v53 = vpop.f32.mrb[29].mxu0  ;;  %v2509_v43 = vadd.f32 %v2508_v31, %v2507_v58  ;;  %v2556_v52 = vmul.f32 %v8768_v33, %v8768_v33  ;;  %v2514_v0 = vsel %vm654_vm3, %v8768_v33, 0.0 }
 0x221   : > { %v2510_v45 = vsel %vm654_vm3, %v8770_v53, 0.0  ;;  %v2554_v26 = vmul.f32 %v8770_v53, %v8770_v53  ;;  %v8777_v44 = vpop.f32.mrb[30].mxu0 }
 0x222   : > { %v2511_v47 = vadd.f32 %v2510_v45, %v2509_v43  ;;  %v2612_v38 = vadd.f32 %v2611_v19, %v2610_v41  ;;  %v8779_v51 = vpop.f32.mrb[31].mxu0  ;;  %v2557_v2 = vmul.f32 %v8777_v44, %v8777_v44  ;;  %v2617_v10 = vsel %vm654_vm3, %v2556_v52, 0.0 }
 0x223   : > { %v2613_v1 = vsel %vm654_vm3, %v2554_v26, 0.0  ;;  %v2512_v55 = vsel %vm654_vm3, %v8779_v51, 0.0  ;;  %v2555_v48 = vmul.f32 %v8779_v51, %v8779_v51  ;;  %v2516_v14 = vsel %vm654_vm3, %v8777_v44, 0.0 }
 0x224   : > { %v2614_v56 = vadd.f32 %v2613_v1, %v2612_v38  ;;  %v2513_v60 = vadd.f32 %v2512_v55, %v2511_v47  ;;  %v2619_v63 = vsel %vm654_vm3, %v2557_v2, 0.0 }
 0x225   : > { %v2615_v62 = vsel %vm654_vm3, %v2555_v48, 0.0 }
 0x226   : > { %v2515_v59 = vadd.f32 %v2514_v0, %v2513_v60  ;;  %v2616_v8 = vadd.f32 %v2615_v62, %v2614_v56 }
 0x228   : > { %v2517_v61 = vadd.f32 %v2516_v14, %v2515_v59  ;;  %v2618_v5 = vadd.f32 %v2617_v10, %v2616_v8 }
 0x22a   : > { %v2518_v15 = vrot.slane %v2517_v61, 4  ;;  %v2620_v7 = vadd.f32 %v2619_v63, %v2618_v5 }
 0x22c   : > { %v2519_v16 = vadd.f32 %v2518_v15, %v2517_v61  ;;  %v2621_v29 = vrot.slane %v2620_v7, 4 }
 0x22e   : > { %v2520_v20 = vrot.slane %v2519_v16, 2  ;;  %v2622_v58 = vadd.f32 %v2621_v29, %v2620_v7 }
 0x230   : > { %v2521_v27 = vadd.f32 %v2520_v20, %v2519_v16  ;;  %v2623_v21 = vrot.slane %v2622_v58, 2 }
 0x232   : > { %v2522_v31 = vrot.slane %v2521_v27, 1  ;;  %v2624_v41 = vadd.f32 %v2623_v21, %v2622_v58 }
 0x234   : > { %v2523_v43 = vadd.f32 %v2522_v31, %v2521_v27  ;;  %v2625_v19 = vrot.slane %v2624_v41, 1 }
 0x236   : > { %v8797_v45 = vmul.f32 0.00390625, %v2523_v43  ;;  %v2626_v26 = vadd.f32 %v2625_v19, %v2624_v41 }
 0x238   : > { %v2627_v47 = vmul.f32 0.00390625, %v2626_v26  ;;  %v2628_v38 = vmul.f32 %v8797_v45, %v8797_v45  ;;  %v2658_v52 = vsub.f32 %v8770_v53, %v8797_v45  ;;  %v2659_v1 = vsub.f32 %v8779_v51, %v8797_v45 }
 0x239   : > { %v2630_v55 = vsub.f32 %v8575_v25, %v8797_v45  ;;  %v2631_v48 = vsub.f32 %v8581_v18, %v8797_v45  ;;  %v2632_v56 = vsub.f32 %v8573_v22, %v8797_v45  ;;  %v2633_v60 = vsub.f32 %v8579_v24, %v8797_v45 }
 0x23a   : > { %v2629_v0 = vsub.f32 %v2627_v47, %v2628_v38  ;;  %v2634_v2 = vsub.f32 %v8602_v13, %v8797_v45  ;;  %v2635_v53 = vsub.f32 %v8611_v50, %v8797_v45  ;;  %v2636_v51 = vsub.f32 %v8600_v23, %v8797_v45 }
 0x23b   : > { %v2637_v25 = vsub.f32 %v8609_v37, %v8797_v45  ;;  %v2638_v18 = vsub.f32 %v8630_v4, %v8797_v45  ;;  %v2639_v22 = vsub.f32 %v8639_v46, %v8797_v45  ;;  %v2640_v24 = vsub.f32 %v8628_v49, %v8797_v45 }
 0x23c   : > { %v2662_v62 = vadd.f32 1e-05, %v2629_v0  ;;  %v2641_v13 = vsub.f32 %v8637_v9, %v8797_v45  ;;  %v2642_v50 = vsub.f32 %v8658_v30, %v8797_v45  ;;  %v2643_v23 = vsub.f32 %v8667_v42, %v8797_v45 }
 0x23d   : > { %v2644_v37 = vsub.f32 %v8656_v32, %v8797_v45  ;;  %v2645_v4 = vsub.f32 %v8665_v35, %v8797_v45  ;;  %v2646_v46 = vsub.f32 %v8686_v28, %v8797_v45  ;;  %v2647_v49 = vsub.f32 %v8695_v17, %v8797_v45 }
 0x23e   : > { %7672 = vrsqrt.f32 %v2662_v62  ;;  %v2648_v9 = vsub.f32 %v8684_v57, %v8797_v45  ;;  %v2649_v30 = vsub.f32 %v8693_v3, %v8797_v45  ;;  %v2650_v42 = vsub.f32 %v8714_v11, %v8797_v45 }
 0x23f   : > { %v2651_v32 = vsub.f32 %v8723_v39, %v8797_v45  ;;  %v2652_v35 = vsub.f32 %v8712_v36, %v8797_v45  ;;  %v2653_v28 = vsub.f32 %v8721_v34, %v8797_v45  ;;  %v2654_v17 = vsub.f32 %v8742_v40, %v8797_v45 }
 0x240   : > { %v2655_v59 = vsub.f32 %v8751_v12, %v8797_v45  ;;  %v2656_v8 = vsub.f32 %v8740_v54, %v8797_v45  ;;  %v2657_v10 = vsub.f32 %v8749_v6, %v8797_v45 }
 0x248   : > { %v8865_v5 = vpop.eup %7672 }
 0x249   : > { %v2692_v63 = vmul.f32 %v8865_v5, %v2658_v52  ;;  %v2693_v15 = vmul.f32 %v8865_v5, %v2659_v1  ;;  %v2666_v7 = vmul.f32 %v8865_v5, %v2632_v56  ;;  %v2667_v16 = vmul.f32 %v8865_v5, %v2633_v60 }
 0x24a   : > { %v8872_v29 = vmul.f32 %v8865_v5, %v2630_v55  ;;  %v8875_v20 = vmul.f32 %v8865_v5, %v2631_v48  ;;  %v8878_v58 = vmul.f32 %v8865_v5, %v2634_v2  ;;  %v8881_v27 = vmul.f32 %v8865_v5, %v2635_v53 }
 0x24b   : > { %v2724_v21 = vmax.f32 %v2692_v63, 0.0  ;;  %v2725_v31 = vmax.f32 %v2693_v15, 0.0  ;;  %v2698_v41 = vmax.f32 %v2666_v7, 0.0  ;;  %v2699_v43 = vmax.f32 %v2667_v16, 0.0 }
 0x24c   : > { %v8884_v19 = vmul.f32 %v8865_v5, %v2636_v51  ;;  %v8887_v26 = vmul.f32 %v8865_v5, %v2637_v25  ;;  %v8890_v47 = vmul.f32 %v8865_v5, %v2638_v18  ;;  %v8893_v38 = vmul.f32 %v8865_v5, %v2639_v22 }
 0x24d   : > { %v6979_v52 = vpack.c.bf16 %v2724_v21, %v2724_v21  ;;  %v6980_v1 = vpack.c.bf16 %v2725_v31, %v2725_v31  ;;  %v6953_v55 = vpack.c.bf16 %v2698_v41, %v2698_v41  ;;  %v6954_v48 = vpack.c.bf16 %v2699_v43, %v2699_v43  ;;  %v3256_v21 = vld [vmem:[#allocation2 + $0xbc] sm:$0x1] }
 0x24e   : > { %v8896_v56 = vmul.f32 %v8865_v5, %v2640_v24  ;;  %v8899_v60 = vmul.f32 %v8865_v5, %v2641_v13  ;;  %v8902_v0 = vmul.f32 %v8865_v5, %v2642_v50  ;;  %v8905_v2 = vmul.f32 %v8865_v5, %v2643_v23 }
 0x24f   : > { %v3066_v53 = vshrl.u32 %v6979_v52, 16  ;;  %v3074_v51 = vshrl.u32 %v6980_v1, 16  ;;  %v3077_v25 = vshll.u32 %v6980_v1, 16  ;;  %v3069_v18 = vshll.u32 %v6979_v52, 16  ;;  %v3165_v1 = vld [vmem:[#allocation2 + $0x20] sm:$0x1] }
 0x250   : > { %v2845_v22 = vshrl.u32 %v6953_v55, 16  ;;  %v2848_v62 = vshll.u32 %v6953_v55, 16  ;;  %v2853_v63 = vshrl.u32 %v6954_v48, 16  ;;  %v2856_v15 = vshll.u32 %v6954_v48, 16 }
 0x251   : > { %v3068_v13 = vrot.slane %v3066_v53, 7  ;;  %v3076_v50 = vrot.slane %v3074_v51, 7  ;;  %v8914_v7 = vmul.f32 %v8865_v5, %v2644_v37  ;;  %v8917_v23 = vmul.f32 %v8865_v5, %v2645_v4  ;;  %v3161_v4 = vld [vmem:[#allocation2 + $0x18] sm:$0xf] }
 0x252   : > { %v2847_v31 = vrot.slane %v2845_v22, 7  ;;  %v2855_v41 = vrot.slane %v2853_v63, 7  ;;  %v8926_v43 = vmul.f32 %v8865_v5, %v2646_v46  ;;  %v8929_v52 = vmul.f32 %v8865_v5, %v2647_v49 }
 0x253   : > { %v3072_v55 = vrot.slane %v3068_v13, 4  ;;  %v3079_v48 = vor.u32 %v3077_v25, %v3076_v50  ;;  %v3081_v53 = vrot.slane %v3076_v50, 4  ;;  %v8941_v46 = vmul.f32 %v8865_v5, %v2648_v9 }
 0x254   : > { %v2850_v51 = vor.u32 %v2848_v62, %v2847_v31  ;;  %v2851_v49 = vrot.slane %v2847_v31, 4  ;;  %v2858_v22 = vor.u32 %v2856_v15, %v2855_v41  ;;  %v2860_v63 = vrot.slane %v2855_v41, 4 }
 0x255   : > { %v3080_v61 = vsel %vm8909_vm11, %v3072_v55, %v3079_v48  ;;  %v3257_v14 = vsel %vm8921_vm12, %v3081_v53, %v3256_v21  ;;  %v8951_v25 = vmul.f32 %v8865_v5, %v2649_v30  ;;  %v8957_v57 = vmul.f32 %v8865_v5, %v2650_v42  ;;  %v3151_v21 = vld [vmem:[#allocation2 + $0xc] sm:$0xf] }
 0x256   : > { %3255 = vst.msk [vmem:[#allocation2 + $0xb8] sm:$0xf] %vm3148_vm6, %v3080_v61  ;;  %3258 = vst [vmem:[#allocation2 + $0xbc] sm:$0x1] %v3257_v14  ;;  %v2859_v9 = vsel %vm8909_vm11, %v2851_v49, %v2858_v22  ;;  %v3162_v62 = vsel %vm8933_vm13, %v2850_v51, %v3161_v4  ;;  %v3166_v3 = vsel %vm8921_vm12, %v2860_v63, %v3165_v1  ;;  %v2697_v6 = vmax.f32 %v8875_v20, 0.0 }
 0x257   : > { %v8970_v11 = vmul.f32 %v8865_v5, %v2651_v32  ;;  %3163 = vst [vmem:[#allocation2 + $0x18] sm:$0xf] %v3162_v62  ;;  %3164 = vst.msk [vmem:[#allocation2 + $0x1c] sm:$0xf] %vm3148_vm6, %v2859_v9  ;;  %v8977_v30 = vmul.f32 %v8865_v5, %v2652_v35  ;;  %v8983_v42 = vmul.f32 %v8865_v5, %v2653_v28  ;;  %v2702_v14 = vmax.f32 %v8884_v19, 0.0 }
 0x258   : > { %3167 = vst [vmem:[#allocation2 + $0x20] sm:$0x1] %v3166_v3  ;;  %v8989_v39 = vmul.f32 %v8865_v5, %v2654_v17  ;;  %v8995_v36 = vmul.f32 %v8865_v5, %v2655_v59  ;;  %v9001_v34 = vmul.f32 %v8865_v5, %v2656_v8  ;;  %v9007_v40 = vmul.f32 %v8865_v5, %v2657_v10  ;;  %v3252_v59 = vld [vmem:[#allocation2 + $0xb4] sm:$0xf] }
 0x259   : > { %v11201_v32 = vsub.f32 %v8768_v33, %v8797_v45  ;;  %v11202_v35 = vsub.f32 %v8777_v44, %v8797_v45  ;;  %v3071_v28 = vor.u32 %v3069_v18, %v3068_v13  ;;  %v2696_v17 = vmax.f32 %v8872_v29, 0.0 }
 0x25a   : > { %v2700_v8 = vmax.f32 %v8878_v58, 0.0  ;;  %v2701_v10 = vmax.f32 %v8881_v27, 0.0  ;;  %v2703_v61 = vmax.f32 %v8887_v26, 0.0  ;;  %v2704_v44 = vmax.f32 %v8890_v47, 0.0 }
 0x25b   : > { %v9013_v12 = vmul.f32 %v8865_v5, %v11201_v32  ;;  %v9019_v54 = vmul.f32 %v8865_v5, %v11202_v35  ;;  %v6951_v33 = vpack.c.bf16 %v2696_v17, %v2696_v17  ;;  %v2705_v45 = vmax.f32 %v8893_v38, 0.0 }
 0x25c   : > { %v2706_v5 = vmax.f32 %v8896_v56, 0.0  ;;  %v2707_v29 = vmax.f32 %v8899_v60, 0.0  ;;  %v2708_v20 = vmax.f32 %v8902_v0, 0.0  ;;  %v6952_v18 = vpack.c.bf16 %v2697_v6, %v2697_v6 }
 0x25d   : > { %v3408_v27 = vld [vmem:[#allocation2 + $0xb8] sm:$0x8]  ;;  %v2709_v26 = vmax.f32 %v8905_v2, 0.0  ;;  %v2710_v47 = vmax.f32 %v8914_v7, 0.0  ;;  %v3253_v38 = vsel %vm8933_vm13, %v3071_v28, %v3252_v59  ;;  %v3517_v15 = vld [vmem:[#allocation2 + $0xbc] sm:$0x1]  ;;  %v9045_v49 = vpack.c.bf16 %v2700_v8, %v2700_v8 }
 0x25e   : > { %v3533_v19 = vld [vmem:[#allocation2 + $0xb8] sm:$0xf]  ;;  %v6747_v56 = vrot.slane %v3408_v27, 11  ;;  %v2828_v50 = vshrl.u32 %v6951_v33, 16  ;;  %3254 = vst [vmem:[#allocation2 + $0xb4] sm:$0xf] %v3253_v38  ;;  %v9050_v62 = vpack.c.bf16 %v2701_v10, %v2701_v10  ;;  %v9052_v3 = vpack.c.bf16 %v2702_v14, %v2702_v14 }
 0x25f   : > { %3537 = vst.msk [vmem:[#allocation2 + $0xd0] sm:$0xf] %vm3148_vm6, %v3533_v19  ;;  %v3267_v13 = vld [vmem:[#allocation2 + $0x18] sm:$0x2]  ;;  %v3349_v41 = vld [vmem:[#allocation2 + $0x18] sm:$0x1]  ;;  %v9056_v28 = vpack.c.bf16 %v2703_v61, %v2703_v61  ;;  %v9058_v17 = vpack.c.bf16 %v2704_v44, %v2704_v44  ;;  %v9066_v38 = vpack.c.bf16 %v2706_v5, %v2706_v5  ;;  %v9105_v60 = vpack.c.bf16 %v2710_v47, %v2710_v47 }
 0x260   : > { %v6718_v31 = vrot.slane %v3267_v13, 9  ;;  %v3395_v4 = vld [vmem:[#allocation2 + $0x1c] sm:$0x8]  ;;  %v2831_v1 = vshll.u32 %v6951_v33, 16  ;;  %v3518_v55 = vsel %vm9034_vm14, %v6747_v56, %v3517_v15  ;;  %v2830_v51 = vrot.slane %v2828_v50, 7 }
 0x261   : > { %v6734_v48 = vrot.slane %v3395_v4, 11  ;;  %v3525_v53 = vld [vmem:[#allocation2 + $0x1c] sm:$0xf]  ;;  %3519 = vst [vmem:[#allocation2 + $0xbc] sm:$0x1] %v3518_v55  ;;  %v2836_v9 = vshrl.u32 %v6952_v18, 16  ;;  %v9060_v33 = vpack.c.bf16 %v2705_v45, %v2705_v45 }
 0x262   : > { %v3350_v22 = vsel %vm8921_vm12, %v6718_v31, %v3349_v41  ;;  %v3478_v63 = vld [vmem:[#allocation2 + $0x20] sm:$0x1]  ;;  %3528 = vst.msk [vmem:[#allocation2 + $0x4] sm:$0xf] %vm3148_vm6, %v3525_v53  ;;  %v2833_v35 = vor.u32 %v2831_v1, %v2830_v51  ;;  %v2834_v6 = vrot.slane %v2830_v51, 4  ;;  %v2839_v8 = vshll.u32 %v6952_v18, 16 }
 0x263   : > { %3351 = vst [vmem:[#allocation2 + $0x18] sm:$0x1] %v3350_v22  ;;  %v3479_v32 = vsel %vm9034_vm14, %v6734_v48, %v3478_v63  ;;  %v2838_v59 = vrot.slane %v2836_v9, 7  ;;  %v3158_v27 = vld [vmem:[#allocation2 + $0x14] sm:$0x1]  ;;  %v2711_v14 = vmax.f32 %v8917_v23, 0.0 }
 0x264   : > { %3480 = vst [vmem:[#allocation2 + $0x20] sm:$0x1] %v3479_v32  ;;  %v3152_v10 = vsel %vm8933_vm13, %v2833_v35, %v3151_v21  ;;  %v2712_v19 = vmax.f32 %v8926_v43, 0.0  ;;  %v2713_v44 = vmax.f32 %v8929_v52, 0.0  ;;  %v2714_v15 = vmax.f32 %v8941_v46, 0.0 }
 0x265   : > { %v2841_v61 = vor.u32 %v2839_v8, %v2838_v59  ;;  %v2843_v56 = vrot.slane %v2838_v59, 4  ;;  %3153 = vst [vmem:[#allocation2 + $0xc] sm:$0xf] %v3152_v10  ;;  %v2715_v45 = vmax.f32 %v8951_v25, 0.0  ;;  %v2716_v18 = vmax.f32 %v8957_v57, 0.0 }
 0x266   : > { %v2717_v13 = vmax.f32 %v8970_v11, 0.0  ;;  %v2718_v50 = vmax.f32 %v8977_v30, 0.0  ;;  %v2719_v5 = vmax.f32 %v8983_v42, 0.0  ;;  %v2720_v52 = vmax.f32 %v8989_v39, 0.0 }
 0x267   : > { %v2842_v23 = vsel %vm8909_vm11, %v2834_v6, %v2841_v61  ;;  %v3159_v43 = vsel %vm8921_vm12, %v2843_v56, %v3158_v27  ;;  %v2721_v46 = vmax.f32 %v8995_v36, 0.0  ;;  %v2722_v25 = vmax.f32 %v9001_v34, 0.0 }
 0x268   : > { %3155 = vst.msk [vmem:[#allocation2 + $0x10] sm:$0xf] %vm3148_vm6, %v2842_v23  ;;  %3160 = vst [vmem:[#allocation2 + $0x14] sm:$0x1] %v3159_v43  ;;  %v2723_v57 = vmax.f32 %v9007_v40, 0.0  ;;  %v2726_v11 = vmax.f32 %v9013_v12, 0.0  ;;  %v9089_v42 = vpack.c.bf16 %v2707_v29, %v2707_v29  ;;  %v9094_v39 = vpack.c.bf16 %v2708_v20, %v2708_v20 }
 0x269   : > { %v2727_v31 = vmax.f32 %v9019_v54, 0.0  ;;  %v9099_v36 = vpack.c.bf16 %v2709_v26, %v2709_v26  ;;  %v9107_v29 = vpack.c.bf16 %v2711_v14, %v2711_v14  ;;  %v9109_v4 = vpack.c.bf16 %v2712_v19, %v2712_v19 }
 0x26a   : > { %v7573_v30 = vld [vmem:[#allocation2 + $0x18] sm:$0xff]   ;;  %v9111_v0 = vpack.c.bf16 %v2713_v44, %v2713_v44  ;;  %v9113_v2 = vpack.c.bf16 %v2714_v15, %v2714_v15  ;;  %v9115_v26 = vpack.c.bf16 %v2715_v45, %v2715_v45  ;;  %v9117_v22 = vpack.c.bf16 %v2716_v18, %v2716_v18 }
 0x26b   : > { %v3524_v21 = vld [vmem:[#allocation2 + $0x18] sm:$0xf]  ;;  %v7574_v41 = vld [vmem:[#allocation2 + $0x20] ss:$0 sps:$4 sm:$0x11]   ;;  %v4276_v20 = vshll.u32 %v7573_v30, 16  ;;  %v9120_v9 = vpack.c.bf16 %v2717_v13, %v2717_v13  ;;  %v9122_v32 = vpack.c.bf16 %v2718_v50, %v2718_v50  ;;  %v9124_v59 = vpack.c.bf16 %v2719_v5, %v2719_v5 }
 0x26c   : > { %3527 = vst.msk [vmem:[#allocation2] sm:$0xf] %vm3148_vm6, %v3524_v21  ;;  %v4488_v1 = vrot.slane %v7573_v30, 1  ;;  %v3526_v55 = vld [vmem:[#allocation2 + $0x20] sm:$0x1]  ;;  %v4274_v48 = vshrl.u32 %v7573_v30, 16  ;;  %v9126_v8 = vpack.c.bf16 %v2720_v52, %v2720_v52  ;;  %v9132_v44 = vpack.c.bf16 %v2721_v46, %v2721_v46 }
 0x26d   : > { %v4281_v53 = vshll.u32 %v7574_v41, 16  ;;  %v3266_v51 = vld [vmem:[#allocation2 + $0xc] sm:$0x2]  ;;  %v4489_v7 = vrot.slane %v7574_v41, 1  ;;  %3530 = vst.msk [vmem:[#allocation2 + $0x8] sm:$0x1] %vm3156_vm8, %v3526_v55 }
 0x26e   : > { %v4278_v47 = vrot.slane %v4276_v20, 1  ;;  %v6717_v63 = vrot.slane %v3266_v51, 9  ;;  %v3346_v6 = vld [vmem:[#allocation2 + $0xc] sm:$0x1]  ;;  %v2862_v27 = vshrl.u32 %v9045_v49, 16  ;;  %v2870_v18 = vshrl.u32 %v9050_v62, 16 }
 0x26f   : > { %v4283_v35 = vrot.slane %v4281_v53, 1  ;;  %v3394_v19 = vld [vmem:[#allocation2 + $0x10] sm:$0x8]  ;;  %v3475_v61 = vld [vmem:[#allocation2 + $0x14] sm:$0x1]  ;;  %v4490_v56 = vsel %vm573_vm0, %v4488_v1, %v4489_v7  ;;  %v2879_v23 = vshrl.u32 %v9052_v3, 16  ;;  %v9190_v7 = vpack.c.bf16 %v2727_v31, %v2727_v31 }
 0x270   : > { %v4279_v10 = vor.u32 %v4278_v47, %v4274_v48  ;;  %v3347_v14 = vsel %vm8921_vm12, %v6717_v63, %v3346_v6  ;;  %v6733_v15 = vrot.slane %v3394_v19, 11  ;;  %v2882_v43 = vshll.u32 %v9052_v3, 16 }
 0x271   : > { %3348 = vst [vmem:[#allocation2 + $0xc] sm:$0x1] %v3347_v14  ;;  %v2887_v5 = vshrl.u32 %v9056_v28, 16  ;;  %v2890_v46 = vshll.u32 %v9056_v28, 16  ;;  %v2896_v30 = vshrl.u32 %v9058_v17, 16  ;;  %v2904_v41 = vshrl.u32 %v9060_v33, 16 }
 0x272   : > { %v4284_v50 = vsel %vm348_vm2, %v4279_v10, %v4283_v35  ;;  %v3476_v52 = vsel %vm9034_vm14, %v6733_v15, %v3475_v61  ;;  %v2913_v1 = vshrl.u32 %v9066_v38, 16  ;;  %v2921_v48 = vshrl.u32 %v9089_v42, 16  ;;  %11206 = vst [vmem:[#allocation4_spill] sm:$0xff] %v9190_v7 }
 0x273   : > { %4455 = vrot.lane.b32.xlu1 %v4284_v50, %s7738_s21  ;;  %3477 = vst [vmem:[#allocation2 + $0x14] sm:$0x1] %v3476_v52  ;;  %v2930_v51 = vshrl.u32 %v9094_v39, 16  ;;  %v2938_v47 = vshrl.u32 %v9099_v36, 16  ;;  %v2947_v35 = vshrl.u32 %v9105_v60, 16  ;;  %v2955_v10 = vshrl.u32 %v9107_v29, 16 }
 0x274   : > { %v9167_v50 = vpack.c.bf16 %v2722_v25, %v2722_v25  ;;  %v9180_v6 = vpack.c.bf16 %v2723_v57, %v2723_v57  ;;  %v9185_v63 = vpack.c.bf16 %v2726_v11, %v2726_v11  ;;  %v3015_v40 = vshrl.u32 %v9122_v32, 16 }
 0x275   : > { %v3023_v12 = vshrl.u32 %v9124_v59, 16  ;;  %v3032_v54 = vshrl.u32 %v9126_v8, 16  ;;  %v3040_v14 = vshrl.u32 %v9132_v44, 16  ;;  %v2864_v11 = vrot.slane %v2862_v27, 7 }
 0x276   : > { %11205 = vst [vmem:[#allocation3_spill] sm:$0xff] %v9185_v63  ;;  %v3049_v57 = vshrl.u32 %v9167_v50, 16  ;;  %v3057_v52 = vshrl.u32 %v9180_v6, 16  ;;  %v9239_v3 = vrot.slane %v2921_v48, 7  ;;  %v9249_v28 = vrot.slane %v2938_v47, 7 }
 0x277   : > { %4535 = vrot.lane.b32.xlu1 %v4490_v56, %s7737_s20  ;;  %v2889_v56 = vrot.slane %v2887_v5, 7  ;;  %v9262_v48 = vrot.slane %v2955_v10, 7  ;;  %v11211_v10 = vshrl.u32 %v9117_v22, 16 }
 0x278   : > { %v7575_v15 = vld [vmem:[#allocation2 + $0xc] sm:$0xff]  }
 0x279   : > { %v4262_v53 = vshrl.u32 %v7575_v15, 16  ;;  %v4264_v55 = vshll.u32 %v7575_v15, 16  ;;  %v4485_v34 = vrot.slane %v7575_v15, 1  ;;  %v3006_v15 = vshrl.u32 %v9120_v9, 16 }
 0x27a   : > { %v7576_v20 = vld [vmem:[#allocation2 + $0x14] ss:$0 sps:$4 sm:$0x11]   ;;  %v2892_v5 = vor.u32 %v2890_v46, %v2889_v56  ;;  %v2894_v27 = vrot.slane %v2889_v56, 4  ;;  %v9253_v46 = vrot.slane %v2947_v35, 7  ;;  %v11208_v35 = vshrl.u32 %v9111_v0, 16 }
 0x27b   : > { %v4266_v21 = vrot.slane %v4264_v55, 1  ;;  %v4269_v13 = vshll.u32 %v7576_v20, 16  ;;  %v4486_v45 = vrot.slane %v7576_v20, 1 }
 0x27c   : > { %v9271_v56 = vrot.slane %v11208_v35, 7  ;;  %v9297_v35 = vrot.slane %v3049_v57, 7  ;;  %v11214_v57 = vshll.u32 %v9058_v17, 16 }
 0x27d   : > { %v4267_v61 = vor.u32 %v4266_v21, %v4262_v53  ;;  %v4271_v55 = vrot.slane %v4269_v13, 1  ;;  %v4487_v25 = vsel %vm573_vm0, %v4485_v34, %v4486_v45  ;;  %v3083_v21 = vshrl.u32 %v9185_v63, 16  ;;  %v3175_v34 = vld [vmem:[#allocation2 + $0x30] sm:$0xf] }
 0x27e   : > { %v3091_v13 = vshrl.u32 %v9190_v7, 16  ;;  %v2881_v45 = vrot.slane %v2879_v23, 7  ;;  %v9225_v23 = vrot.slane %v2896_v30, 7  ;;  %v9245_v30 = vrot.slane %v2930_v51, 7 }
 0x27f   : > { %v4272_v53 = vsel %vm348_vm2, %v4267_v61, %v4271_v55  ;;  %v2872_v61 = vrot.slane %v2870_v18, 7  ;;  %v3179_v55 = vld [vmem:[#allocation2 + $0x38] sm:$0x1]  ;;  %v9235_v18 = vrot.slane %v2913_v1, 7  ;;  %v11207_v51 = vshrl.u32 %v9109_v4, 16 }
 0x280   : > { %4453 = vrot.lane.b32.xlu0 %v4272_v53, %s7738_s21  ;;  %v2884_v31 = vor.u32 %v2882_v43, %v2881_v45  ;;  %v2885_v19 = vrot.slane %v2881_v45, 4  ;;  %v9229_v53 = vrot.slane %v2904_v41, 7  ;;  %v3180_v1 = vsel %vm8921_vm12, %v2894_v27, %v3179_v55  ;;  %v9285_v55 = vld [vmem:[#allocation2 + $0xb4] sm:$0x2] }
 0x281   : > { %v9266_v47 = vrot.slane %v11207_v51, 7  ;;  %3181 = vst [vmem:[#allocation2 + $0x38] sm:$0x1] %v3180_v1  ;;  %v9289_v27 = vrot.slane %v3015_v40, 7  ;;  %v3168_v1 = vld [vmem:[#allocation2 + $0x24] sm:$0xf] }
 0x282   : > { %v3176_v43 = vsel %vm8933_vm13, %v2884_v31, %v3175_v34  ;;  %v2893_v41 = vsel %vm8909_vm11, %v2885_v19, %v2892_v5  ;;  %v11209_v19 = vshrl.u32 %v9113_v2, 16  ;;  %v11210_v31 = vshrl.u32 %v9115_v26, 16 }
 0x283   : > { %3177 = vst [vmem:[#allocation2 + $0x30] sm:$0xf] %v3176_v43  ;;  %3178 = vst.msk [vmem:[#allocation2 + $0x34] sm:$0xf] %vm3148_vm6, %v2893_v41  ;;  %v9283_v34 = vrot.slane %v11211_v10, 7  ;;  %v9287_v5 = vrot.slane %v3006_v15, 7 }
 0x284   : > { %4533 = vrot.lane.b32.xlu0 %v4487_v25, %s7737_s20  ;;  %v9275_v25 = vrot.slane %v11209_v19, 7  ;;  %v9279_v45 = vrot.slane %v11210_v31, 7  ;;  %v9291_v43 = vrot.slane %v3023_v12, 7  ;;  %v9293_v41 = vrot.slane %v3032_v54, 7  ;;  %v3172_v10 = vld [vmem:[#allocation2 + $0x2c] sm:$0x1] }
 0x285   : > { %v9295_v51 = vrot.slane %v3040_v14, 7  ;;  %v9299_v19 = vrot.slane %v3057_v52, 7  ;;  %v9301_v31 = vrot.slane %v3083_v21, 7  ;;  %v9303_v20 = vrot.slane %v3091_v13, 7 }
 0x286   : > { %v11212_v15 = vshll.u32 %v9045_v49, 16  ;;  %v2868_v7 = vrot.slane %v2864_v11, 4  ;;  %v11213_v12 = vshll.u32 %v9050_v62, 16  ;;  %v6731_v63 = vrot.slane %v9285_v55, 9  ;;  %v9462_v55 = vld [vmem:[#allocation2 + $0x60] sm:$0xf] }
 0x287   : > { %v2877_v14 = vrot.slane %v2872_v61, 4  ;;  %v9313_v52 = vor.u32 %v11214_v57, %v9225_v23  ;;  %v11215_v62 = vshll.u32 %v9060_v33, 16  ;;  %v11217_v33 = vshll.u32 %v9089_v42, 16 }
 0x288   : > { %v2867_v40 = vor.u32 %v11212_v15, %v2864_v11  ;;  %v2875_v54 = vor.u32 %v11213_v12, %v2872_v61  ;;  %v11219_v61 = vshll.u32 %v9099_v36, 16 }
 0x289   : > { %v9323_v11 = vor.u32 %v11215_v62, %v9229_v53  ;;  %v3173_v17 = vsel %vm8921_vm12, %v2877_v14, %v3172_v10  ;;  %v11218_v10 = vshll.u32 %v9094_v39, 16 }
 0x28a   : > { %v2876_v13 = vsel %vm8909_vm11, %v2868_v7, %v2875_v54  ;;  %v3169_v49 = vsel %vm8933_vm13, %v2867_v40, %v3168_v1  ;;  %v3269_v15 = vld [vmem:[#allocation2 + $0x30] sm:$0x2]  ;;  %v3355_v12 = vld [vmem:[#allocation2 + $0x30] sm:$0x1]  ;;  %v11216_v7 = vshll.u32 %v9066_v38, 16  ;;  %v9338_v40 = vor.u32 %v11217_v33, %v9239_v3 }
 0x28b   : > { %3170 = vst [vmem:[#allocation2 + $0x24] sm:$0xf] %v3169_v49  ;;  %3171 = vst.msk [vmem:[#allocation2 + $0x28] sm:$0xf] %vm3148_vm6, %v2876_v13  ;;  %v6720_v57 = vrot.slane %v3269_v15, 9  ;;  %v9344_v14 = vor.u32 %v11218_v10, %v9245_v30  ;;  %v2936_v38 = vrot.slane %v9245_v30, 4  ;;  %v2943_v42 = vor.u32 %v11219_v61, %v9249_v28 }
 0x28c   : > { %v9332_v54 = vor.u32 %v11216_v7, %v9235_v18  ;;  %v3397_v62 = vld [vmem:[#allocation2 + $0x34] sm:$0x8]  ;;  %3174 = vst [vmem:[#allocation2 + $0x2c] sm:$0x1] %v3173_v17  ;;  %v3484_v7 = vld [vmem:[#allocation2 + $0x38] sm:$0x1] }
 0x28d   : > { %v6736_v49 = vrot.slane %v3397_v62, 11  ;;  %v11220_v15 = vshll.u32 %v9105_v60, 16  ;;  %v3356_v39 = vsel %vm8921_vm12, %v6720_v57, %v3355_v12  ;;  %v2953_v10 = vrot.slane %v9253_v46, 4  ;;  %v3186_v1 = vld [vmem:[#allocation2 + $0x44] sm:$0x1] }
 0x28e   : > { %v11221_v30 = vshll.u32 %v9107_v29, 16  ;;  %3357 = vst [vmem:[#allocation2 + $0x30] sm:$0x1] %v3356_v39  ;;  %v11222_v60 = vshll.u32 %v9109_v4, 16  ;;  %v11224_v57 = vshll.u32 %v9113_v2, 16  ;;  %v11225_v4 = vshll.u32 %v9115_v26, 16 }
 0x28f   : > { %v9354_v17 = vor.u32 %v11220_v15, %v9253_v46  ;;  %v3485_v36 = vsel %vm9034_vm14, %v6736_v49, %v3484_v7  ;;  %v11223_v46 = vshll.u32 %v9111_v0, 16  ;;  %v2987_v49 = vrot.slane %v9275_v25, 4 }
 0x290   : > { %v2960_v62 = vor.u32 %v11221_v30, %v9262_v48  ;;  %v9368_v61 = vor.u32 %v11222_v60, %v9266_v47  ;;  %3486 = vst [vmem:[#allocation2 + $0x38] sm:$0x1] %v3485_v36  ;;  %v9380_v39 = vor.u32 %v11224_v57, %v9275_v25  ;;  %v2994_v7 = vor.u32 %v11225_v4, %v9279_v45 }
 0x291   : > { %v9374_v12 = vor.u32 %v11223_v46, %v9271_v56  ;;  %v11226_v0 = vshll.u32 %v9117_v22, 16  ;;  %v3004_v36 = vrot.slane %v9283_v34, 4  ;;  %v11227_v25 = vshll.u32 %v9120_v9, 16 }
 0x292   : > { %v3268_v2 = vld [vmem:[#allocation2 + $0x24] sm:$0x2]  ;;  %v3352_v57 = vld [vmem:[#allocation2 + $0x24] sm:$0x1]  ;;  %v3396_v29 = vld [vmem:[#allocation2 + $0x28] sm:$0x8] }
 0x293   : > { %v9390_v60 = vor.u32 %v11226_v0, %v9283_v34  ;;  %v3011_v13 = vor.u32 %v11227_v25, %v9287_v5  ;;  %v11228_v26 = vshll.u32 %v9122_v32, 16  ;;  %v11229_v22 = vshll.u32 %v9124_v59, 16  ;;  %v3481_v15 = vld [vmem:[#allocation2 + $0x2c] sm:$0x1] }
 0x294   : > { %v11230_v34 = vshll.u32 %v9126_v8, 16  ;;  %v6719_v30 = vrot.slane %v3268_v2, 9  ;;  %v6735_v33 = vrot.slane %v3396_v29, 11  ;;  %v11231_v9 = vshll.u32 %v9132_v44, 16 }
 0x295   : > { %v9400_v4 = vor.u32 %v11228_v26, %v9289_v27  ;;  %v3028_v0 = vor.u32 %v11229_v22, %v9291_v43  ;;  %v11232_v32 = vshll.u32 %v9167_v50, 16  ;;  %v3021_v59 = vrot.slane %v9289_v27, 4  ;;  %v9430_v27 = vld [vmem:[#allocation2 + $0x30] sm:$0xff]   ;;  %v9442_v50 = vld [vmem:[#allocation2 + $0x48] sm:$0xf] }
 0x296   : > { %v9408_v46 = vor.u32 %v11230_v34, %v9293_v41  ;;  %v3045_v25 = vor.u32 %v11231_v9, %v9295_v51  ;;  %v3038_v8 = vrot.slane %v9293_v41, 4  ;;  %v11233_v2 = vshll.u32 %v9180_v6, 16  ;;  %v3388_v34 = vld [vmem:[#allocation2 + $0xb4] sm:$0x1]  ;;  %v11234_v6 = vld [vmem:[#allocation3_spill] sm:$0xff] }
 0x297   : > { %v9416_v26 = vor.u32 %v11232_v32, %v9297_v35  ;;  %v3353_v44 = vsel %vm8921_vm12, %v6719_v30, %v3352_v57  ;;  %v3482_v9 = vsel %vm9034_vm14, %v6735_v33, %v3481_v15  ;;  %v3055_v32 = vrot.slane %v9297_v35, 4  ;;  %v11236_v57 = vld [vmem:[#allocation4_spill] sm:$0xff]  ;;  %v3182_v35 = vld [vmem:[#allocation2 + $0x3c] sm:$0xf]  ;;  %v3196_v41 = vld [vmem:[#allocation2 + $0x54] sm:$0xf] }
 0x298   : > { %v3062_v29 = vor.u32 %v11233_v2, %v9299_v19  ;;  %3354 = vst [vmem:[#allocation2 + $0x24] sm:$0x1] %v3353_v44  ;;  %3483 = vst [vmem:[#allocation2 + $0x2c] sm:$0x1] %v3482_v9  ;;  %v11235_v2 = vshll.u32 %v11234_v6, 16  ;;  %v3089_v30 = vrot.slane %v9301_v31, 4  ;;  %v3389_v44 = vsel %vm8921_vm12, %v6731_v63, %v3388_v34 }
 0x299   : > { %v11237_v33 = vshll.u32 %v11236_v57, 16  ;;  %v9444_v21 = vld [vmem:[#allocation2 + $0x38] ss:$0 sps:$4 sm:$0x11]   ;;  %v11238_v9 = vrot.slane %v9225_v23, 4  ;;  %v11239_v6 = vrot.slane %v9235_v18, 4  ;;  %v2944_v57 = vsel %vm8909_vm11, %v2936_v38, %v2943_v42 }
 0x29a   : > { %v9436_v22 = vor.u32 %v11235_v2, %v9301_v31  ;;  %v3200_v63 = vld [vmem:[#allocation2 + $0x5c] sm:$0x1]  ;;  %v4298_v34 = vshrl.u32 %v9430_v27, 16  ;;  %v4300_v23 = vshll.u32 %v9430_v27, 16  ;;  %v2961_v18 = vsel %vm8909_vm11, %v2953_v10, %v2960_v62  ;;  %3390 = vst [vmem:[#allocation2 + $0xb4] sm:$0x1] %v3389_v44 }
 0x29b   : > { %v3096_v15 = vor.u32 %v11237_v33, %v9303_v20  ;;  %v2910_v31 = vsel %vm8909_vm11, %v11238_v9, %v9323_v11  ;;  %v2927_v2 = vsel %vm8909_vm11, %v11239_v6, %v9338_v40  ;;  %v3193_v33 = vld [vmem:[#allocation2 + $0x50] sm:$0x1]  ;;  %3199 = vst.msk [vmem:[#allocation2 + $0x58] sm:$0xf] %vm3148_vm6, %v2944_v57  ;;  %v3207_v40 = vld [vmem:[#allocation2 + $0x68] sm:$0x1]  ;;  %v2995_v10 = vsel %vm8909_vm11, %v2987_v49, %v2994_v7 }
 0x29c   : > { %3185 = vst.msk [vmem:[#allocation2 + $0x40] sm:$0xf] %vm3148_vm6, %v2910_v31  ;;  %3192 = vst.msk [vmem:[#allocation2 + $0x4c] sm:$0xf] %vm3148_vm6, %v2927_v2  ;;  %v3210_v38 = vld [vmem:[#allocation2 + $0x6c] sm:$0xf]  ;;  %v3012_v57 = vsel %vm8909_vm11, %v3004_v36, %v3011_v13  ;;  %v3029_v9 = vsel %vm8909_vm11, %v3021_v59, %v3028_v0 }
 0x29d   : > { %v4305_v42 = vshll.u32 %v9444_v21, 16  ;;  %v11240_v6 = vrot.slane %v9266_v47, 4  ;;  %3206 = vst.msk [vmem:[#allocation2 + $0x64] sm:$0xf] %vm3148_vm6, %v2961_v18  ;;  %v9482_v62 = vld [vmem:[#allocation2 + $0x78] sm:$0xf]  ;;  %v3046_v47 = vsel %vm8909_vm11, %v3038_v8, %v3045_v25  ;;  %v3097_v13 = vsel %vm8909_vm11, %v3089_v30, %v3096_v15 }
 0x29e   : > { %v3221_v44 = vld [vmem:[#allocation2 + $0x80] sm:$0x1]  ;;  %v3214_v31 = vld [vmem:[#allocation2 + $0x74] sm:$0x1]  ;;  %v4302_v2 = vrot.slane %v4300_v23, 1  ;;  %v4495_v18 = vrot.slane %v9444_v21, 1  ;;  %v3063_v23 = vsel %vm8909_vm11, %v3055_v32, %v3062_v29  ;;  %v3183_v21 = vsel %vm8933_vm13, %v9313_v52, %v3182_v35 }
 0x29f   : > { %v2978_v11 = vsel %vm8909_vm11, %v11240_v6, %v9374_v12  ;;  %3220 = vst.msk [vmem:[#allocation2 + $0x7c] sm:$0xf] %vm3148_vm6, %v2995_v10  ;;  %v3231_v12 = vld [vmem:[#allocation2 + $0x90] sm:$0xf]  ;;  %v3224_v49 = vld [vmem:[#allocation2 + $0x84] sm:$0xf]  ;;  %v3190_v32 = vsel %vm8933_vm13, %v9332_v54, %v9442_v50  ;;  %v3204_v50 = vsel %vm8933_vm13, %v9354_v17, %v9462_v55 }
 0x2a0   : > { %3213 = vst.msk [vmem:[#allocation2 + $0x70] sm:$0xf] %vm3148_vm6, %v2978_v11  ;;  %v4307_v7 = vrot.slane %v4305_v42, 1  ;;  %3227 = vst.msk [vmem:[#allocation2 + $0x88] sm:$0xf] %vm3148_vm6, %v3012_v57  ;;  %v4303_v8 = vor.u32 %v4302_v2, %v4298_v34  ;;  %v11241_v29 = vrot.slane %v9229_v53, 4  ;;  %v3225_v6 = vsel %vm8933_vm13, %v9390_v60, %v3224_v49 }
 0x2a1   : > { %3234 = vst.msk [vmem:[#allocation2 + $0x94] sm:$0xf] %vm3148_vm6, %v3029_v9  ;;  %3241 = vst.msk [vmem:[#allocation2 + $0xa0] sm:$0xf] %vm3148_vm6, %v3046_v47  ;;  %v3235_v36 = vld [vmem:[#allocation2 + $0x98] sm:$0x1] }
 0x2a2   : > { %v3228_v0 = vld [vmem:[#allocation2 + $0x8c] sm:$0x1]  ;;  %v3238_v25 = vld [vmem:[#allocation2 + $0x9c] sm:$0xf]  ;;  %v3242_v59 = vld [vmem:[#allocation2 + $0xa4] sm:$0x1]  ;;  %v3187_v24 = vsel %vm8921_vm12, %v11241_v29, %v3186_v1  ;;  %v3197_v1 = vsel %vm8933_vm13, %v9344_v14, %v3196_v41  ;;  %v3211_v14 = vsel %vm8933_vm13, %v9368_v61, %v3210_v38  ;;  %v3218_v61 = vsel %vm8933_vm13, %v9380_v39, %v9482_v62 }
 0x2a3   : > { %3248 = vst.msk [vmem:[#allocation2 + $0xac] sm:$0xf] %vm3148_vm6, %v3063_v23  ;;  %3262 = vst.msk [vmem:[#allocation2 + $0xc4] sm:$0xf] %vm3148_vm6, %v3097_v13  ;;  %v3245_v30 = vld [vmem:[#allocation2 + $0xa8] sm:$0xf] }
 0x2a4   : > { %v3249_v15 = vld [vmem:[#allocation2 + $0xb0] sm:$0x1]  ;;  %v9513_v34 = vld [vmem:[#allocation2 + $0x24] sm:$0xff]   ;;  %v11242_v52 = vrot.slane %v9239_v3, 4  ;;  %v11243_v35 = vrot.slane %v9249_v28, 4  ;;  %v4308_v3 = vsel %vm348_vm2, %v4303_v8, %v4307_v7  ;;  %v11244_v11 = vrot.slane %v9262_v48, 4 }
 0x2a5   : > { %3184 = vst [vmem:[#allocation2 + $0x3c] sm:$0xf] %v3183_v21  ;;  %3188 = vst [vmem:[#allocation2 + $0x44] sm:$0x1] %v3187_v24  ;;  %v11245_v41 = vrot.slane %v9271_v56, 4  ;;  %4459 = vrot.lane.b32.xlu1 %v4308_v3, %s7738_s21  ;;  %v4286_v48 = vshrl.u32 %v9513_v34, 16  ;;  %v3246_v47 = vsel %vm8933_vm13, %v9416_v26, %v3245_v30 }
 0x2a6   : > { %v3194_v53 = vsel %vm8921_vm12, %v11242_v52, %v3193_v33  ;;  %v3201_v54 = vsel %vm8921_vm12, %v11243_v35, %v3200_v63  ;;  %3191 = vst [vmem:[#allocation2 + $0x48] sm:$0xf] %v3190_v32  ;;  %v9531_v33 = vld [vmem:[#allocation2 + $0x2c] ss:$0 sps:$4 sm:$0x11]   ;;  %v3208_v28 = vsel %vm8921_vm12, %v11244_v11, %v3207_v40  ;;  %v4288_v63 = vshll.u32 %v9513_v34, 16 }
 0x2a7   : > { %v3215_v17 = vsel %vm8921_vm12, %v11245_v41, %v3214_v31  ;;  %3195 = vst [vmem:[#allocation2 + $0x50] sm:$0x1] %v3194_v53  ;;  %3198 = vst [vmem:[#allocation2 + $0x54] sm:$0xf] %v3197_v1  ;;  %v3259_v55 = vld [vmem:[#allocation2 + $0xc0] sm:$0xf] }
 0x2a8   : > { %3202 = vst [vmem:[#allocation2 + $0x5c] sm:$0x1] %v3201_v54  ;;  %3205 = vst [vmem:[#allocation2 + $0x60] sm:$0xf] %v3204_v50  ;;  %v11246_v56 = vrot.slane %v9279_v45, 4  ;;  %v4293_v9 = vshll.u32 %v9531_v33, 16  ;;  %v3232_v45 = vsel %vm8933_vm13, %v9400_v4, %v3231_v12 }
 0x2a9   : > { %3209 = vst [vmem:[#allocation2 + $0x68] sm:$0x1] %v3208_v28  ;;  %3212 = vst [vmem:[#allocation2 + $0x6c] sm:$0xf] %v3211_v14  ;;  %v3532_v38 = vld [vmem:[#allocation2 + $0xb4] sm:$0xf] }
 0x2aa   : > { %v3222_v40 = vsel %vm8921_vm12, %v11246_v56, %v3221_v44  ;;  %3216 = vst [vmem:[#allocation2 + $0x74] sm:$0x1] %v3215_v17  ;;  %v3263_v42 = vld [vmem:[#allocation2 + $0xc8] sm:$0x1]  ;;  %v11247_v10 = vrot.slane %v9287_v5, 4  ;;  %v4290_v62 = vrot.slane %v4288_v63, 1  ;;  %v3239_v5 = vsel %vm8933_vm13, %v9408_v46, %v3238_v25 }
 0x2ab   : > { %3219 = vst [vmem:[#allocation2 + $0x78] sm:$0xf] %v3218_v61  ;;  %3223 = vst [vmem:[#allocation2 + $0x80] sm:$0x1] %v3222_v40  ;;  %v11248_v44 = vrot.slane %v9291_v43, 4  ;;  %v11249_v60 = vrot.slane %v9295_v51, 4  ;;  %v3260_v46 = vsel %vm8933_vm13, %v9436_v22, %v3259_v55 }
 0x2ac   : > { %v3229_v39 = vsel %vm8921_vm12, %v11247_v10, %v3228_v0  ;;  %3536 = vst.msk [vmem:[#allocation2 + $0xcc] sm:$0xf] %vm3148_vm6, %v3532_v38  ;;  %3226 = vst [vmem:[#allocation2 + $0x84] sm:$0xf] %v3225_v6  ;;  %v3399_v4 = vld [vmem:[#allocation2 + $0x4c] sm:$0x8]  ;;  %v4291_v49 = vor.u32 %v4290_v62, %v4286_v48 }
 0x2ad   : > { %v3236_v31 = vsel %vm8921_vm12, %v11248_v44, %v3235_v36  ;;  %v3243_v2 = vsel %vm8921_vm12, %v11249_v60, %v3242_v59  ;;  %3230 = vst [vmem:[#allocation2 + $0x8c] sm:$0x1] %v3229_v39  ;;  %3233 = vst [vmem:[#allocation2 + $0x90] sm:$0xf] %v3232_v45  ;;  %v11250_v57 = vrot.slane %v9430_v27, 1  ;;  %v11251_v12 = vrot.slane %v9299_v19, 4 }
 0x2ae   : > { %3237 = vst [vmem:[#allocation2 + $0x98] sm:$0x1] %v3236_v31  ;;  %3240 = vst [vmem:[#allocation2 + $0x9c] sm:$0xf] %v3239_v5  ;;  %v4295_v27 = vrot.slane %v4293_v9, 1  ;;  %v11252_v7 = vrot.slane %v9303_v20, 4 }
 0x2af   : > { %v4496_v43 = vsel %vm573_vm0, %v11250_v57, %v4495_v18  ;;  %v3250_v51 = vsel %vm8921_vm12, %v11251_v12, %v3249_v15  ;;  %3244 = vst [vmem:[#allocation2 + $0xa4] sm:$0x1] %v3243_v2  ;;  %3247 = vst [vmem:[#allocation2 + $0xa8] sm:$0xf] %v3246_v47  ;;  %v3271_v19 = vld [vmem:[#allocation2 + $0x48] sm:$0x2] }
 0x2b0   : > { %4539 = vrot.lane.b32.xlu1 %v4496_v43, %s7737_s20  ;;  %v3264_v26 = vsel %vm8921_vm12, %v11252_v7, %v3263_v42  ;;  %3251 = vst [vmem:[#allocation2 + $0xb0] sm:$0x1] %v3250_v51  ;;  %3261 = vst [vmem:[#allocation2 + $0xc0] sm:$0xf] %v3260_v46  ;;  %v6738_v18 = vrot.slane %v3399_v4, 11  ;;  %v4296_v37 = vsel %vm348_vm2, %v4291_v49, %v4295_v27  ;;  %v4491_v22 = vrot.slane %v9513_v34, 1 }
 0x2b1   : > { %3265 = vst [vmem:[#allocation2 + $0xc8] sm:$0x1] %v3264_v26  ;;  %v4492_v23 = vrot.slane %v9531_v33, 1  ;;  %v6722_v13 = vrot.slane %v3271_v19, 9  ;;  %v3490_v36 = vld [vmem:[#allocation2 + $0x50] sm:$0x1]  ;;  %4457 = vrot.lane.b32.xlu0 %v4296_v37, %s7738_s21 }
 0x2b2   : > { %v3361_v20 = vld [vmem:[#allocation2 + $0x48] sm:$0x1]  ;;  %v3491_v0 = vsel %vm9034_vm14, %v6738_v18, %v3490_v36  ;;  %v3398_v59 = vld [vmem:[#allocation2 + $0x40] sm:$0x8]  ;;  %v3400_v8 = vld [vmem:[#allocation2 + $0x58] sm:$0x8] }
 0x2b3   : > { %v3362_v25 = vsel %vm8921_vm12, %v6722_v13, %v3361_v20  ;;  %3492 = vst [vmem:[#allocation2 + $0x50] sm:$0x1] %v3491_v0  ;;  %v4493_v21 = vsel %vm573_vm0, %v4491_v22, %v4492_v23  ;;  %v6737_v29 = vrot.slane %v3398_v59, 11  ;;  %v6739_v24 = vrot.slane %v3400_v8, 11  ;;  %v3270_v32 = vld [vmem:[#allocation2 + $0x3c] sm:$0x2] }
 0x2b4   : > { %3363 = vst [vmem:[#allocation2 + $0x48] sm:$0x1] %v3362_v25  ;;  %v3272_v30 = vld [vmem:[#allocation2 + $0x54] sm:$0x2]  ;;  %v3273_v15 = vld [vmem:[#allocation2 + $0x60] sm:$0x2] }
 0x2b5   : > { %4537 = vrot.lane.b32.xlu0 %v4493_v21, %s7737_s20  ;;  %v3274_v34 = vld [vmem:[#allocation2 + $0x6c] sm:$0x2]  ;;  %v3358_v52 = vld [vmem:[#allocation2 + $0x3c] sm:$0x1]  ;;  %v3487_v53 = vld [vmem:[#allocation2 + $0x44] sm:$0x1] }
 0x2b6   : > { %v3493_v1 = vld [vmem:[#allocation2 + $0x5c] sm:$0x1]  ;;  %v3275_v54 = vld [vmem:[#allocation2 + $0x78] sm:$0x2]  ;;  %v3364_v50 = vld [vmem:[#allocation2 + $0x54] sm:$0x1]  ;;  %v3488_v33 = vsel %vm9034_vm14, %v6737_v29, %v3487_v53 }
 0x2b7   : > { %v6721_v3 = vrot.slane %v3270_v32, 9  ;;  %v3494_v11 = vsel %vm9034_vm14, %v6739_v24, %v3493_v1  ;;  %v3276_v14 = vld [vmem:[#allocation2 + $0x84] sm:$0x2]  ;;  %3489 = vst [vmem:[#allocation2 + $0x44] sm:$0x1] %v3488_v33  ;;  %v6723_v41 = vrot.slane %v3272_v30, 9 }
 0x2b8   : > { %3495 = vst [vmem:[#allocation2 + $0x5c] sm:$0x1] %v3494_v11  ;;  %v9615_v55 = vld [vmem:[#allocation2 + $0x90] sm:$0x2]  ;;  %v3367_v48 = vld [vmem:[#allocation2 + $0x60] sm:$0x1] }
 0x2b9   : > { %v9617_v63 = vld [vmem:[#allocation2 + $0x64] sm:$0x8]  ;;  %v9619_v61 = vld [vmem:[#allocation2 + $0x70] sm:$0x8]  ;;  %v3359_v56 = vsel %vm8921_vm12, %v6721_v3, %v3358_v52  ;;  %v6724_v40 = vrot.slane %v3273_v15, 9  ;;  %v3365_v10 = vsel %vm8921_vm12, %v6723_v41, %v3364_v50  ;;  %v6725_v31 = vrot.slane %v3274_v34, 9 }
 0x2ba   : > { %v9606_v35 = vld [vmem:[#allocation2 + $0x50] ss:$0 sps:$4 sm:$0x11]   ;;  %v3278_v42 = vld [vmem:[#allocation2 + $0x9c] sm:$0x2]  ;;  %v6726_v46 = vrot.slane %v3275_v54, 9 }
 0x2bb   : > { %v9612_v28 = vld [vmem:[#allocation2 + $0x48] sm:$0xff]   ;;  %v4329_v17 = vshll.u32 %v9606_v35, 16  ;;  %v9624_v6 = vld [vmem:[#allocation2 + $0x7c] sm:$0x8]  ;;  %3360 = vst [vmem:[#allocation2 + $0x3c] sm:$0x1] %v3359_v56  ;;  %v3368_v5 = vsel %vm8921_vm12, %v6724_v40, %v3367_v48 }
 0x2bc   : > { %v4324_v38 = vshll.u32 %v9612_v28, 16  ;;  %v3279_v9 = vld [vmem:[#allocation2 + $0xa8] sm:$0x2]  ;;  %v9628_v39 = vld [vmem:[#allocation2 + $0xc0] sm:$0x2]  ;;  %v4322_v60 = vshrl.u32 %v9612_v28, 16 }
 0x2bd   : > { %v9630_v45 = vld [vmem:[#allocation2 + $0x88] sm:$0x8]  ;;  %v9632_v62 = vld [vmem:[#allocation2 + $0x94] sm:$0x8]  ;;  %v9634_v44 = vld [vmem:[#allocation2 + $0xa0] sm:$0x8] }
 0x2be   : > { %3366 = vst [vmem:[#allocation2 + $0x54] sm:$0x1] %v3365_v10  ;;  %v4326_v2 = vrot.slane %v4324_v38, 1  ;;  %v4331_v4 = vrot.slane %v4329_v17, 1  ;;  %v3370_v57 = vld [vmem:[#allocation2 + $0x6c] sm:$0x1] }
 0x2bf   : > { %v3373_v43 = vld [vmem:[#allocation2 + $0x78] sm:$0x1]  ;;  %v3376_v47 = vld [vmem:[#allocation2 + $0x84] sm:$0x1]  ;;  %v9639_v12 = vld [vmem:[#allocation2 + $0xac] sm:$0x8]  ;;  %v3371_v25 = vsel %vm8921_vm12, %v6725_v31, %v3370_v57 }
 0x2c0   : > { %v9641_v51 = vld [vmem:[#allocation2 + $0xc4] sm:$0x8]  ;;  %3369 = vst [vmem:[#allocation2 + $0x60] sm:$0x1] %v3368_v5  ;;  %v6727_v49 = vrot.slane %v3276_v14, 9  ;;  %v6728_v27 = vrot.slane %v9615_v55, 9  ;;  %v4327_v19 = vor.u32 %v4326_v2, %v4322_v60  ;;  %v3374_v59 = vsel %vm8921_vm12, %v6726_v46, %v3373_v43 }
 0x2c1   : > { %v6729_v7 = vrot.slane %v3278_v42, 9  ;;  %v6730_v26 = vrot.slane %v3279_v9, 9  ;;  %v3379_v18 = vld [vmem:[#allocation2 + $0x90] sm:$0x1]  ;;  %v6732_v37 = vrot.slane %v9628_v39, 9  ;;  %v6740_v22 = vrot.slane %v9617_v63, 11 }
 0x2c2   : > { %v6741_v23 = vrot.slane %v9619_v61, 11  ;;  %v3382_v13 = vld [vmem:[#allocation2 + $0x9c] sm:$0x1]  ;;  %v3385_v36 = vld [vmem:[#allocation2 + $0xa8] sm:$0x1]  ;;  %v6742_v0 = vrot.slane %v9624_v6, 11  ;;  %v3377_v8 = vsel %vm8921_vm12, %v6727_v49, %v3376_v47  ;;  %v4332_v21 = vsel %vm348_vm2, %v4327_v19, %v4331_v4 }
 0x2c3   : > { %v9647_v20 = vld [vmem:[#allocation2 + $0x44] ss:$0 sps:$4 sm:$0x11]   ;;  %v3391_v29 = vld [vmem:[#allocation2 + $0xc0] sm:$0x1]  ;;  %v6743_v24 = vrot.slane %v9630_v45, 11  ;;  %4463 = vrot.lane.b32.xlu1 %v4332_v21, %s7738_s21  ;;  %v3380_v3 = vsel %vm8921_vm12, %v6728_v27, %v3379_v18  ;;  %v3383_v55 = vsel %vm8921_vm12, %v6729_v7, %v3382_v13  ;;  %v3386_v48 = vsel %vm8921_vm12, %v6730_v26, %v3385_v36 }
 0x2c4   : > { %v6744_v32 = vrot.slane %v9632_v62, 11  ;;  %v6745_v30 = vrot.slane %v9634_v44, 11  ;;  %3372 = vst [vmem:[#allocation2 + $0x6c] sm:$0x1] %v3371_v25  ;;  %3375 = vst [vmem:[#allocation2 + $0x78] sm:$0x1] %v3374_v59  ;;  %v3392_v40 = vsel %vm8921_vm12, %v6732_v37, %v3391_v29 }
 0x2c5   : > { %3378 = vst [vmem:[#allocation2 + $0x84] sm:$0x1] %v3377_v8  ;;  %v3496_v15 = vld [vmem:[#allocation2 + $0x68] sm:$0x1]  ;;  %v3499_v34 = vld [vmem:[#allocation2 + $0x74] sm:$0x1] }
 0x2c6   : > { %v3502_v52 = vld [vmem:[#allocation2 + $0x80] sm:$0x1]  ;;  %v4317_v1 = vshll.u32 %v9647_v20, 16  ;;  %v6746_v54 = vrot.slane %v9639_v12, 11  ;;  %v6748_v50 = vrot.slane %v9641_v51, 11  ;;  %v4500_v41 = vrot.slane %v9612_v28, 1 }
 0x2c7   : > { %v7583_v53 = vld [vmem:[#allocation2 + $0x3c] sm:$0xff]   ;;  %v3505_v33 = vld [vmem:[#allocation2 + $0x8c] sm:$0x1]  ;;  %v3508_v11 = vld [vmem:[#allocation2 + $0x98] sm:$0x1]  ;;  %v4501_v17 = vrot.slane %v9606_v35, 1  ;;  %v3497_v42 = vsel %vm9034_vm14, %v6740_v22, %v3496_v15  ;;  %v3500_v9 = vsel %vm9034_vm14, %v6741_v23, %v3499_v34  ;;  %v3503_v6 = vsel %vm9034_vm14, %v6742_v0, %v3502_v52 }
 0x2c8   : > { %v3511_v14 = vld [vmem:[#allocation2 + $0xa4] sm:$0x1]  ;;  %3381 = vst [vmem:[#allocation2 + $0x90] sm:$0x1] %v3380_v3  ;;  %v3514_v63 = vld [vmem:[#allocation2 + $0xb0] sm:$0x1]  ;;  %v3506_v39 = vsel %vm9034_vm14, %v6743_v24, %v3505_v33  ;;  %v3509_v45 = vsel %vm9034_vm14, %v6744_v32, %v3508_v11 }
 0x2c9   : > { %v4310_v61 = vshrl.u32 %v7583_v53, 16  ;;  %v4312_v56 = vshll.u32 %v7583_v53, 16  ;;  %3384 = vst [vmem:[#allocation2 + $0x9c] sm:$0x1] %v3383_v55  ;;  %3387 = vst [vmem:[#allocation2 + $0xa8] sm:$0x1] %v3386_v48  ;;  %v4502_v35 = vsel %vm573_vm0, %v4500_v41, %v4501_v17  ;;  %v3512_v62 = vsel %vm9034_vm14, %v6745_v30, %v3511_v14 }
 0x2ca   : > { %v9674_v38 = vld [vmem:[#allocation2 + $0x60] sm:$0xff]   ;;  %v3520_v28 = vld [vmem:[#allocation2 + $0xc8] sm:$0x1]  ;;  %3393 = vst [vmem:[#allocation2 + $0xc0] sm:$0x1] %v3392_v40  ;;  %v7587_v10 = vld [vmem:[#allocation2 + $0x54] sm:$0xff]   ;;  %4543 = vrot.lane.b32.xlu1 %v4502_v35, %s7737_s20  ;;  %v3515_v31 = vsel %vm9034_vm14, %v6746_v54, %v3514_v63 }
 0x2cb   : > { %v4314_v16 = vrot.slane %v4312_v56, 1  ;;  %3498 = vst [vmem:[#allocation2 + $0x68] sm:$0x1] %v3497_v42  ;;  %3501 = vst [vmem:[#allocation2 + $0x74] sm:$0x1] %v3500_v9  ;;  %v4319_v44 = vrot.slane %v4317_v1, 1  ;;  %v3521_v5 = vsel %vm9034_vm14, %v6748_v50, %v3520_v28 }
 0x2cc   : > { %3504 = vst [vmem:[#allocation2 + $0x80] sm:$0x1] %v3503_v6  ;;  %3507 = vst [vmem:[#allocation2 + $0x8c] sm:$0x1] %v3506_v39  ;;  %v4348_v2 = vshll.u32 %v9674_v38, 16  ;;  %v4336_v57 = vshll.u32 %v7587_v10, 16 }
 0x2cd   : > { %3510 = vst [vmem:[#allocation2 + $0x98] sm:$0x1] %v3509_v45  ;;  %3513 = vst [vmem:[#allocation2 + $0xa4] sm:$0x1] %v3512_v62  ;;  %v4315_v60 = vor.u32 %v4314_v16, %v4310_v61  ;;  %v4497_v47 = vrot.slane %v7583_v53, 1  ;;  %v4498_v12 = vrot.slane %v9647_v20, 1 }
 0x2ce   : > { %3516 = vst [vmem:[#allocation2 + $0xb0] sm:$0x1] %v3515_v31  ;;  %3522 = vst [vmem:[#allocation2 + $0xc8] sm:$0x1] %v3521_v5  ;;  %v9697_v51 = vld [vmem:[#allocation2 + $0x6c] sm:$0xff]   ;;  %v4350_v58 = vrot.slane %v4348_v2, 1 }
 0x2cf   : > { %v7588_v4 = vld [vmem:[#allocation2 + $0x5c] ss:$0 sps:$4 sm:$0x11]   ;;  %v4320_v43 = vsel %vm348_vm2, %v4315_v60, %v4319_v44  ;;  %v4338_v46 = vrot.slane %v4336_v57, 1  ;;  %v4334_v27 = vshrl.u32 %v7587_v10, 16  ;;  %v4346_v19 = vshrl.u32 %v9674_v38, 16 }
 0x2d0   : > { %4461 = vrot.lane.b32.xlu0 %v4320_v43, %s7738_s21  ;;  %v9700_v49 = vld [vmem:[#allocation2 + $0x78] sm:$0xff]   ;;  %v4341_v7 = vshll.u32 %v7588_v4, 16  ;;  %v4499_v18 = vsel %vm573_vm0, %v4497_v47, %v4498_v12  ;;  %v4360_v22 = vshll.u32 %v9697_v51, 16  ;;  %v4503_v21 = vrot.slane %v7587_v10, 1  ;;  %v9708_v32 = vld [vmem:[#allocation2 + $0x84] sm:$0xff]   ;;  %v9713_v53 = vld [vmem:[#allocation2 + $0x90] sm:$0xff]  }
 0x2d1   : > { %v4339_v37 = vor.u32 %v4338_v46, %v4334_v27  ;;  %v4351_v23 = vor.u32 %v4350_v58, %v4346_v19  ;;  %v4372_v36 = vshll.u32 %v9700_v49, 16  ;;  %v4504_v29 = vrot.slane %v7588_v4, 1  ;;  %v9727_v9 = vld [vmem:[#allocation2 + $0x9c] sm:$0xff]   ;;  %v9731_v45 = vld [vmem:[#allocation2 + $0xa8] sm:$0xff]   ;;  %v9742_v58 = vld [vmem:[#allocation2 + $0xb4] sm:$0xff]  }
 0x2d2   : > { %v7586_v26 = vld [vmem:[#allocation2 + $0x68] ss:$0 sps:$4 sm:$0x11]   ;;  %v4343_v20 = vrot.slane %v4341_v7, 1  ;;  %v4362_v24 = vrot.slane %v4360_v22, 1  ;;  %v4506_v15 = vrot.slane %v9674_v38, 1 }
 0x2d3   : > { %v4353_v13 = vshll.u32 %v7586_v26, 16  ;;  %v7592_v0 = vld [vmem:[#allocation2 + $0x74] ss:$0 sps:$4 sm:$0x11]   ;;  %v4507_v34 = vrot.slane %v7586_v26, 1  ;;  %v4374_v52 = vrot.slane %v4372_v36, 1  ;;  %v4505_v33 = vsel %vm573_vm0, %v4503_v21, %v4504_v29 }
 0x2d4   : > { %4541 = vrot.lane.b32.xlu0 %v4499_v18, %s7737_s20  ;;  %v7590_v59 = vld [vmem:[#allocation2 + $0x80] ss:$0 sps:$4 sm:$0x11]   ;;  %v4344_v8 = vsel %vm348_vm2, %v4339_v37, %v4343_v20  ;;  %v4358_v1 = vshrl.u32 %v9697_v51, 16  ;;  %v4365_v54 = vshll.u32 %v7592_v0, 16  ;;  %v4370_v50 = vshrl.u32 %v9700_v49, 16 }
 0x2d5   : > { %v4355_v25 = vrot.slane %v4353_v13, 1  ;;  %v4377_v3 = vshll.u32 %v7590_v59, 16  ;;  %v4384_v14 = vshll.u32 %v9708_v32, 16  ;;  %v4508_v41 = vsel %vm573_vm0, %v4506_v15, %v4507_v34  ;;  %v7594_v55 = vld [vmem:[#allocation2 + $0x98] ss:$0 sps:$4 sm:$0x11]  }
 0x2d6   : > { %v4363_v11 = vor.u32 %v4362_v24, %v4358_v1  ;;  %v4375_v17 = vor.u32 %v4374_v52, %v4370_v50  ;;  %v4396_v48 = vshll.u32 %v9713_v53, 16  ;;  %v4367_v63 = vrot.slane %v4365_v54, 1  ;;  %v7596_v61 = vld [vmem:[#allocation2 + $0x8c] ss:$0 sps:$4 sm:$0x11]   ;;  %v9762_v50 = vld [vmem:[#allocation2] sm:$0xff]  }
 0x2d7   : > { %v4356_v30 = vsel %vm348_vm2, %v4351_v23, %v4355_v25  ;;  %v4379_v56 = vrot.slane %v4377_v3, 1  ;;  %v4512_v40 = vrot.slane %v9700_v49, 1  ;;  %v4509_v28 = vrot.slane %v9697_v51, 1  ;;  %v7600_v51 = vld [vmem:[#allocation2 + $0xa4] ss:$0 sps:$4 sm:$0x11]  }
 0x2d8   : > { %4465 = vrot.lane.b32.xlu0 %v4344_v8, %s7738_s21  ;;  %4467 = vrot.lane.b32.xlu1 %v4356_v30, %s7738_s21  ;;  %v4368_v38 = vsel %vm348_vm2, %v4363_v11, %v4367_v63  ;;  %v4510_v35 = vrot.slane %v7592_v0, 1  ;;  %v4386_v42 = vrot.slane %v4384_v14, 1  ;;  %v4513_v10 = vrot.slane %v7590_v59, 1  ;;  %v7598_v7 = vld [vmem:[#allocation2 + $0xb0] ss:$0 sps:$4 sm:$0x11]  }
 0x2d9   : > { %v4380_v6 = vsel %vm348_vm2, %v4375_v17, %v4379_v56  ;;  %v4398_v16 = vrot.slane %v4396_v48, 1  ;;  %v4401_v39 = vshll.u32 %v7594_v55, 16  ;;  %v4382_v62 = vshrl.u32 %v9708_v32, 16  ;;  %v9749_v23 = vld [vmem:[#allocation2 + $0xc0] sm:$0xff]  }
 0x2da   : > { %v4389_v44 = vshll.u32 %v7596_v61, 16  ;;  %v4394_v31 = vshrl.u32 %v9713_v53, 16  ;;  %v4511_v5 = vsel %vm573_vm0, %v4509_v28, %v4510_v35  ;;  %v4408_v2 = vshll.u32 %v9727_v9, 16  ;;  %v7602_v34 = vld [vmem:[#allocation2 + $0xc8] ss:$0 sps:$4 sm:$0x11]  }
 0x2db   : > { %v4387_v60 = vor.u32 %v4386_v42, %v4382_v62  ;;  %v4514_v4 = vsel %vm573_vm0, %v4512_v40, %v4513_v10  ;;  %v4403_v43 = vrot.slane %v4401_v39, 1  ;;  %v4420_v47 = vshll.u32 %v9731_v45, 16  ;;  %v9779_v39 = vld [vmem:[#allocation2 + $0x18] sm:$0xff]  }
 0x2dc   : > { %4545 = vrot.lane.b32.xlu0 %v4505_v33, %s7737_s20  ;;  %4547 = vrot.lane.b32.xlu1 %v4508_v41, %s7737_s20  ;;  %v4399_v57 = vor.u32 %v4398_v16, %v4394_v31  ;;  %v4391_v12 = vrot.slane %v4389_v44, 1  ;;  %v4518_v46 = vrot.slane %v9713_v53, 1  ;;  %v4519_v49 = vrot.slane %v7594_v55, 1  ;;  %v9767_v41 = vld [vmem:[#allocation2 + $0xc] sm:$0xff]  }
 0x2dd   : > { %v4515_v27 = vrot.slane %v9708_v32, 1  ;;  %v4516_v19 = vrot.slane %v7596_v61, 1  ;;  %v4410_v18 = vrot.slane %v4408_v2, 1  ;;  %v4422_v22 = vrot.slane %v4420_v47, 1 }
 0x2de   : > { %v4392_v26 = vsel %vm348_vm2, %v4387_v60, %v4391_v12  ;;  %v4404_v37 = vsel %vm348_vm2, %v4399_v57, %v4403_v43  ;;  %v4406_v13 = vshrl.u32 %v9727_v9, 16  ;;  %v4413_v36 = vshll.u32 %v7600_v51, 16  ;;  %v7604_v32 = vld [vmem:[#allocation2 + $0xbc] ss:$0 sps:$4 sm:$0x11]  }
 0x2df   : > { %v4418_v20 = vshrl.u32 %v9731_v45, 16  ;;  %v4425_v0 = vshll.u32 %v7598_v7, 16  ;;  %v4517_v25 = vsel %vm573_vm0, %v4515_v27, %v4516_v19  ;;  %v4432_v8 = vshll.u32 %v9742_v58, 16  ;;  %v7608_v16 = vld [vmem:[#allocation2 + $0x14] ss:$0 sps:$4 sm:$0x11]  }
 0x2e0   : > { %4469 = vrot.lane.b32.xlu0 %v4368_v38, %s7738_s21  ;;  %4471 = vrot.lane.b32.xlu1 %v4380_v6, %s7738_s21  ;;  %v4411_v59 = vor.u32 %v4410_v18, %v4406_v13  ;;  %v4520_v21 = vsel %vm573_vm0, %v4518_v46, %v4519_v49  ;;  %v4444_v24 = vshll.u32 %v9749_v23, 16  ;;  %v4415_v30 = vrot.slane %v4413_v36, 1  ;;  %v7610_v19 = vld [vmem:[#allocation2 + $0x20] ss:$0 sps:$4 sm:$0x11]  }
 0x2e1   : > { %v4423_v29 = vor.u32 %v4422_v22, %v4418_v20  ;;  %v4427_v15 = vrot.slane %v4425_v0, 1  ;;  %v4521_v53 = vrot.slane %v9727_v9, 1  ;;  %v4522_v1 = vrot.slane %v7600_v51, 1  ;;  %v7606_v9 = vld [vmem:[#allocation2 + $0x8] ss:$0 sps:$4 sm:$0x11]  }
 0x2e2   : > { %v4416_v52 = vsel %vm348_vm2, %v4411_v59, %v4415_v30  ;;  %v4434_v54 = vrot.slane %v4432_v8, 1  ;;  %v4524_v33 = vrot.slane %v9731_v45, 1  ;;  %v4525_v11 = vrot.slane %v7598_v7, 1  ;;  %v9800_v20 = vld [vmem:[#allocation2 + $0x30] sm:$0xff]  }
 0x2e3   : > { %v4428_v3 = vsel %vm348_vm2, %v4423_v29, %v4427_v15  ;;  %v4446_v14 = vrot.slane %v4444_v24, 1  ;;  %v4430_v17 = vshrl.u32 %v9742_v58, 16  ;;  %v4437_v55 = vshll.u32 %v7604_v32, 16 }
 0x2e4   : > { %4549 = vrot.lane.b32.xlu0 %v4511_v5, %s7737_s20  ;;  %4551 = vrot.lane.b32.xlu1 %v4514_v4, %s7737_s20  ;;  %v4442_v48 = vshrl.u32 %v9749_v23, 16  ;;  %v4449_v63 = vshll.u32 %v7602_v34, 16  ;;  %v4523_v61 = vsel %vm573_vm0, %v4521_v53, %v4522_v1  ;;  %v3718_v40 = vshll.u32 %v9762_v50, 16  ;;  %v9785_v4 = vld [vmem:[#allocation2 + $0x24] sm:$0xff]  }
 0x2e5   : > { %v4435_v56 = vor.u32 %v4434_v54, %v4430_v17  ;;  %v4526_v38 = vsel %vm573_vm0, %v4524_v33, %v4525_v11  ;;  %v3730_v35 = vshll.u32 %v9767_v41, 16  ;;  %v4439_v42 = vrot.slane %v4437_v55, 1  ;;  %v9819_v33 = vld [vmem:[#allocation2 + $0x38] ss:$0 sps:$4 sm:$0x11]  }
 0x2e6   : > { %v4447_v28 = vor.u32 %v4446_v14, %v4442_v48  ;;  %v4451_v6 = vrot.slane %v4449_v63, 1  ;;  %v4527_v10 = vrot.slane %v9742_v58, 1  ;;  %v4528_v62 = vrot.slane %v7604_v32, 1  ;;  %v7633_v32 = vld [vmem:[%s11156_s2 + $0x8] sm:$0x3f]  }
 0x2e7   : > { %v4440_v45 = vsel %vm348_vm2, %v4435_v56, %v4439_v42  ;;  %v3720_v44 = vrot.slane %v3718_v40, 1  ;;  %v4530_v5 = vrot.slane %v9749_v23, 1  ;;  %v4531_v60 = vrot.slane %v7602_v34, 1  ;;  %v4456_v34 = vpop.permute.xlu1 %4455  ;;  %7460 = vmatprep.subr.msk.bf16.mxu1 %vm1308_vm1, %v7633_v32  ;;  %v9824_v17 = vld [vmem:[#allocation2 + $0x44] ss:$0 sps:$4 sm:$0x11]  }
 0x2e8   : > { %4473 = vrot.lane.b32.xlu0 %v4392_v26, %s7738_s21  ;;  %4475 = vrot.lane.b32.xlu1 %v4404_v37, %s7738_s21  ;;  %v4452_v31 = vsel %vm348_vm2, %v4447_v28, %v4451_v6  ;;  %v3732_v2 = vrot.slane %v3730_v35, 1  ;;  %v3716_v57 = vshrl.u32 %v9762_v50, 16  ;;  %v3723_v43 = vshll.u32 %v7606_v9, 16  ;;  %v9796_v37 = vld [vmem:[#allocation2 + $0x2c] ss:$0 sps:$4 sm:$0x11]  }
 0x2e9   : > { %v3728_v47 = vshrl.u32 %v9767_v41, 16  ;;  %v3735_v12 = vshll.u32 %v7608_v16, 16  ;;  %v4529_v51 = vsel %vm573_vm0, %v4527_v10, %v4528_v62  ;;  %v3742_v46 = vshll.u32 %v9779_v39, 16  ;;  %v9827_v56 = vld [vmem:[#allocation2 + $0x48] sm:$0xff]   ;;  %v9833_v42 = vld [vmem:[#allocation2 + $0x54] sm:$0xff]  }
 0x2ea   : > { %v3721_v58 = vor.u32 %v3720_v44, %v3716_v57  ;;  %v4532_v49 = vsel %vm573_vm0, %v4530_v5, %v4531_v60  ;;  %v3754_v7 = vshll.u32 %v9785_v4, 16  ;;  %v3725_v26 = vrot.slane %v3723_v43, 1  ;;  %v7634_v6 = vld [vmem:[%s11156_s2] sm:$0x3f]   ;;  %v7705_v43 = vld [vmem:[#allocation2 + $0xc] sm:$0xff]  }
 0x2eb   : > { %v3733_v27 = vor.u32 %v3732_v2, %v3728_v47  ;;  %v3737_v18 = vrot.slane %v3735_v12, 1  ;;  %v3939_v23 = vrot.slane %v9762_v50, 1  ;;  %v3940_v13 = vrot.slane %v7606_v9, 1  ;;  %v4536_v9 = vpop.permute.xlu1 %4535 }
 0x2ec   : > { %4553 = vrot.lane.b32.xlu0 %v4517_v25, %s7737_s20  ;;  %4555 = vrot.lane.b32.xlu1 %v4520_v21, %s7737_s20  ;;  %v3726_v22 = vsel %vm348_vm2, %v3721_v58, %v3725_v26  ;;  %v3744_v36 = vrot.slane %v3742_v46, 1  ;;  %v3942_v25 = vrot.slane %v9767_v41, 1  ;;  %v3943_v59 = vrot.slane %v7608_v16, 1  ;;  %v9805_v21 = vld [vmem:[#allocation2 + $0x3c] sm:$0xff]  }
 0x2ed   : > { %v3738_v0 = vsel %vm348_vm2, %v3733_v27, %v3737_v18  ;;  %v3756_v8 = vrot.slane %v3754_v7, 1  ;;  %v3740_v29 = vshrl.u32 %v9779_v39, 16  ;;  %v3747_v24 = vshll.u32 %v7610_v19, 16  ;;  %v7620_v7 = vld [vmem:[#allocation2 + $0x5c] ss:$0 sps:$4 sm:$0x11]  }
 0x2ee   : > { %v3752_v30 = vshrl.u32 %v9785_v4, 16  ;;  %v3759_v15 = vshll.u32 %v9796_v37, 16  ;;  %v3766_v1 = vshll.u32 %v9800_v20, 16  ;;  %v3944_v50 = vsel %vm573_vm0, %v3942_v25, %v3943_v59 }
 0x2ef   : > { %v3745_v53 = vor.u32 %v3744_v36, %v3740_v29  ;;  %v3778_v11 = vshll.u32 %v9805_v21, 16  ;;  %v3749_v14 = vrot.slane %v3747_v24, 1  ;;  %v3945_v41 = vrot.slane %v9779_v39, 1 }
 0x2f0   : > { %4477 = vrot.lane.b32.xlu0 %v4416_v52, %s7738_s21  ;;  %4479 = vrot.lane.b32.xlu1 %v4428_v3, %s7738_s21  ;;  %v3941_v52 = vsel %vm573_vm0, %v3939_v23, %v3940_v13  ;;  %v3757_v3 = vor.u32 %v3756_v8, %v3752_v30  ;;  %v3761_v55 = vrot.slane %v3759_v15, 1  ;;  %v3946_v48 = vrot.slane %v7610_v19, 1  ;;  %v9863_v13 = vld [vmem:[#allocation2 + $0x60] sm:$0xff]   ;;  %v9869_v8 = vld [vmem:[#allocation2 + $0x6c] sm:$0xff]  }
 0x2f1   : > { %v3750_v63 = vsel %vm348_vm2, %v3745_v53, %v3749_v14  ;;  %v3949_v28 = vrot.slane %v9796_v37, 1  ;;  %v3780_v35 = vrot.slane %v3778_v11, 1  ;;  %v3764_v10 = vshrl.u32 %v9800_v20, 16  ;;  %v7622_v53 = vld [vmem:[#allocation2 + $0x68] ss:$0 sps:$4 sm:$0x11]  }
 0x2f2   : > { %v4454_v54 = vpop.permute.xlu0 %4453  ;;  %v3762_v40 = vsel %vm348_vm2, %v3757_v3, %v3761_v55  ;;  %v3771_v16 = vshll.u32 %v9819_v33, 16  ;;  %v3776_v39 = vshrl.u32 %v9805_v21, 16  ;;  %v3947_v62 = vsel %vm573_vm0, %v3945_v41, %v3946_v48 }
 0x2f3   : > { %v3783_v44 = vshll.u32 %v9824_v17, 16  ;;  %v4670_v60 = vsel %vm1308_vm1, %v7633_v32, 0  ;;  %v3790_v57 = vshll.u32 %v9827_v56, 16  ;;  %v4566_v47 = vsel %vm654_vm3, %v7705_v43, %v4454_v54  ;;  %v9903_v43 = vld [vmem:[#allocation2 + $0x90] sm:$0xff]  }
 0x2f4   : > { %4557 = vrot.lane.b32.xlu0 %v4523_v61, %s7737_s20  ;;  %4559 = vrot.lane.b32.xlu1 %v4526_v38, %s7737_s20  ;;  %v3768_v61 = vrot.slane %v3766_v1, 1  ;;  %v3948_v38 = vrot.slane %v9785_v4, 1  ;;  %v9846_v4 = vld [vmem:[#allocation2 + $0x50] ss:$0 sps:$4 sm:$0x11]   ;;  %v3781_v58 = vor.u32 %v3780_v35, %v3776_v39  ;;  %v3802_v46 = vshll.u32 %v9833_v42, 16 }
 0x2f5   : > { %7228 = vmatpush3.bf16.msra.mxu1 %v4670_v60  ;;  %v3773_v27 = vrot.slane %v3771_v16, 1  ;;  %v3785_v26 = vrot.slane %v3783_v44, 1  ;;  %v4871_v19 = vsel %vm1308_vm1, %v7634_v6, 0  ;;  %v3951_v37 = vrot.slane %v9800_v20, 1 }
 0x2f6   : > { %v3769_v2 = vor.u32 %v3768_v61, %v3764_v10  ;;  %7461 = vmatprep.subr.msk.bf16.mxu1 %vm1308_vm1, %v7634_v6  ;;  %v3792_v23 = vrot.slane %v3790_v57, 1  ;;  %v3955_v25 = vrot.slane %v9824_v17, 1  ;;  %v3804_v59 = vrot.slane %v3802_v46, 1  ;;  %v9884_v17 = vld [vmem:[#allocation2 + $0x78] sm:$0xff]  }
 0x2f7   : > { %v3786_v36 = vsel %vm348_vm2, %v3781_v58, %v3785_v26  ;;  %v3788_v20 = vshrl.u32 %v9827_v56, 16  ;;  %v3795_v29 = vshll.u32 %v9846_v4, 16  ;;  %v3800_v24 = vshrl.u32 %v9833_v42, 16  ;;  %v7626_v39 = vld [vmem:[#allocation2 + $0x80] ss:$0 sps:$4 sm:$0x11]  }
 0x2f8   : > { %4481 = vrot.lane.b32.xlu0 %v4440_v45, %s7738_s21  ;;  %4483 = vrot.lane.b32.xlu1 %v4452_v31, %s7738_s21  ;;  %v4534_v45 = vpop.permute.xlu0 %4533  ;;  %v7704_v31 = vld [vmem:[#allocation2 + $0x18] sm:$0xff]   ;;  %v3774_v18 = vsel %vm348_vm2, %v3769_v2, %v3773_v27  ;;  %v3807_v32 = vshll.u32 %v7620_v7, 16  ;;  %v3826_v1 = vshll.u32 %v9869_v8, 16  ;;  %v3957_v11 = vrot.slane %v9827_v56, 1 }
 0x2f9   : > { %v4568_v5 = vsel %vm654_vm3, %v7704_v31, %v4456_v34  ;;  %v3793_v15 = vor.u32 %v3792_v23, %v3788_v20  ;;  %v3814_v34 = vshll.u32 %v9863_v13, 16  ;;  %v3797_v54 = vrot.slane %v3795_v29, 1  ;;  %v7628_v44 = vld [vmem:[#allocation2 + $0x8c] ss:$0 sps:$4 sm:$0x11]  }
 0x2fa   : > { %v4600_v12 = vsel %vm687_vm4, %v4568_v5, %v4536_v9  ;;  %v3809_v3 = vrot.slane %v3807_v32, 1  ;;  %v3958_v14 = vrot.slane %v9846_v4, 1  ;;  %v3960_v48 = vrot.slane %v9833_v42, 1 }
 0x2fb   : > { %v3816_v41 = vrot.slane %v3814_v34, 1  ;;  %v3828_v61 = vrot.slane %v3826_v1, 1  ;;  %v3819_v56 = vshll.u32 %v7622_v53, 16  ;;  %v3838_v10 = vshll.u32 %v9884_v17, 16  ;;  %v9929_v1 = vld [vmem:[#allocation2 + $0xb4] sm:$0xff]  }
 0x2fc   : > { %4561 = vrot.lane.b32.xlu0 %v4529_v51, %s7737_s20  ;;  %4563 = vrot.lane.b32.xlu1 %v4532_v49, %s7737_s20  ;;  %v3950_v51 = vsel %vm573_vm0, %v3948_v38, %v3949_v28  ;;  %v4598_v49 = vsel %vm687_vm4, %v4566_v47, %v4534_v45  ;;  %v3812_v38 = vshrl.u32 %v9863_v13, 16  ;;  %v3824_v28 = vshrl.u32 %v9869_v8, 16  ;;  %v9905_v47 = vld [vmem:[#allocation2 + $0x9c] sm:$0xff]  }
 0x2fd   : > { %7229 = vmatprep.mubr.msk.bf16.mxu1 %vm1275_vm5, %v4598_v49  ;;  %v3959_v9 = vsel %vm573_vm0, %v3957_v11, %v3958_v14  ;;  %v3963_v5 = vrot.slane %v9863_v13, 1  ;;  %v3964_v2 = vrot.slane %v7622_v53, 1  ;;  %v3966_v4 = vrot.slane %v9869_v8, 1  ;;  %v9916_v13 = vld [vmem:[#allocation2 + $0x98] ss:$0 sps:$4 sm:$0x11]  }
 0x2fe   : > { %7230 = vmatmul.mubr.msk.bf16.vlgmr.msra.gmra.mrb[0].mxu1 %vm1275_vm5, %v4600_v12  ;;  %v3817_v6 = vor.u32 %v3816_v41, %v3812_v38  ;;  %v3829_v16 = vor.u32 %v3828_v61, %v3824_v28  ;;  %v3840_v57 = vrot.slane %v3838_v10, 1  ;;  %v3836_v46 = vshrl.u32 %v9884_v17, 16  ;;  %v7706_v41 = vld [vmem:[#allocation2 + $0x30] sm:$0xff]   ;;  %v7707_v61 = vld [vmem:[#allocation2 + $0x24] sm:$0xff]  }
 0x2ff   : > { %7262 = vmatpush3.bf16.msra.mxu1 %v4871_v19  ;;  %v3843_v49 = vshll.u32 %v7626_v39, 16  ;;  %v3965_v19 = vsel %vm573_vm0, %v3963_v5, %v3964_v2  ;;  %v3969_v20 = vrot.slane %v9884_v17, 1  ;;  %v3970_v29 = vrot.slane %v7626_v39, 1  ;;  %v9956_v2 = vld [vmem:[#allocation2 + $0x18] sm:$0xff]  }
 0x300   : > { %3907 = vrot.lane.b32.xlu0 %v3726_v22, %s7738_s21  ;;  %3909 = vrot.lane.b32.xlu1 %v3738_v0, %s7738_s21  ;;  %v3952_v22 = vrot.slane %v9819_v33, 1  ;;  %v3954_v0 = vrot.slane %v9805_v21, 1  ;;  %v3798_v33 = vsel %vm348_vm2, %v3793_v15, %v3797_v54  ;;  %v3872_v11 = vshrl.u32 %v9905_v47, 16 }
 0x301   : > { %v3976_v5 = vrot.slane %v9916_v13, 1 }
 0x302   : > { %v3953_v30 = vsel %vm573_vm0, %v3951_v37, %v3952_v22  ;;  %v3956_v21 = vsel %vm573_vm0, %v3954_v0, %v3955_v25  ;;  %v3862_v37 = vshll.u32 %v9903_v43, 16  ;;  %v3845_v0 = vrot.slane %v3843_v49, 1  ;;  %v9920_v25 = vld [vmem:[#allocation2 + $0xa4] ss:$0 sps:$4 sm:$0x11]  }
 0x303   : > { %v3879_v14 = vshll.u32 %v9920_v25, 16 }
 0x304   : > { %3987 = vrot.lane.b32.xlu0 %v3941_v52, %s7737_s20  ;;  %3989 = vrot.lane.b32.xlu1 %v3944_v50, %s7737_s20  ;;  %v3805_v52 = vor.u32 %v3804_v59, %v3800_v24  ;;  %v7624_v50 = vld [vmem:[#allocation2 + $0x74] ss:$0 sps:$4 sm:$0x11]   ;;  %v3864_v32 = vrot.slane %v3862_v37, 1  ;;  %v5213_v37 = vshll.u32 %v9956_v2, 16 }
 0x305   : > { %v3831_v35 = vshll.u32 %v7624_v50, 16  ;;  %v3881_v39 = vrot.slane %v3879_v14, 1 }
 0x306   : > { %v3810_v55 = vsel %vm348_vm2, %v3805_v52, %v3809_v3  ;;  %v3973_v52 = vrot.slane %v7628_v44, 1  ;;  %v3867_v3 = vshll.u32 %v9916_v13, 16 }
 0x307   : > { %v3833_v31 = vrot.slane %v3831_v35, 1 }
 0x308   : > { %3911 = vrot.lane.b32.xlu0 %v3750_v63, %s7738_s21  ;;  %3913 = vrot.lane.b32.xlu1 %v3762_v40, %s7738_s21  ;;  %v3961_v63 = vrot.slane %v7620_v7, 1  ;;  %v9889_v40 = vld [vmem:[#allocation2 + $0x84] sm:$0xff]   ;;  %v3855_v7 = vshll.u32 %v7628_v44, 16 }
 0x309   : > { %v3850_v45 = vshll.u32 %v9889_v40, 16  ;;  %v3834_v12 = vsel %vm348_vm2, %v3829_v16, %v3833_v31  ;;  %v3848_v27 = vshrl.u32 %v9889_v40, 16  ;;  %v7636_v16 = vld [vmem:[#allocation2 + $0xb0] ss:$0 sps:$4 sm:$0x11]   ;;  %v3975_v31 = vrot.slane %v9903_v43, 1 }
 0x30a   : > { %v3962_v42 = vsel %vm573_vm0, %v3960_v48, %v3961_v63  ;;  %v3857_v59 = vrot.slane %v3855_v7, 1  ;;  %v3896_v7 = vshrl.u32 %v9929_v1, 16 }
 0x30b   : > { %v3852_v58 = vrot.slane %v3850_v45, 1  ;;  %v7638_v45 = vld [vmem:[#allocation2 + $0xbc] ss:$0 sps:$4 sm:$0x11]  }
 0x30c   : > { %3991 = vrot.lane.b32.xlu0 %v3947_v62, %s7737_s20  ;;  %3993 = vrot.lane.b32.xlu1 %v3950_v51, %s7737_s20  ;;  %v3821_v62 = vrot.slane %v3819_v56, 1  ;;  %v3967_v51 = vrot.slane %v7624_v50, 1  ;;  %v3860_v50 = vshrl.u32 %v9903_v43, 16 }
 0x30d   : > { %v3853_v23 = vor.u32 %v3852_v58, %v3848_v27  ;;  %v3891_v27 = vshll.u32 %v7636_v16, 16 }
 0x30e   : > { %v3822_v60 = vsel %vm348_vm2, %v3817_v6, %v3821_v62  ;;  %v3968_v22 = vsel %vm573_vm0, %v3966_v4, %v3967_v51  ;;  %v3865_v48 = vor.u32 %v3864_v32, %v3860_v50  ;;  %v3898_v6 = vshll.u32 %v9929_v1, 16  ;;  %v9951_v62 = vld [vmem:[%s11156_s2 + $0x10] sm:$0x3f]   ;;  %v3534_v4 = vld [vmem:[#allocation2 + $0xbc] sm:$0x1] }
 0x30f   : > { %v3858_v34 = vsel %vm348_vm2, %v3853_v23, %v3857_v59  ;;  %v3979_v51 = vrot.slane %v9920_v25, 1  ;;  %7462 = vmatprep.subr.msk.bf16.mxu1 %vm1308_vm1, %v9951_v62  ;;  %3538 = vst.msk [vmem:[#allocation2 + $0xd4] sm:$0x1] %vm3156_vm8, %v3534_v4  ;;  %v7642_v59 = vld [vmem:[#allocation2 + $0x2c] ss:$0 sps:$4 sm:$0x11]  }
 0x310   : > { %3915 = vrot.lane.b32.xlu0 %v3774_v18, %s7738_s21  ;;  %3917 = vrot.lane.b32.xlu1 %v3786_v36, %s7738_s21  ;;  %v3841_v18 = vor.u32 %v3840_v57, %v3836_v46  ;;  %v3874_v36 = vshll.u32 %v9905_v47, 16  ;;  %v3900_v58 = vrot.slane %v3898_v6, 1  ;;  %v9962_v46 = vld [vmem:[#allocation2 + $0x24] sm:$0xff]   ;;  %v5215_v32 = vrot.slane %v5213_v37, 1 }
 0x311   : > { %v5225_v13 = vshll.u32 %v9962_v46, 16  ;;  %v5211_v50 = vshrl.u32 %v9956_v2, 16 }
 0x312   : > { %v3846_v24 = vsel %vm348_vm2, %v3841_v18, %v3845_v0  ;;  %v3876_v53 = vrot.slane %v3874_v36, 1  ;;  %v3901_v23 = vor.u32 %v3900_v58, %v3896_v7  ;;  %v3893_v36 = vrot.slane %v3891_v27, 1  ;;  %v7640_v0 = vld [vmem:[#allocation2 + $0x20] ss:$0 sps:$4 sm:$0x11]  }
 0x314   : > { %3995 = vrot.lane.b32.xlu0 %v3953_v30, %s7737_s20  ;;  %3997 = vrot.lane.b32.xlu1 %v3956_v21, %s7737_s20  ;;  %v9924_v30 = vld [vmem:[#allocation2 + $0xa8] sm:$0xff]   ;;  %v3972_v21 = vrot.slane %v9889_v40, 1 }
 0x315   : > { %v3886_v63 = vshll.u32 %v9924_v30, 16  ;;  %v3884_v49 = vshrl.u32 %v9924_v30, 16 }
 0x316   : > { %v3974_v35 = vsel %vm573_vm0, %v3972_v21, %v3973_v52  ;;  %v3984_v21 = vrot.slane %v9929_v1, 1  ;;  %v3985_v52 = vrot.slane %v7638_v45, 1 }
 0x317   : > { %v4460_v26 = vpop.permute.xlu1 %4459 }
 0x318   : > { %3919 = vrot.lane.b32.xlu0 %v3798_v33, %s7738_s21  ;;  %3921 = vrot.lane.b32.xlu1 %v3810_v55, %s7738_s21  ;;  %v3971_v33 = vsel %vm573_vm0, %v3969_v20, %v3970_v29  ;;  %v4572_v55 = vsel %vm654_vm3, %v7706_v41, %v4460_v26  ;;  %v3903_v26 = vshll.u32 %v7638_v45, 16  ;;  %v3981_v29 = vrot.slane %v9924_v30, 1 }
 0x319   : > { %v5216_v41 = vor.u32 %v5215_v32, %v5211_v50  ;;  %v10021_v32 = vld [vmem:[#allocation2 + $0x5c] ss:$0 sps:$4 sm:$0x11]   ;;  %v10025_v50 = vld [vmem:[#allocation2 + $0x60] sm:$0xff]  }
 0x31a   : > { %v3905_v25 = vrot.slane %v3903_v26, 1 }
 0x31c   : > { %3999 = vrot.lane.b32.xlu0 %v3959_v9, %s7737_s20  ;;  %4001 = vrot.lane.b32.xlu1 %v3962_v42, %s7737_s20  ;;  %v3877_v9 = vor.u32 %v3876_v53, %v3872_v11  ;;  %v3869_v42 = vrot.slane %v3867_v3, 1  ;;  %v5227_v53 = vrot.slane %v5225_v13, 1  ;;  %v5218_v3 = vshll.u32 %v7640_v0, 16 }
 0x31d   : > { %v5230_v11 = vshll.u32 %v7642_v59, 16 }
 0x31e   : > { %v3870_v44 = vsel %vm348_vm2, %v3865_v48, %v3869_v42  ;;  %v3882_v57 = vsel %vm348_vm2, %v3877_v9, %v3881_v39  ;;  %v3986_v48 = vsel %vm573_vm0, %v3984_v21, %v3985_v52  ;;  %v9994_v9 = vld [vmem:[#allocation2 + $0x44] ss:$0 sps:$4 sm:$0x11]   ;;  %v5435_v42 = vrot.slane %v7640_v0, 1  ;;  %v9998_v39 = vld [vmem:[#allocation2 + $0x48] sm:$0xff]   ;;  %v7709_v0 = vld [vmem:[#allocation2 + $0x3c] sm:$0xff]  }
 0x31f   : > { %v5254_v58 = vshll.u32 %v9994_v9, 16  ;;  %v5261_v26 = vshll.u32 %v9998_v39, 16 }
 0x320   : > { %3923 = vrot.lane.b32.xlu0 %v3822_v60, %s7738_s21  ;;  %3925 = vrot.lane.b32.xlu1 %v3834_v12, %s7738_s21  ;;  %v3888_v60 = vrot.slane %v3886_v63, 1  ;;  %v3978_v12 = vrot.slane %v9905_v47, 1 }
 0x322   : > { %v4540_v54 = vpop.permute.xlu1 %4539  ;;  %v3889_v18 = vor.u32 %v3888_v60, %v3884_v49  ;;  %v10003_v60 = vld [vmem:[#allocation2 + $0x54] sm:$0xff]  }
 0x323   : > { %v4458_v15 = vpop.permute.xlu0 %4457  ;;  %v4604_v56 = vsel %vm687_vm4, %v4572_v55, %v4540_v54  ;;  %v9983_v54 = vld [vmem:[#allocation2 + $0x3c] sm:$0xff]   ;;  %v5273_v37 = vshll.u32 %v10003_v60, 16 }
 0x324   : > { %4003 = vrot.lane.b32.xlu0 %v3965_v19, %s7737_s20  ;;  %4005 = vrot.lane.b32.xlu1 %v3968_v22, %s7737_s20  ;;  %v4570_v38 = vsel %vm654_vm3, %v7707_v61, %v4458_v15  ;;  %v3977_v19 = vsel %vm573_vm0, %v3975_v31, %v3976_v5  ;;  %v3980_v22 = vsel %vm573_vm0, %v3978_v12, %v3979_v51  ;;  %v9978_v15 = vld [vmem:[#allocation2 + $0x30] sm:$0xff]   ;;  %v5249_v61 = vshll.u32 %v9983_v54, 16 }
 0x325   : > { %v3894_v20 = vsel %vm348_vm2, %v3889_v18, %v3893_v36  ;;  %v5237_v55 = vshll.u32 %v9978_v15, 16  ;;  %v5438_v31 = vrot.slane %v7642_v59, 1  ;;  %v5235_v4 = vshrl.u32 %v9978_v15, 16  ;;  %v10016_v36 = vld [vmem:[#allocation2 + $0x50] ss:$0 sps:$4 sm:$0x11]  }
 0x326   : > { %v5251_v5 = vrot.slane %v5249_v61, 1  ;;  %v5247_v51 = vshrl.u32 %v9983_v54, 16  ;;  %v5271_v61 = vshrl.u32 %v10003_v60, 16 }
 0x327   : > { %v4538_v28 = vpop.permute.xlu0 %4537 }
 0x328   : > { %3927 = vrot.lane.b32.xlu0 %v3846_v24, %s7738_s21  ;;  %3929 = vrot.lane.b32.xlu1 %v3858_v34, %s7738_s21  ;;  %v4602_v10 = vsel %vm687_vm4, %v4570_v38, %v4538_v28  ;;  %v3982_v24 = vrot.slane %v7636_v16, 1  ;;  %v3906_v34 = vsel %vm348_vm2, %v3901_v23, %v3905_v25  ;;  %v5220_v38 = vrot.slane %v5218_v3, 1  ;;  %v7644_v28 = vld [vmem:[#allocation2 + $0x38] ss:$0 sps:$4 sm:$0x11]  }
 0x329   : > { %7233 = vmatprep.mubr.msk.bf16.mxu1 %vm1275_vm5, %v4602_v10  ;;  %v5434_v10 = vrot.slane %v9956_v2, 1  ;;  %v5239_v16 = vrot.slane %v5237_v55, 1  ;;  %v5252_v18 = vor.u32 %v5251_v5, %v5247_v51  ;;  %v5441_v52 = vrot.slane %v7644_v28, 1 }
 0x32a   : > { %7234 = vmatmul.mubr.msk.bf16.gmra.mrb[4].mxu1 %vm1275_vm5, %v4604_v56  ;;  %v3983_v14 = vsel %vm573_vm0, %v3981_v29, %v3982_v24  ;;  %v5221_v6 = vsel %vm348_vm2, %v5216_v41, %v5220_v38  ;;  %v5256_v29 = vrot.slane %v5254_v58, 1  ;;  %v5440_v24 = vrot.slane %v9978_v15, 1  ;;  %v10032_v41 = vld [vmem:[#allocation2 + $0x6c] sm:$0xff]   ;;  %v10052_v58 = vld [vmem:[#allocation2 + $0x74] ss:$0 sps:$4 sm:$0x11]  }
 0x32b   : > { %v5436_v49 = vsel %vm573_vm0, %v5434_v10, %v5435_v42  ;;  %v5240_v7 = vor.u32 %v5239_v16, %v5235_v4  ;;  %v5259_v55 = vshrl.u32 %v9998_v39, 16  ;;  %v5278_v38 = vshll.u32 %v10021_v32, 16 }
 0x32c   : > { %4007 = vrot.lane.b32.xlu0 %v3971_v33, %s7737_s20  ;;  %4009 = vrot.lane.b32.xlu1 %v3974_v35, %s7737_s20  ;;  %v5223_v33 = vshrl.u32 %v9962_v46, 16  ;;  %v5232_v35 = vrot.slane %v5230_v11, 1  ;;  %v5257_v3 = vsel %vm348_vm2, %v5252_v18, %v5256_v29  ;;  %v5444_v11 = vrot.slane %v9994_v9, 1 }
 0x32d   : > { %v5285_v9 = vshll.u32 %v10025_v50, 16  ;;  %v5297_v42 = vshll.u32 %v10032_v41, 16  ;;  %v5449_v51 = vrot.slane %v10003_v60, 1  ;;  %v5295_v29 = vshrl.u32 %v10032_v41, 16 }
 0x32e   : > { %v5228_v63 = vor.u32 %v5227_v53, %v5223_v33  ;;  %v5263_v53 = vrot.slane %v5261_v26, 1  ;;  %v5443_v33 = vrot.slane %v9983_v54, 1 }
 0x32f   : > { %v5287_v18 = vrot.slane %v5285_v9, 1  ;;  %v7713_v9 = vld [vmem:[#allocation2 + $0x78] sm:$0xff]  }
 0x330   : > { %3931 = vrot.lane.b32.xlu0 %v3870_v44, %s7738_s21  ;;  %3933 = vrot.lane.b32.xlu1 %v3882_v57, %s7738_s21  ;;  %v5233_v45 = vsel %vm348_vm2, %v5228_v63, %v5232_v35  ;;  %v5437_v44 = vrot.slane %v9962_v46, 1  ;;  %v5242_v57 = vshll.u32 %v7644_v28, 16  ;;  %v5442_v28 = vsel %vm573_vm0, %v5440_v24, %v5441_v52 }
 0x331   : > { %v5264_v35 = vor.u32 %v5263_v53, %v5259_v55  ;;  %v5302_v24 = vshll.u32 %v10052_v58, 16  ;;  %v10079_v55 = vld [vmem:[#allocation2 + $0x80] ss:$0 sps:$4 sm:$0x11]  }
 0x332   : > { %v5244_v13 = vrot.slane %v5242_v57, 1  ;;  %v5280_v57 = vrot.slane %v5278_v38, 1 }
 0x333   : > { %v5304_v38 = vrot.slane %v5302_v24, 1 }
 0x334   : > { %4011 = vrot.lane.b32.xlu0 %v3977_v19, %s7737_s20  ;;  %4013 = vrot.lane.b32.xlu1 %v3980_v22, %s7737_s20  ;;  %v5439_v19 = vsel %vm573_vm0, %v5437_v44, %v5438_v31  ;;  %v7708_v22 = vld [vmem:[#allocation2 + $0x48] sm:$0xff]   ;;  %v5245_v21 = vsel %vm348_vm2, %v5240_v7, %v5244_v13  ;;  %v7710_v31 = vld [vmem:[#allocation2 + $0x54] sm:$0xff]   ;;  %v5450_v13 = vrot.slane %v10021_v32, 1 }
 0x335   : > { %v4464_v56 = vpop.permute.xlu1 %4463  ;;  %v10047_v44 = vld [vmem:[#allocation2 + $0x68] ss:$0 sps:$4 sm:$0x11]  }
 0x336   : > { %v4576_v23 = vsel %vm654_vm3, %v7708_v22, %v4464_v56  ;;  %v5451_v53 = vsel %vm573_vm0, %v5449_v51, %v5450_v13 }
 0x338   : > { %3935 = vrot.lane.b32.xlu0 %v3894_v20, %s7738_s21  ;;  %3937 = vrot.lane.b32.xlu1 %v3906_v34, %s7738_s21 }
 0x33c   : > { %4015 = vrot.lane.b32.xlu0 %v3983_v14, %s7737_s20  ;;  %4017 = vrot.lane.b32.xlu1 %v3986_v48, %s7737_s20  ;;  %v4544_v27 = vpop.permute.xlu1 %4543  ;;  %v5275_v14 = vrot.slane %v5273_v37, 1  ;;  %v5266_v48 = vshll.u32 %v10016_v36, 16  ;;  %v10057_v37 = vld [vmem:[#allocation2 + $0x78] sm:$0xff]  }
 0x33d   : > { %v4608_v59 = vsel %vm687_vm4, %v4576_v23, %v4544_v27  ;;  %v5309_v52 = vshll.u32 %v10057_v37, 16  ;;  %v5307_v51 = vshrl.u32 %v10057_v37, 16 }
 0x33e   : > { %v5276_v10 = vor.u32 %v5275_v14, %v5271_v61  ;;  %v5268_v16 = vrot.slane %v5266_v48, 1  ;;  %v5452_v14 = vrot.slane %v10025_v50, 1  ;;  %v7712_v48 = vld [vmem:[#allocation2 + $0x6c] sm:$0xff]  }
 0x340   : > { %5402 = vrot.lane.b32.xlu0 %v5221_v6, %s7738_s21  ;;  %5404 = vrot.lane.b32.xlu1 %v5233_v45, %s7738_s21  ;;  %v5445_v6 = vsel %vm573_vm0, %v5443_v33, %v5444_v11  ;;  %v5446_v45 = vrot.slane %v9998_v39, 1  ;;  %v5281_v23 = vsel %vm348_vm2, %v5276_v10, %v5280_v57 }
 0x342   : > { %v4462_v12 = vpop.permute.xlu0 %4461 }
 0x343   : > { %v4574_v25 = vsel %vm654_vm3, %v7709_v0, %v4462_v12  ;;  %v5447_v12 = vrot.slane %v10016_v36, 1  ;;  %v5299_v36 = vrot.slane %v5297_v42, 1  ;;  %v10064_v0 = vld [vmem:[#allocation2 + $0x84] sm:$0xff]  }
 0x344   : > { %5482 = vrot.lane.b32.xlu0 %v5436_v49, %s7737_s20  ;;  %5484 = vrot.lane.b32.xlu1 %v5439_v19, %s7737_s20  ;;  %v7711_v49 = vld [vmem:[#allocation2 + $0x60] sm:$0xff]   ;;  %v5269_v19 = vsel %vm348_vm2, %v5264_v35, %v5268_v16  ;;  %v5321_v33 = vshll.u32 %v10064_v0, 16  ;;  %v10084_v35 = vld [vmem:[#allocation2 + $0x8c] ss:$0 sps:$4 sm:$0x11]  }
 0x346   : > { %v4542_v20 = vpop.permute.xlu0 %4541  ;;  %v5323_v57 = vrot.slane %v5321_v33, 1 }
 0x347   : > { %v4606_v34 = vsel %vm687_vm4, %v4574_v25, %v4542_v20  ;;  %v5283_v25 = vshrl.u32 %v10025_v50, 16 }
 0x348   : > { %5406 = vrot.lane.b32.xlu0 %v5245_v21, %s7738_s21  ;;  %7237 = vmatprep.mubr.msk.bf16.mxu1 %vm1275_vm5, %v4606_v34  ;;  %v5448_v21 = vsel %vm573_vm0, %v5446_v45, %v5447_v12  ;;  %v5311_v45 = vrot.slane %v5309_v52, 1  ;;  %v10096_v12 = vld [vmem:[#allocation2 + $0x9c] sm:$0xff]   ;;  %v5461_v52 = vrot.slane %v10064_v0, 1 }
 0x349   : > { %5408 = vrot.lane.b32.xlu1 %v5257_v3, %s7738_s21  ;;  %7238 = vmatmul.mubr.msk.bf16.gmra.mrb[8].mxu1 %vm1275_vm5, %v4608_v59  ;;  %v5290_v59 = vshll.u32 %v10047_v44, 16  ;;  %v5288_v32 = vor.u32 %v5287_v18, %v5283_v25  ;;  %v5300_v3 = vor.u32 %v5299_v36, %v5295_v29  ;;  %v5345_v36 = vshll.u32 %v10096_v12, 16  ;;  %v7714_v29 = vld [vmem:[#allocation2 + $0x84] sm:$0xff]  }
 0x34a   : > { %v4466_v63 = vpop.permute.xlu0 %4465  ;;  %v4468_v56 = vpop.permute.xlu1 %4467 }
 0x34b   : > { %v4578_v5 = vsel %vm654_vm3, %v7710_v31, %v4466_v63  ;;  %v4580_v27 = vsel %vm654_vm3, %v7711_v49, %v4468_v56  ;;  %v5292_v11 = vrot.slane %v5290_v59, 1  ;;  %v5453_v56 = vrot.slane %v10047_v44, 1  ;;  %v10089_v31 = vld [vmem:[#allocation2 + $0x90] sm:$0xff]  }
 0x34c   : > { %5486 = vrot.lane.b32.xlu0 %v5442_v28, %s7737_s20  ;;  %v5455_v28 = vrot.slane %v10032_v41, 1  ;;  %v5305_v44 = vsel %vm348_vm2, %v5300_v3, %v5304_v38  ;;  %v5314_v49 = vshll.u32 %v10079_v55, 16  ;;  %v5458_v59 = vrot.slane %v10057_v37, 1  ;;  %v7715_v3 = vld [vmem:[#allocation2 + $0x90] sm:$0xff]  }
 0x34d   : > { %5488 = vrot.lane.b32.xlu1 %v5445_v6, %s7737_s20  ;;  %v5293_v16 = vsel %vm348_vm2, %v5288_v32, %v5292_v11  ;;  %v5454_v18 = vsel %vm573_vm0, %v5452_v14, %v5453_v56  ;;  %v5459_v32 = vrot.slane %v10079_v55, 1  ;;  %v5462_v56 = vrot.slane %v10084_v35, 1 }
 0x34e   : > { %v4546_v4 = vpop.permute.xlu0 %4545  ;;  %v4548_v7 = vpop.permute.xlu1 %4547  ;;  %v5316_v25 = vrot.slane %v5314_v49, 1 }
 0x34f   : > { %v4610_v26 = vsel %vm687_vm4, %v4578_v5, %v4546_v4  ;;  %v4612_v22 = vsel %vm687_vm4, %v4580_v27, %v4548_v7  ;;  %v5456_v4 = vrot.slane %v10052_v58, 1  ;;  %v5319_v7 = vshrl.u32 %v10064_v0, 16 }
 0x350   : > { %5410 = vrot.lane.b32.xlu0 %v5269_v19, %s7738_s21  ;;  %7241 = vmatprep.mubr.msk.bf16.mxu1 %vm1275_vm5, %v4610_v26  ;;  %v5326_v26 = vshll.u32 %v10084_v35, 16  ;;  %v5312_v58 = vor.u32 %v5311_v45, %v5307_v51 }
 0x351   : > { %5412 = vrot.lane.b32.xlu1 %v5281_v23, %s7738_s21  ;;  %7242 = vmatmul.mubr.msk.bf16.gmra.mrb[12].mxu1 %vm1275_vm5, %v4612_v22  ;;  %v5333_v22 = vshll.u32 %v10089_v31, 16  ;;  %v5457_v23 = vsel %vm573_vm0, %v5455_v28, %v5456_v4  ;;  %v5324_v13 = vor.u32 %v5323_v57, %v5319_v7  ;;  %v5347_v28 = vrot.slane %v5345_v36, 1  ;;  %v10148_v36 = vld [vmem:[#allocation2 + $0xbc] ss:$0 sps:$4 sm:$0x11]  }
 0x352   : > { %v4470_v20 = vpop.permute.xlu0 %4469  ;;  %v4472_v34 = vpop.permute.xlu1 %4471  ;;  %v5463_v57 = vsel %vm573_vm0, %v5461_v52, %v5462_v56  ;;  %v5464_v7 = vrot.slane %v10089_v31, 1 }
 0x353   : > { %v4582_v63 = vsel %vm654_vm3, %v7712_v48, %v4470_v20  ;;  %v4584_v6 = vsel %vm654_vm3, %v7713_v9, %v4472_v34  ;;  %v10111_v20 = vld [vmem:[#allocation2 + $0x98] ss:$0 sps:$4 sm:$0x11]   ;;  %v5317_v48 = vsel %vm348_vm2, %v5312_v58, %v5316_v25  ;;  %v7717_v25 = vld [vmem:[#allocation2 + $0xa8] sm:$0xff]  }
 0x354   : > { %5490 = vrot.lane.b32.xlu0 %v5448_v21, %s7737_s20  ;;  %v5328_v21 = vrot.slane %v5326_v26, 1  ;;  %v10128_v9 = vld [vmem:[#allocation2 + $0xb4] sm:$0xff]   ;;  %v10143_v26 = vld [vmem:[#allocation2 + $0xb0] ss:$0 sps:$4 sm:$0x11]  }
 0x355   : > { %5492 = vrot.lane.b32.xlu1 %v5451_v53, %s7737_s20  ;;  %v10116_v53 = vld [vmem:[#allocation2 + $0xa4] ss:$0 sps:$4 sm:$0x11]   ;;  %v5369_v49 = vshll.u32 %v10128_v9, 16 }
 0x356   : > { %v4550_v61 = vpop.permute.xlu0 %4549  ;;  %v4552_v10 = vpop.permute.xlu1 %4551  ;;  %v5329_v55 = vsel %vm348_vm2, %v5324_v13, %v5328_v21  ;;  %v5350_v45 = vshll.u32 %v10116_v53, 16  ;;  %v5467_v13 = vrot.slane %v10096_v12, 1 }
 0x357   : > { %v4614_v42 = vsel %vm687_vm4, %v4582_v63, %v4550_v61  ;;  %v4616_v5 = vsel %vm687_vm4, %v4584_v6, %v4552_v10  ;;  %v5335_v63 = vrot.slane %v5333_v22, 1  ;;  %v10121_v61 = vld [vmem:[#allocation2 + $0xa8] sm:$0xff]   ;;  %v5331_v6 = vshrl.u32 %v10089_v31, 16 }
 0x358   : > { %5414 = vrot.lane.b32.xlu0 %v5293_v16, %s7738_s21  ;;  %7245 = vmatprep.mubr.msk.bf16.mxu1 %vm1275_vm5, %v4614_v42  ;;  %v5338_v10 = vshll.u32 %v10111_v20, 16  ;;  %v5343_v16 = vshrl.u32 %v10096_v12, 16  ;;  %v5357_v4 = vshll.u32 %v10121_v61, 16  ;;  %v5352_v22 = vrot.slane %v5350_v45, 1 }
 0x359   : > { %5416 = vrot.lane.b32.xlu1 %v5305_v44, %s7738_s21  ;;  %7246 = vmatmul.mubr.msk.bf16.gmra.mrb[16].mxu1 %vm1275_vm5, %v4616_v5  ;;  %v5460_v44 = vsel %vm573_vm0, %v5458_v59, %v5459_v32  ;;  %v5336_v35 = vor.u32 %v5335_v63, %v5331_v6  ;;  %v10153_v32 = vld [vmem:[#allocation2 + $0xc0] sm:$0xff]  }
 0x35a   : > { %v4474_v27 = vpop.permute.xlu0 %4473  ;;  %v4476_v19 = vpop.permute.xlu1 %4475  ;;  %v5348_v51 = vor.u32 %v5347_v28, %v5343_v16  ;;  %v5359_v21 = vrot.slane %v5357_v4, 1  ;;  %v5381_v6 = vshll.u32 %v10153_v32, 16 }
 0x35b   : > { %v4586_v24 = vsel %vm654_vm3, %v7714_v29, %v4474_v27  ;;  %v4588_v33 = vsel %vm654_vm3, %v7715_v3, %v4476_v19  ;;  %v5340_v27 = vrot.slane %v5338_v10, 1  ;;  %v7716_v19 = vld [vmem:[#allocation2 + $0x9c] sm:$0xff]   ;;  %v5468_v3 = vrot.slane %v10116_v53, 1 }
 0x35c   : > { %5494 = vrot.lane.b32.xlu0 %v5454_v18, %s7737_s20 }
 0x35d   : > { %5496 = vrot.lane.b32.xlu1 %v5457_v23, %s7737_s20  ;;  %v5465_v23 = vrot.slane %v10111_v20, 1  ;;  %v5353_v20 = vsel %vm348_vm2, %v5348_v51, %v5352_v22  ;;  %v5469_v10 = vsel %vm573_vm0, %v5467_v13, %v5468_v3  ;;  %v5383_v13 = vrot.slane %v5381_v6, 1 }
 0x35e   : > { %v4554_v34 = vpop.permute.xlu0 %4553  ;;  %v4556_v11 = vpop.permute.xlu1 %4555  ;;  %v5476_v6 = vrot.slane %v10153_v32, 1 }
 0x35f   : > { %v4618_v14 = vsel %vm687_vm4, %v4586_v24, %v4554_v34  ;;  %v4620_v38 = vsel %vm687_vm4, %v4588_v33, %v4556_v11  ;;  %v5341_v34 = vsel %vm348_vm2, %v5336_v35, %v5340_v27  ;;  %v5371_v33 = vrot.slane %v5369_v49, 1  ;;  %v10160_v11 = vld [vmem:[#allocation2 + $0xcc] sm:$0xff]   ;;  %v7718_v35 = vld [vmem:[#allocation2 + $0xb4] sm:$0xff]  }
 0x360   : > { %5418 = vrot.lane.b32.xlu0 %v5317_v48, %s7738_s21  ;;  %7249 = vmatprep.mubr.msk.bf16.mxu1 %vm1275_vm5, %v4618_v14  ;;  %v5355_v14 = vshrl.u32 %v10121_v61, 16  ;;  %v5362_v48 = vshll.u32 %v10143_v26, 16  ;;  %v5466_v28 = vsel %vm573_vm0, %v5464_v7, %v5465_v23  ;;  %v5393_v16 = vshll.u32 %v10160_v11, 16  ;;  %v7671_v7 = vld [vmem:[#allocation2 + $0xd4] ss:$0 sps:$4 sm:$0x11]  }
 0x361   : > { %5420 = vrot.lane.b32.xlu1 %v5329_v55, %s7738_s21  ;;  %7250 = vmatmul.mubr.msk.bf16.gmra.mrb[20].mxu1 %vm1275_vm5, %v4620_v38  ;;  %v5367_v38 = vshrl.u32 %v10128_v9, 16  ;;  %v5374_v55 = vshll.u32 %v10148_v36, 16  ;;  %v5471_v49 = vrot.slane %v10143_v26, 1  ;;  %v5473_v27 = vrot.slane %v10128_v9, 1 }
 0x362   : > { %v4478_v42 = vpop.permute.xlu0 %4477  ;;  %v4480_v5 = vpop.permute.xlu1 %4479  ;;  %v5360_v53 = vor.u32 %v5359_v21, %v5355_v14  ;;  %v5364_v45 = vrot.slane %v5362_v48, 1 }
 0x363   : > { %v4590_v18 = vsel %vm654_vm3, %v7716_v19, %v4478_v42  ;;  %v4592_v59 = vsel %vm654_vm3, %v7717_v25, %v4480_v5  ;;  %v5372_v42 = vor.u32 %v5371_v33, %v5367_v38  ;;  %v5470_v5 = vrot.slane %v10121_v61, 1  ;;  %v7719_v19 = vld [vmem:[#allocation2 + $0xc0] sm:$0xff]  }
 0x364   : > { %5498 = vrot.lane.b32.xlu0 %v5460_v44, %s7737_s20  ;;  %v7668_v44 = vld [vmem:[#allocation2 + $0xc8] ss:$0 sps:$4 sm:$0x11]   ;;  %v5376_v51 = vrot.slane %v5374_v55, 1  ;;  %v5365_v23 = vsel %vm348_vm2, %v5360_v53, %v5364_v45  ;;  %v7720_v38 = vld [vmem:[#allocation2] sm:$0xff]   ;;  %v5619_v53 = vsel %vm1308_vm1, %v9951_v62, 0 }
 0x365   : > { %5500 = vrot.lane.b32.xlu1 %v5463_v57, %s7737_s20  ;;  %v5472_v33 = vsel %vm573_vm0, %v5470_v5, %v5471_v49  ;;  %v5479_v62 = vrot.slane %v10160_v11, 1 }
 0x366   : > { %v4558_v58 = vpop.permute.xlu0 %4557  ;;  %v4560_v29 = vpop.permute.xlu1 %4559  ;;  %v5377_v26 = vsel %vm348_vm2, %v5372_v42, %v5376_v51  ;;  %v5480_v51 = vrot.slane %v7671_v7, 1 }
 0x367   : > { %v4622_v24 = vsel %vm687_vm4, %v4590_v18, %v4558_v58  ;;  %v4624_v52 = vsel %vm687_vm4, %v4592_v59, %v4560_v29  ;;  %v5474_v59 = vrot.slane %v10148_v36, 1  ;;  %v5395_v29 = vrot.slane %v5393_v16, 1 }
 0x368   : > { %5422 = vrot.lane.b32.xlu0 %v5341_v34, %s7738_s21  ;;  %7253 = vmatprep.mubr.msk.bf16.mxu1 %vm1275_vm5, %v4622_v24  ;;  %v5379_v24 = vshrl.u32 %v10153_v32, 16  ;;  %v5386_v34 = vshll.u32 %v7668_v44, 16 }
 0x369   : > { %5424 = vrot.lane.b32.xlu1 %v5353_v20, %s7738_s21  ;;  %7254 = vmatmul.mubr.msk.bf16.gmra.mrb[24].mxu1 %vm1275_vm5, %v4624_v52  ;;  %v5391_v52 = vshrl.u32 %v10160_v11, 16  ;;  %v5398_v20 = vshll.u32 %v7671_v7, 16  ;;  %v5475_v36 = vsel %vm573_vm0, %v5473_v27, %v5474_v59  ;;  %v7723_v7 = vld [vmem:[#allocation2 + $0x24] sm:$0xff]  }
 0x36a   : > { %v4482_v63 = vpop.permute.xlu0 %4481  ;;  %v4484_v56 = vpop.permute.xlu1 %4483  ;;  %v5384_v14 = vor.u32 %v5383_v13, %v5379_v24  ;;  %v7724_v24 = vld [vmem:[#allocation2 + $0x30] sm:$0xff]  }
 0x36b   : > { %v4594_v4 = vsel %vm654_vm3, %v7718_v35, %v4482_v63  ;;  %v4596_v18 = vsel %vm654_vm3, %v7719_v19, %v4484_v56  ;;  %v5396_v48 = vor.u32 %v5395_v29, %v5391_v52  ;;  %v5388_v63 = vrot.slane %v5386_v34, 1  ;;  %v7725_v52 = vld [vmem:[#allocation2 + $0x3c] sm:$0xff]  }
 0x36c   : > { %5502 = vrot.lane.b32.xlu0 %v5466_v28, %s7737_s20  ;;  %v5400_v28 = vrot.slane %v5398_v20, 1  ;;  %v5477_v35 = vrot.slane %v7668_v44, 1  ;;  %v5481_v19 = vsel %vm573_vm0, %v5479_v62, %v5480_v51 }
 0x36d   : > { %5504 = vrot.lane.b32.xlu1 %v5469_v10, %s7737_s20  ;;  %v7721_v10 = vld [vmem:[#allocation2 + $0xc] sm:$0xff]   ;;  %v5389_v5 = vsel %vm348_vm2, %v5384_v14, %v5388_v63 }
 0x36e   : > { %v4562_v57 = vpop.permute.xlu0 %4561  ;;  %v4564_v58 = vpop.permute.xlu1 %4563  ;;  %v5478_v44 = vsel %vm573_vm0, %v5476_v6, %v5477_v35  ;;  %v7726_v63 = vld [vmem:[#allocation2 + $0x48] sm:$0xff]  }
 0x36f   : > { %v4626_v22 = vsel %vm687_vm4, %v4594_v4, %v4562_v57  ;;  %v4628_v25 = vsel %vm687_vm4, %v4596_v18, %v4564_v58  ;;  %v5401_v57 = vsel %vm348_vm2, %v5396_v48, %v5400_v28  ;;  %v7722_v18 = vld [vmem:[#allocation2 + $0x18] sm:$0xff]  }
 0x370   : > { %5426 = vrot.lane.b32.xlu0 %v5365_v23, %s7738_s21  ;;  %7257 = vmatprep.mubr.msk.bf16.mxu1 %vm1275_vm5, %v4626_v22 }
 0x371   : > { %5428 = vrot.lane.b32.xlu1 %v5377_v26, %s7738_s21  ;;  %7258 = vmatmul.mubr.msk.bf16.gmra.mrb[28].mxu1 %vm1275_vm5, %v4628_v25 }
 0x372   : > { %v3908_v21 = vpop.permute.xlu0 %3907  ;;  %v3910_v3 = vpop.permute.xlu1 %3909 }
 0x373   : > { %v4020_v55 = vsel %vm654_vm3, %v7720_v38, %v3908_v21  ;;  %v4022_v42 = vsel %vm654_vm3, %v7721_v10, %v3910_v3 }
 0x374   : > { %5506 = vrot.lane.b32.xlu0 %v5472_v33, %s7737_s20 }
 0x375   : > { %5508 = vrot.lane.b32.xlu1 %v5475_v36, %s7737_s20 }
 0x376   : > { %v3988_v56 = vpop.permute.xlu0 %3987  ;;  %v3990_v45 = vpop.permute.xlu1 %3989 }
 0x377   : > { %v4052_v16 = vsel %vm687_vm4, %v4020_v55, %v3988_v56  ;;  %v4054_v4 = vsel %vm687_vm4, %v4022_v42, %v3990_v45  ;;  %v7727_v56 = vld [vmem:[#allocation2 + $0x54] sm:$0xff]   ;;  %v7728_v45 = vld [vmem:[#allocation2 + $0x60] sm:$0xff]  }
 0x378   : > { %5430 = vrot.lane.b32.xlu0 %v5389_v5, %s7738_s21  ;;  %7263 = vmatprep.mubr.msk.bf16.mxu1 %vm1275_vm5, %v4052_v16 }
 0x379   : > { %5432 = vrot.lane.b32.xlu1 %v5401_v57, %s7738_s21  ;;  %7264 = vmatmul.mubr.msk.bf16.vlgmr.msra.gmra.mrb[0].mxu1 %vm1275_vm5, %v4054_v4 }
 0x37a   : > { %7296 = vmatpush3.bf16.msra.mxu1 %v5619_v53  ;;  %v3912_v49 = vpop.permute.xlu0 %3911  ;;  %v3914_v27 = vpop.permute.xlu1 %3913 }
 0x37b   : > { %v4024_v58 = vsel %vm654_vm3, %v7722_v18, %v3912_v49  ;;  %v4026_v23 = vsel %vm654_vm3, %v7723_v7, %v3914_v27 }
 0x37c   : > { %5510 = vrot.lane.b32.xlu0 %v5478_v44, %s7737_s20 }
 0x37d   : > { %5512 = vrot.lane.b32.xlu1 %v5481_v19, %s7737_s20 }
 0x37e   : > { %v3992_v22 = vpop.permute.xlu0 %3991  ;;  %v3994_v25 = vpop.permute.xlu1 %3993 }
 0x37f   : > { %v4056_v13 = vsel %vm687_vm4, %v4024_v58, %v3992_v22  ;;  %v4058_v26 = vsel %vm687_vm4, %v4026_v23, %v3994_v25 }
 0x380   : > { %7267 = vmatprep.mubr.msk.bf16.mxu1 %vm1275_vm5, %v4056_v13 }
 0x381   : > { %7268 = vmatmul.mubr.msk.bf16.gmra.mrb[4].mxu1 %vm1275_vm5, %v4058_v26 }
 0x382   : > { %v3916_v59 = vpop.permute.xlu0 %3915  ;;  %v3918_v29 = vpop.permute.xlu1 %3917 }
 0x383   : > { %v4028_v34 = vsel %vm654_vm3, %v7724_v24, %v3916_v59  ;;  %v4030_v20 = vsel %vm654_vm3, %v7725_v52, %v3918_v29 }
 0x386   : > { %v3996_v21 = vpop.permute.xlu0 %3995  ;;  %v3998_v33 = vpop.permute.xlu1 %3997 }
 0x387   : > { %v4060_v3 = vsel %vm687_vm4, %v4028_v34, %v3996_v21  ;;  %v4062_v14 = vsel %vm687_vm4, %v4030_v20, %v3998_v33 }
 0x388   : > { %7271 = vmatprep.mubr.msk.bf16.mxu1 %vm1275_vm5, %v4060_v3 }
 0x389   : > { %7272 = vmatmul.mubr.msk.bf16.gmra.mrb[8].mxu1 %vm1275_vm5, %v4062_v14 }
 0x38a   : > { %v3920_v36 = vpop.permute.xlu0 %3919  ;;  %v3922_v48 = vpop.permute.xlu1 %3921 }
 0x38b   : > { %v4032_v38 = vsel %vm654_vm3, %v7726_v63, %v3920_v36  ;;  %v4034_v28 = vsel %vm654_vm3, %v7727_v56, %v3922_v48 }
 0x38e   : > { %v4000_v55 = vpop.permute.xlu0 %3999  ;;  %v4002_v6 = vpop.permute.xlu1 %4001 }
 0x38f   : > { %v4064_v53 = vsel %vm687_vm4, %v4032_v38, %v4000_v55  ;;  %v4066_v10 = vsel %vm687_vm4, %v4034_v28, %v4002_v6 }
 0x390   : > { %7275 = vmatprep.mubr.msk.bf16.mxu1 %vm1275_vm5, %v4064_v53 }
 0x391   : > { %7276 = vmatmul.mubr.msk.bf16.gmra.mrb[12].mxu1 %vm1275_vm5, %v4066_v10 }
 0x392   : > { %v3924_v42 = vpop.permute.xlu0 %3923  ;;  %v3926_v16 = vpop.permute.xlu1 %3925 }
 0x393   : > { %v4036_v5 = vsel %vm654_vm3, %v7728_v45, %v3924_v42  ;;  %v4038_v4 = vsel %vm654_vm3, %v9869_v8, %v3926_v16 }
 0x396   : > { %v4004_v35 = vpop.permute.xlu0 %4003  ;;  %v4006_v62 = vpop.permute.xlu1 %4005 }
 0x397   : > { %v4068_v57 = vsel %vm687_vm4, %v4036_v5, %v4004_v35  ;;  %v4070_v51 = vsel %vm687_vm4, %v4038_v4, %v4006_v62 }
 0x398   : > { %7279 = vmatprep.mubr.msk.bf16.mxu1 %vm1275_vm5, %v4068_v57 }
 0x399   : > { %7280 = vmatmul.mubr.msk.bf16.gmra.mrb[16].mxu1 %vm1275_vm5, %v4070_v51 }
 0x39a   : > { %v3928_v49 = vpop.permute.xlu0 %3927  ;;  %v3930_v27 = vpop.permute.xlu1 %3929 }
 0x39b   : > { %v4040_v44 = vsel %vm654_vm3, %v9884_v17, %v3928_v49  ;;  %v4042_v18 = vsel %vm654_vm3, %v9889_v40, %v3930_v27 }
 0x39e   : > { %v4008_v19 = vpop.permute.xlu0 %4007  ;;  %v4010_v58 = vpop.permute.xlu1 %4009 }
 0x39f   : > { %v4072_v8 = vsel %vm687_vm4, %v4040_v44, %v4008_v19  ;;  %v4074_v22 = vsel %vm687_vm4, %v4042_v18, %v4010_v58 }
 0x3a0   : > { %7283 = vmatprep.mubr.msk.bf16.mxu1 %vm1275_vm5, %v4072_v8 }
 0x3a1   : > { %7284 = vmatmul.mubr.msk.bf16.gmra.mrb[20].mxu1 %vm1275_vm5, %v4074_v22 }
 0x3a2   : > { %v3932_v7 = vpop.permute.xlu0 %3931  ;;  %v3934_v23 = vpop.permute.xlu1 %3933 }
 0x3a3   : > { %v4044_v13 = vsel %vm654_vm3, %v9903_v43, %v3932_v7  ;;  %v4046_v17 = vsel %vm654_vm3, %v9905_v47, %v3934_v23 }
 0x3a6   : > { %v4012_v25 = vpop.permute.xlu0 %4011  ;;  %v4014_v26 = vpop.permute.xlu1 %4013 }
 0x3a7   : > { %v4076_v40 = vsel %vm687_vm4, %v4044_v13, %v4012_v25  ;;  %v4078_v59 = vsel %vm687_vm4, %v4046_v17, %v4014_v26 }
 0x3a8   : > { %7287 = vmatprep.mubr.msk.bf16.mxu1 %vm1275_vm5, %v4076_v40 }
 0x3a9   : > { %7288 = vmatmul.mubr.msk.bf16.gmra.mrb[24].mxu1 %vm1275_vm5, %v4078_v59 }
 0x3aa   : > { %v3936_v29 = vpop.permute.xlu0 %3935  ;;  %v3938_v24 = vpop.permute.xlu1 %3937 }
 0x3ab   : > { %v4048_v34 = vsel %vm654_vm3, %v9924_v30, %v3936_v29  ;;  %v4050_v43 = vsel %vm654_vm3, %v9929_v1, %v3938_v24 }
 0x3ae   : > { %v4016_v21 = vpop.permute.xlu0 %4015  ;;  %v4018_v52 = vpop.permute.xlu1 %4017 }
 0x3af   : > { %v4080_v47 = vsel %vm687_vm4, %v4048_v34, %v4016_v21  ;;  %v4082_v20 = vsel %vm687_vm4, %v4050_v43, %v4018_v52 }
 0x3b0   : > { %7291 = vmatprep.mubr.msk.bf16.mxu1 %vm1275_vm5, %v4080_v47 }
 0x3b1   : > { %7292 = vmatmul.mubr.msk.bf16.gmra.mrb[28].mxu1 %vm1275_vm5, %v4082_v20 }
 0x3b2   : > { %v5403_v3 = vpop.permute.xlu0 %5402  ;;  %v5405_v33 = vpop.permute.xlu1 %5404 }
 0x3b3   : > { %v5515_v14 = vsel %vm654_vm3, %v9956_v2, %v5403_v3  ;;  %v5517_v30 = vsel %vm654_vm3, %v9962_v46, %v5405_v33 }
 0x3b6   : > { %v5483_v36 = vpop.permute.xlu0 %5482  ;;  %v5485_v48 = vpop.permute.xlu1 %5484 }
 0x3b7   : > { %v5547_v1 = vsel %vm687_vm4, %v5515_v14, %v5483_v36  ;;  %v5549_v63 = vsel %vm687_vm4, %v5517_v30, %v5485_v48 }
 0x3b8   : > { %7297 = vmatprep.mubr.msk.bf16.mxu1 %vm1275_vm5, %v5547_v1 }
 0x3b9   : > { %7298 = vmatmul.mubr.msk.bf16.vlgmr.msra.gmra.mrb[0].mxu1 %vm1275_vm5, %v5549_v63 }
 0x3ba   : > { %v5407_v38 = vpop.permute.xlu0 %5406 }
 0x3bb   : > { %v5409_v55 = vpop.permute.xlu1 %5408  ;;  %v5519_v56 = vsel %vm654_vm3, %v9978_v15, %v5407_v38 }
 0x3bc   : > { %v5521_v2 = vsel %vm654_vm3, %v9983_v54, %v5409_v55 }
 0x3be   : > { %v5487_v28 = vpop.permute.xlu0 %5486 }
 0x3bf   : > { %v5551_v46 = vsel %vm687_vm4, %v5519_v56, %v5487_v28  ;;  %v5489_v53 = vpop.permute.xlu1 %5488 }
 0x3c0   : > { %v5553_v6 = vsel %vm687_vm4, %v5521_v2, %v5489_v53  ;;  %7301 = vmatprep.mubr.msk.bf16.mxu1 %vm1275_vm5, %v5551_v46 }
 0x3c1   : > { %7302 = vmatmul.mubr.msk.bf16.gmra.mrb[4].mxu1 %vm1275_vm5, %v5553_v6 }
 0x3c2   : > { %v5411_v10 = vpop.permute.xlu0 %5410 }
 0x3c3   : > { %v5413_v42 = vpop.permute.xlu1 %5412  ;;  %v5523_v16 = vsel %vm654_vm3, %v9998_v39, %v5411_v10 }
 0x3c4   : > { %v5525_v15 = vsel %vm654_vm3, %v10003_v60, %v5413_v42 }
 0x3c6   : > { %v5491_v45 = vpop.permute.xlu0 %5490 }
 0x3c7   : > { %v5555_v54 = vsel %vm687_vm4, %v5523_v16, %v5491_v45  ;;  %v5493_v5 = vpop.permute.xlu1 %5492 }
 0x3c8   : > { %v5557_v35 = vsel %vm687_vm4, %v5525_v15, %v5493_v5  ;;  %7305 = vmatprep.mubr.msk.bf16.mxu1 %vm1275_vm5, %v5555_v54 }
 0x3c9   : > { %7306 = vmatmul.mubr.msk.bf16.gmra.mrb[8].mxu1 %vm1275_vm5, %v5557_v35 }
 0x3ca   : > { %v5415_v4 = vpop.permute.xlu0 %5414 }
 0x3cb   : > { %v5417_v57 = vpop.permute.xlu1 %5416  ;;  %v5527_v62 = vsel %vm654_vm3, %v10025_v50, %v5415_v4 }
 0x3cc   : > { %v5529_v39 = vsel %vm654_vm3, %v10032_v41, %v5417_v57 }
 0x3ce   : > { %v5495_v51 = vpop.permute.xlu0 %5494 }
 0x3cf   : > { %v5559_v60 = vsel %vm687_vm4, %v5527_v62, %v5495_v51  ;;  %v5497_v49 = vpop.permute.xlu1 %5496 }
 0x3d0   : > { %v5561_v27 = vsel %vm687_vm4, %v5529_v39, %v5497_v49  ;;  %7309 = vmatprep.mubr.msk.bf16.mxu1 %vm1275_vm5, %v5559_v60 }
 0x3d1   : > { %7310 = vmatmul.mubr.msk.bf16.gmra.mrb[12].mxu1 %vm1275_vm5, %v5561_v27 }
 0x3d2   : > { %v5419_v44 = vpop.permute.xlu0 %5418 }
 0x3d3   : > { %v5421_v19 = vpop.permute.xlu1 %5420  ;;  %v5531_v18 = vsel %vm654_vm3, %v10057_v37, %v5419_v44 }
 0x3d4   : > { %v5533_v50 = vsel %vm654_vm3, %v10064_v0, %v5421_v19 }
 0x3d6   : > { %v5499_v8 = vpop.permute.xlu0 %5498 }
 0x3d7   : > { %v5563_v41 = vsel %vm687_vm4, %v5531_v18, %v5499_v8  ;;  %v5501_v58 = vpop.permute.xlu1 %5500 }
 0x3d8   : > { %v5565_v22 = vsel %vm687_vm4, %v5533_v50, %v5501_v58  ;;  %7313 = vmatprep.mubr.msk.bf16.mxu1 %vm1275_vm5, %v5563_v41 }
 0x3d9   : > { %7314 = vmatmul.mubr.msk.bf16.gmra.mrb[16].mxu1 %vm1275_vm5, %v5565_v22 }
 0x3da   : > { %v5423_v7 = vpop.permute.xlu0 %5422 }
 0x3db   : > { %v5425_v23 = vpop.permute.xlu1 %5424  ;;  %v5535_v13 = vsel %vm654_vm3, %v10089_v31, %v5423_v7 }
 0x3dc   : > { %v5537_v37 = vsel %vm654_vm3, %v10096_v12, %v5425_v23 }
 0x3de   : > { %v5503_v25 = vpop.permute.xlu0 %5502 }
 0x3df   : > { %v5567_v0 = vsel %vm687_vm4, %v5535_v13, %v5503_v25  ;;  %v5505_v17 = vpop.permute.xlu1 %5504 }
 0x3e0   : > { %v5569_v40 = vsel %vm687_vm4, %v5537_v37, %v5505_v17  ;;  %7317 = vmatprep.mubr.msk.bf16.mxu1 %vm1275_vm5, %v5567_v0 }
 0x3e1   : > { %7318 = vmatmul.mubr.msk.bf16.gmra.mrb[20].mxu1 %vm1275_vm5, %v5569_v40 }
 0x3e2   : > { %v5427_v26 = vpop.permute.xlu0 %5426 }
 0x3e3   : > { %v5429_v59 = vpop.permute.xlu1 %5428  ;;  %v5539_v29 = vsel %vm654_vm3, %v10121_v61, %v5427_v26 }
 0x3e4   : > { %v5541_v31 = vsel %vm654_vm3, %v10128_v9, %v5429_v59 }
 0x3e6   : > { %v5507_v24 = vpop.permute.xlu0 %5506 }
 0x3e7   : > { %v5571_v12 = vsel %vm687_vm4, %v5539_v29, %v5507_v24  ;;  %v5509_v34 = vpop.permute.xlu1 %5508 }
 0x3e8   : > { %v5573_v21 = vsel %vm687_vm4, %v5541_v31, %v5509_v34  ;;  %7321 = vmatprep.mubr.msk.bf16.mxu1 %vm1275_vm5, %v5571_v12 }
 0x3e9   : > { %7322 = vmatmul.mubr.msk.bf16.gmra.mrb[24].mxu1 %vm1275_vm5, %v5573_v21 }
 0x3ea   : > { %v5431_v43 = vpop.permute.xlu0 %5430 }
 0x3eb   : > { %v5433_v47 = vpop.permute.xlu1 %5432  ;;  %v5543_v52 = vsel %vm654_vm3, %v10153_v32, %v5431_v43 }
 0x3ec   : > { %v5545_v61 = vsel %vm654_vm3, %v10160_v11, %v5433_v47 }
 0x3ee   : > { %v5511_v20 = vpop.permute.xlu0 %5510 }
 0x3ef   : > { %v5575_v9 = vsel %vm687_vm4, %v5543_v52, %v5511_v20  ;;  %v5513_v3 = vpop.permute.xlu1 %5512 }
 0x3f0   : > { %v5577_v33 = vsel %vm687_vm4, %v5545_v61, %v5513_v3  ;;  %7325 = vmatprep.mubr.msk.bf16.mxu1 %vm1275_vm5, %v5575_v9 }
 0x3f1   : > { %7326 = vmatmul.mubr.msk.bf16.gmra.mrb[28].mxu1 %vm1275_vm5, %v5577_v33 }
 0x48c   : > { %v10325_v14 = vpop.f32.mrb[0].mxu1 }
 0x48d   : > { %v10327_v36 = vpop.f32.mrb[1].mxu1  ;;  %v5886_v11 = vmul.f32 %v10325_v14, %v10325_v14  ;;  %v5817_v56 = vsel %vm654_vm3, %v10325_v14, 0.0 }
 0x48e   : > { %v5884_v32 = vmul.f32 %v10327_v36, %v10327_v36  ;;  %v10331_v30 = vpop.f32.mrb[2].mxu1  ;;  %v5814_v48 = vsel %vm654_vm3, %v10327_v36, 0.0 }
 0x48f   : > { %v10333_v1 = vpop.f32.mrb[3].mxu1  ;;  %v5887_v2 = vmul.f32 %v10331_v30, %v10331_v30  ;;  %v5919_v10 = vsel %vm654_vm3, %v5886_v11, 0.0  ;;  %v5819_v42 = vsel %vm654_vm3, %v10331_v30, 0.0 }
 0x490   : > { %v5815_v63 = vsel %vm654_vm3, %v10333_v1, 0.0  ;;  %v5885_v38 = vmul.f32 %v10333_v1, %v10333_v1  ;;  %v5916_v28 = vsel %vm654_vm3, %v5884_v32, 0.0 }
 0x491   : > { %v5816_v55 = vadd.f32 %v5815_v63, %v5814_v48  ;;  %v5921_v5 = vsel %vm654_vm3, %v5887_v2, 0.0 }
 0x492   : > { %v5917_v46 = vsel %vm654_vm3, %v5885_v38, 0.0 }
 0x493   : > { %v5818_v53 = vadd.f32 %v5817_v56, %v5816_v55  ;;  %v5918_v6 = vadd.f32 %v5917_v46, %v5916_v28 }
 0x494   : > { %v10352_v16 = vpop.f32.mrb[4].mxu1 }
 0x495   : > { %v5920_v45 = vadd.f32 %v5919_v10, %v5918_v6  ;;  %v10354_v15 = vpop.f32.mrb[5].mxu1  ;;  %v5820_v54 = vadd.f32 %v5819_v42, %v5818_v53  ;;  %v5890_v60 = vmul.f32 %v10352_v16, %v10352_v16  ;;  %v5825_v8 = vsel %vm654_vm3, %v10352_v16, 0.0 }
 0x496   : > { %v5821_v35 = vsel %vm654_vm3, %v10354_v15, 0.0  ;;  %v5888_v4 = vmul.f32 %v10354_v15, %v10354_v15  ;;  %v10361_v57 = vpop.f32.mrb[6].mxu1 }
 0x497   : > { %v5822_v62 = vadd.f32 %v5821_v35, %v5820_v54  ;;  %v5922_v51 = vadd.f32 %v5921_v5, %v5920_v45  ;;  %v10363_v39 = vpop.f32.mrb[7].mxu1  ;;  %v5891_v50 = vmul.f32 %v10361_v57, %v10361_v57  ;;  %v5927_v7 = vsel %vm654_vm3, %v5890_v60, 0.0 }
 0x498   : > { %v5923_v49 = vsel %vm654_vm3, %v5888_v4, 0.0  ;;  %v5823_v27 = vsel %vm654_vm3, %v10363_v39, 0.0  ;;  %v5889_v44 = vmul.f32 %v10363_v39, %v10363_v39  ;;  %v5827_v23 = vsel %vm654_vm3, %v10361_v57, 0.0 }
 0x499   : > { %v5924_v19 = vadd.f32 %v5923_v49, %v5922_v51  ;;  %v5824_v18 = vadd.f32 %v5823_v27, %v5822_v62  ;;  %v5929_v17 = vsel %vm654_vm3, %v5891_v50, 0.0 }
 0x49a   : > { %v5925_v41 = vsel %vm654_vm3, %v5889_v44, 0.0 }
 0x49b   : > { %v5826_v58 = vadd.f32 %v5825_v8, %v5824_v18  ;;  %v5926_v22 = vadd.f32 %v5925_v41, %v5924_v19 }
 0x49c   : > { %v10380_v13 = vpop.f32.mrb[8].mxu1 }
 0x49d   : > { %v5928_v25 = vadd.f32 %v5927_v7, %v5926_v22  ;;  %v10382_v37 = vpop.f32.mrb[9].mxu1  ;;  %v5828_v0 = vadd.f32 %v5827_v23, %v5826_v58  ;;  %v5894_v12 = vmul.f32 %v10380_v13, %v10380_v13  ;;  %v5833_v20 = vsel %vm654_vm3, %v10380_v13, 0.0 }
 0x49e   : > { %v5829_v40 = vsel %vm654_vm3, %v10382_v37, 0.0  ;;  %v5892_v26 = vmul.f32 %v10382_v37, %v10382_v37  ;;  %v10389_v59 = vpop.f32.mrb[10].mxu1 }
 0x49f   : > { %v5830_v29 = vadd.f32 %v5829_v40, %v5828_v0  ;;  %v5930_v24 = vadd.f32 %v5929_v17, %v5928_v25  ;;  %v10391_v31 = vpop.f32.mrb[11].mxu1  ;;  %v5895_v61 = vmul.f32 %v10389_v59, %v10389_v59  ;;  %v5935_v32 = vsel %vm654_vm3, %v5894_v12, 0.0 }
 0x4a0   : > { %v5931_v34 = vsel %vm654_vm3, %v5892_v26, 0.0  ;;  %v5831_v21 = vsel %vm654_vm3, %v10391_v31, 0.0  ;;  %v5893_v43 = vmul.f32 %v10391_v31, %v10391_v31  ;;  %v5835_v11 = vsel %vm654_vm3, %v10389_v59, 0.0 }
 0x4a1   : > { %v5932_v47 = vadd.f32 %v5931_v34, %v5930_v24  ;;  %v5832_v52 = vadd.f32 %v5831_v21, %v5830_v29  ;;  %v5937_v56 = vsel %vm654_vm3, %v5895_v61, 0.0  ;;  %v10462_v61 = vld [vmem:[%s7776_s19 + $0x18] sm:$0xff]  }
 0x4a2   : > { %v5933_v9 = vsel %vm654_vm3, %v5893_v43, 0.0 }
 0x4a3   : > { %v5834_v3 = vadd.f32 %v5833_v20, %v5832_v52  ;;  %v5934_v33 = vadd.f32 %v5933_v9, %v5932_v47 }
 0x4a4   : > { %v10408_v48 = vpop.f32.mrb[12].mxu1 }
 0x4a5   : > { %v5936_v63 = vadd.f32 %v5935_v32, %v5934_v33  ;;  %v10410_v38 = vpop.f32.mrb[13].mxu1  ;;  %v5836_v55 = vadd.f32 %v5835_v11, %v5834_v3  ;;  %v5898_v42 = vmul.f32 %v10408_v48, %v10408_v48  ;;  %v5841_v62 = vsel %vm654_vm3, %v10408_v48, 0.0  ;;  %v10470_v32 = vld [vmem:[%s7776_s19 + $0xc] sm:$0xff]  }
 0x4a6   : > { %v5837_v28 = vsel %vm654_vm3, %v10410_v38, 0.0  ;;  %v5896_v2 = vmul.f32 %v10410_v38, %v10410_v38  ;;  %v10417_v46 = vpop.f32.mrb[14].mxu1 }
 0x4a7   : > { %v5838_v53 = vadd.f32 %v5837_v28, %v5836_v55  ;;  %v5938_v6 = vadd.f32 %v5937_v56, %v5936_v63  ;;  %v10419_v10 = vpop.f32.mrb[15].mxu1  ;;  %v5899_v51 = vmul.f32 %v10417_v46, %v10417_v46  ;;  %v5943_v44 = vsel %vm654_vm3, %v5898_v42, 0.0 }
 0x4a8   : > { %v5939_v45 = vsel %vm654_vm3, %v5896_v2, 0.0  ;;  %v5839_v54 = vsel %vm654_vm3, %v10419_v10, 0.0  ;;  %v5897_v5 = vmul.f32 %v10419_v10, %v10419_v10  ;;  %v5843_v19 = vsel %vm654_vm3, %v10417_v46, 0.0 }
 0x4a9   : > { %v5940_v35 = vadd.f32 %v5939_v45, %v5938_v6  ;;  %v5840_v4 = vadd.f32 %v5839_v54, %v5838_v53  ;;  %v5945_v58 = vsel %vm654_vm3, %v5899_v51, 0.0  ;;  %v10482_v6 = vld [vmem:[%s7776_s19 + $0x14] sm:$0x1] }
 0x4aa   : > { %v5941_v60 = vsel %vm654_vm3, %v5897_v5, 0.0 }
 0x4ab   : > { %v5842_v49 = vadd.f32 %v5841_v62, %v5840_v4  ;;  %v5942_v27 = vadd.f32 %v5941_v60, %v5940_v35  ;;  %v10489_v4 = vld [vmem:[%s7776_s19 + $0x20] sm:$0x1]  ;;  %v10594_v35 = vld [vmem:[%s7776_s19 + $0x6c] sm:$0xff]  }
 0x4ac   : > { %v10436_v18 = vpop.f32.mrb[16].mxu1  ;;  %11258 = vst [vmem:[#allocation8_spill] sm:$0xff] %v10594_v35  ;;  %v10632_v62 = vld [vmem:[%s7776_s19 + $0xa8] sm:$0xff]   ;;  %v10670_v35 = vld [vmem:[%s7776_s19 + $0xb4] sm:$0xff]  }
 0x4ad   : > { %v5944_v8 = vadd.f32 %v5943_v44, %v5942_v27  ;;  %v10438_v50 = vpop.f32.mrb[17].mxu1  ;;  %v5844_v41 = vadd.f32 %v5843_v19, %v5842_v49  ;;  %v5902_v40 = vmul.f32 %v10436_v18, %v10436_v18  ;;  %v5849_v21 = vsel %vm654_vm3, %v10436_v18, 0.0  ;;  %v10500_v44 = vld [vmem:[%s7776_s19 + $0x24] sm:$0xff]   ;;  %11265 = vst [vmem:[#allocation15_spill] sm:$0xff] %v10632_v62  ;;  %11273 = vst [vmem:[#allocation23_spill] sm:$0xff] %v10670_v35 }
 0x4ae   : > { %v5845_v22 = vsel %vm654_vm3, %v10438_v50, 0.0  ;;  %v5900_v7 = vmul.f32 %v10438_v50, %v10438_v50  ;;  %v10445_v23 = vpop.f32.mrb[18].mxu1  ;;  %v11275_v62 = vunpack.c.h.bf16 %v10470_v32 }
 0x4af   : > { %v5846_v25 = vadd.f32 %v5845_v22, %v5844_v41  ;;  %v5946_v0 = vadd.f32 %v5945_v58, %v5944_v8  ;;  %v10447_v17 = vpop.f32.mrb[19].mxu1  ;;  %v5903_v43 = vmul.f32 %v10445_v23, %v10445_v23  ;;  %v5951_v9 = vsel %vm654_vm3, %v5902_v40, 0.0  ;;  %v10503_v41 = vld [vmem:[%s7776_s19 + $0x30] sm:$0xff]   ;;  %v10513_v40 = vld [vmem:[%s7776_s19 + $0x2c] sm:$0x1] }
 0x4b0   : > { %v5947_v26 = vsel %vm654_vm3, %v5900_v7, 0.0  ;;  %v5847_v29 = vsel %vm654_vm3, %v10447_v17, 0.0  ;;  %v5901_v24 = vmul.f32 %v10447_v17, %v10447_v17  ;;  %v5851_v3 = vsel %vm654_vm3, %v10445_v23, 0.0 }
 0x4b1   : > { %v5948_v12 = vadd.f32 %v5947_v26, %v5946_v0  ;;  %v5848_v34 = vadd.f32 %v5847_v29, %v5846_v25  ;;  %v5953_v56 = vsel %vm654_vm3, %v5903_v43, 0.0  ;;  %v10516_v26 = vld [vmem:[%s7776_s19 + $0x38] sm:$0x1] }
 0x4b2   : > { %v5949_v47 = vsel %vm654_vm3, %v5901_v24, 0.0  ;;  %v10648_v43 = vld [vmem:[%s7776_s19 + $0x98] sm:$0x1] }
 0x4b3   : > { %v5850_v52 = vadd.f32 %v5849_v21, %v5848_v34  ;;  %v5950_v20 = vadd.f32 %v5949_v47, %v5948_v12  ;;  %v10520_v34 = vld [vmem:[%s7776_s19 + $0x48] sm:$0xff]   ;;  %11268 = vst [vmem:[#allocation18_spill] sm:$0xff] %v10648_v43 }
 0x4b4   : > { %v10467_v33 = vpop.f32.mrb[20].mxu1 }
 0x4b5   : > { %v5952_v11 = vadd.f32 %v5951_v9, %v5950_v20  ;;  %v10472_v63 = vpop.f32.mrb[21].mxu1  ;;  %v5852_v55 = vadd.f32 %v5851_v3, %v5850_v52  ;;  %v5906_v51 = vmul.f32 %v10467_v33, %v10467_v33  ;;  %v5857_v7 = vsel %vm654_vm3, %v10467_v33, 0.0 }
 0x4b6   : > { %v5853_v28 = vsel %vm654_vm3, %v10472_v63, 0.0  ;;  %v5904_v2 = vmul.f32 %v10472_v63, %v10472_v63  ;;  %v10479_v53 = vpop.f32.mrb[22].mxu1 }
 0x4b7   : > { %v5854_v45 = vadd.f32 %v5853_v28, %v5852_v55  ;;  %v5954_v54 = vadd.f32 %v5953_v56, %v5952_v11  ;;  %v10485_v5 = vpop.f32.mrb[23].mxu1  ;;  %v5907_v25 = vmul.f32 %v10479_v53, %v10479_v53  ;;  %v5959_v47 = vsel %vm654_vm3, %v5906_v51, 0.0  ;;  %v10532_v11 = vld [vmem:[%s7776_s19 + $0x3c] sm:$0xff]  }
 0x4b8   : > { %v5955_v60 = vsel %vm654_vm3, %v5904_v2, 0.0  ;;  %v5855_v49 = vsel %vm654_vm3, %v10485_v5, 0.0  ;;  %v5905_v27 = vmul.f32 %v10485_v5, %v10485_v5  ;;  %v5859_v52 = vsel %vm654_vm3, %v10479_v53, 0.0  ;;  %v10577_v2 = vld [vmem:[%s7776_s19 + $0x5c] sm:$0x1] }
 0x4b9   : > { %v5956_v19 = vadd.f32 %v5955_v60, %v5954_v54  ;;  %v5856_v8 = vadd.f32 %v5855_v49, %v5854_v45  ;;  %v5961_v54 = vsel %vm654_vm3, %v5907_v25, 0.0 }
 0x4ba   : > { %v5957_v0 = vsel %vm654_vm3, %v5905_v27, 0.0  ;;  %v10567_v27 = vld [vmem:[%s7776_s19 + $0x54] sm:$0xff]  }
 0x4bb   : > { %v5858_v24 = vadd.f32 %v5857_v7, %v5856_v8  ;;  %v5958_v12 = vadd.f32 %v5957_v0, %v5956_v19  ;;  %v10547_v19 = vld [vmem:[%s7776_s19 + $0x60] sm:$0xff]  }
 0x4bc   : > { %v10527_v20 = vpop.f32.mrb[24].mxu1 }
 0x4bd   : > { %11253 = vst [vmem:[#allocation3_spill] sm:$0xff] %v10527_v20  ;;  %v5960_v55 = vadd.f32 %v5959_v47, %v5958_v12  ;;  %v10534_v56 = vpop.f32.mrb[25].mxu1  ;;  %v5860_v28 = vadd.f32 %v5859_v52, %v5858_v24  ;;  %v5910_v12 = vmul.f32 %v10527_v20, %v10527_v20  ;;  %v5865_v45 = vsel %vm654_vm3, %v10527_v20, 0.0  ;;  %v10584_v24 = vld [vmem:[%s7776_s19 + $0x78] sm:$0xff]  }
 0x4be   : > { %v5861_v51 = vsel %vm654_vm3, %v10534_v56, 0.0  ;;  %v5908_v60 = vmul.f32 %v10534_v56, %v10534_v56  ;;  %v10543_v49 = vpop.f32.mrb[26].mxu1  ;;  %11256 = vst [vmem:[#allocation6_spill] sm:$0xff] %v10584_v24 }
 0x4bf   : > { %11254 = vst [vmem:[#allocation4_spill] sm:$0xff] %v10543_v49  ;;  %v5862_v8 = vadd.f32 %v5861_v51, %v5860_v28  ;;  %v5962_v7 = vadd.f32 %v5961_v54, %v5960_v55  ;;  %v10549_v0 = vpop.f32.mrb[27].mxu1  ;;  %v10561_v55 = vld [vmem:[%s7776_s19 + $0x44] sm:$0x1]  ;;  %v10564_v54 = vld [vmem:[%s7776_s19 + $0x50] sm:$0x1]  ;;  %v5911_v3 = vmul.f32 %v10543_v49, %v10543_v49 }
 0x4c0   : > { %11255 = vst [vmem:[#allocation5_spill] sm:$0xff] %v10549_v0  ;;  %v5963_v47 = vsel %vm654_vm3, %v5908_v60, 0.0  ;;  %v5863_v52 = vsel %vm654_vm3, %v10549_v0, 0.0  ;;  %v5909_v28 = vmul.f32 %v10549_v0, %v10549_v0  ;;  %v5967_v21 = vsel %vm654_vm3, %v5910_v12, 0.0  ;;  %v10667_v0 = vld [vmem:[%s7776_s19 + $0xb0] sm:$0x1] }
 0x4c1   : > { %v5964_v51 = vadd.f32 %v5963_v47, %v5962_v7  ;;  %v5864_v25 = vadd.f32 %v5863_v52, %v5862_v8  ;;  %v10581_v8 = vld [vmem:[%s7776_s19 + $0x68] sm:$0x1]  ;;  %v5969_v60 = vsel %vm654_vm3, %v5911_v3, 0.0  ;;  %11272 = vst [vmem:[#allocation22_spill] sm:$0xff] %v10667_v0 }
 0x4c2   : > { %v5965_v9 = vsel %vm654_vm3, %v5909_v28, 0.0  ;;  %v5867_v28 = vsel %vm654_vm3, %v10543_v49, 0.0  ;;  %v10641_v49 = vld [vmem:[%s7776_s19 + $0x84] sm:$0xff]  }
 0x4c3   : > { %v5866_v47 = vadd.f32 %v5865_v45, %v5864_v25  ;;  %v5966_v52 = vadd.f32 %v5965_v9, %v5964_v51  ;;  %11266 = vst [vmem:[#allocation16_spill] sm:$0xff] %v10641_v49  ;;  %v10685_v49 = vld [vmem:[%s7776_s19 + $0xbc] sm:$0x1] }
 0x4c4   : > { %v10591_v29 = vpop.f32.mrb[28].mxu1 }
 0x4c5   : > { %11257 = vst [vmem:[#allocation7_spill] sm:$0xff] %v10591_v29  ;;  %v5968_v45 = vadd.f32 %v5967_v21, %v5966_v52  ;;  %v10598_v25 = vpop.f32.mrb[29].mxu1  ;;  %v5868_v51 = vadd.f32 %v5867_v28, %v5866_v47  ;;  %v10611_v47 = vld [vmem:[%s7776_s19 + $0x90] sm:$0xff]   ;;  %v5914_v9 = vmul.f32 %v10591_v29, %v10591_v29  ;;  %v5873_v24 = vsel %vm654_vm3, %v10591_v29, 0.0 }
 0x4c6   : > { %11259 = vst [vmem:[#allocation9_spill] sm:$0xff] %v10598_v25  ;;  %v5869_v42 = vsel %vm654_vm3, %v10598_v25, 0.0  ;;  %v5912_v7 = vmul.f32 %v10598_v25, %v10598_v25  ;;  %v10607_v22 = vpop.f32.mrb[30].mxu1  ;;  %11261 = vst [vmem:[#allocation11_spill] sm:$0xff] %v10611_v47  ;;  %v10664_v47 = vld [vmem:[%s7776_s19 + $0xa4] sm:$0x1] }
 0x4c7   : > { %11260 = vst [vmem:[#allocation10_spill] sm:$0xff] %v10607_v22  ;;  %v5870_v52 = vadd.f32 %v5869_v42, %v5868_v51  ;;  %v5970_v28 = vadd.f32 %v5969_v60, %v5968_v45  ;;  %v10613_v12 = vpop.f32.mrb[31].mxu1  ;;  %v10625_v60 = vld [vmem:[%s7776_s19 + $0x74] sm:$0x1]  ;;  %v10628_v45 = vld [vmem:[%s7776_s19 + $0x80] sm:$0x1] }
 0x4c8   : > { %11262 = vst [vmem:[#allocation12_spill] sm:$0xff] %v10613_v12  ;;  %v5971_v58 = vsel %vm654_vm3, %v5912_v7, 0.0  ;;  %v5871_v21 = vsel %vm654_vm3, %v10613_v12, 0.0  ;;  %v5913_v42 = vmul.f32 %v10613_v12, %v10613_v12  ;;  %11263 = vst [vmem:[#allocation13_spill] sm:$0xff] %v10625_v60  ;;  %v5915_v12 = vmul.f32 %v10607_v22, %v10607_v22  ;;  %v10651_v7 = vld [vmem:[%s7776_s19 + $0x9c] sm:$0xff]  }
 0x4c9   : > { %11264 = vst [vmem:[#allocation14_spill] sm:$0xff] %v10628_v45  ;;  %v5972_v51 = vadd.f32 %v5971_v58, %v5970_v28  ;;  %v5872_v3 = vadd.f32 %v5871_v21, %v5870_v52  ;;  %v10645_v28 = vld [vmem:[%s7776_s19 + $0x8c] sm:$0x1]  ;;  %11269 = vst [vmem:[#allocation19_spill] sm:$0xff] %v10651_v7  ;;  %v5875_v20 = vsel %vm654_vm3, %v10607_v22, 0.0  ;;  %v6200_v29 = vrot.slane %v11275_v62, 1 }
 0x4ca   : > { %v5973_v25 = vsel %vm654_vm3, %v5913_v42, 0.0  ;;  %11267 = vst [vmem:[#allocation17_spill] sm:$0xff] %v10645_v28  ;;  %v5975_v42 = vsel %vm654_vm3, %v5914_v9, 0.0  ;;  %11271 = vst [vmem:[#allocation21_spill] sm:$0xff] %v10664_v47  ;;  %v5977_v45 = vsel %vm654_vm3, %v5915_v12, 0.0  ;;  %v11276_v60 = vunpack.c.l.bf16 %v10482_v6 }
 0x4cb   : > { %v5874_v21 = vadd.f32 %v5873_v24, %v5872_v3  ;;  %v5974_v52 = vadd.f32 %v5973_v25, %v5972_v51  ;;  %v10661_v25 = vld [vmem:[%s7776_s19 + $0xc0] sm:$0xff]   ;;  %v11277_v9 = vunpack.c.l.bf16 %v10462_v61  ;;  %v11282_v6 = vunpack.c.l.bf16 %v10513_v40 }
 0x4cc   : > { %11270 = vst [vmem:[#allocation20_spill] sm:$0xff] %v10661_v25  ;;  %v6202_v24 = vrot.slane %v11276_v60, 1  ;;  %v11283_v7 = vunpack.c.l.bf16 %v10503_v41  ;;  %v11287_v40 = vunpack.c.l.bf16 %v10532_v11 }
 0x4cd   : > { %v5876_v3 = vadd.f32 %v5875_v20, %v5874_v21  ;;  %v5976_v51 = vadd.f32 %v5975_v42, %v5974_v52  ;;  %v10691_v42 = vld [vmem:[%s7776_s19 + $0xc8] sm:$0x1]  ;;  %v6204_v12 = vrot.slane %v11277_v9, 1  ;;  %v11279_v20 = vunpack.c.l.bf16 %v10489_v4 }
 0x4ce   : > { %v6212_v60 = vrot.slane %v11282_v6, 1  ;;  %v6214_v9 = vrot.slane %v11283_v7, 1  ;;  %v11288_v7 = vunpack.c.h.bf16 %v10532_v11 }
 0x4cf   : > { %v5877_v21 = vrot.slane %v5876_v3, 4  ;;  %v5978_v52 = vadd.f32 %v5977_v45, %v5976_v51  ;;  %v11274_v45 = vunpack.c.l.bf16 %v10470_v32  ;;  %v6207_v35 = vrot.slane %v11279_v20, 1 }
 0x4d0   : > { %v11281_v32 = vunpack.c.h.bf16 %v10500_v44  ;;  %v6220_v6 = vrot.slane %v11288_v7, 1 }
 0x4d1   : > { %v5878_v58 = vadd.f32 %v5877_v21, %v5876_v3  ;;  %v5979_v28 = vrot.slane %v5978_v52, 4  ;;  %v6199_v51 = vrot.slane %v11274_v45, 1  ;;  %v11278_v3 = vunpack.c.h.bf16 %v10462_v61 }
 0x4d2   : > { %v11280_v45 = vunpack.c.l.bf16 %v10500_v44  ;;  %v6210_v62 = vrot.slane %v11281_v32, 1  ;;  %v11284_v61 = vunpack.c.h.bf16 %v10503_v41  ;;  %v11286_v44 = vunpack.c.l.bf16 %v10516_v26 }
 0x4d3   : > { %v6205_v21 = vrot.slane %v11278_v3, 1  ;;  %v5879_v25 = vrot.slane %v5878_v58, 2  ;;  %v5980_v0 = vadd.f32 %v5979_v28, %v5978_v52  ;;  %v10716_v52 = vsel %vm573_vm0, %v6199_v51, %v6200_v29 }
 0x4d4   : > { %v6209_v47 = vrot.slane %v11280_v45, 1  ;;  %v6215_v3 = vrot.slane %v11284_v61, 1  ;;  %11285 = vst [vmem:[#allocation24_spill] sm:$0xff] %v10716_v52  ;;  %v6217_v45 = vrot.slane %v11286_v44, 1  ;;  %v6219_v32 = vrot.slane %v11287_v40, 1 }
 0x4d5   : > { %v5880_v43 = vadd.f32 %v5879_v25, %v5878_v58  ;;  %v5981_v28 = vrot.slane %v5980_v0, 2  ;;  %v10725_v58 = vsel %vm573_vm0, %v6200_v29, %v6202_v24  ;;  %v10728_v25 = vsel %vm573_vm0, %v6204_v12, %v6205_v21 }
 0x4d6   : > { %11289 = vst [vmem:[#allocation25_spill] sm:$0xff] %v10725_v58  ;;  %11290 = vst [vmem:[#allocation26_spill] sm:$0xff] %v10728_v25  ;;  %v10731_v51 = vsel %vm573_vm0, %v6205_v21, %v6207_v35  ;;  %v10734_v26 = vsel %vm573_vm0, %v6209_v47, %v6210_v62  ;;  %v10737_v44 = vsel %vm573_vm0, %v6210_v62, %v6212_v60  ;;  %v11295_v29 = vunpack.c.l.bf16 %v10561_v55 }
 0x4d7   : > { %v5881_v41 = vrot.slane %v5880_v43, 1  ;;  %v5982_v61 = vadd.f32 %v5981_v28, %v5980_v0  ;;  %11291 = vst [vmem:[#allocation27_spill] sm:$0xff] %v10731_v51  ;;  %11292 = vst [vmem:[#allocation28_spill] sm:$0xff] %v10734_v26  ;;  %v10740_v11 = vsel %vm573_vm0, %v6214_v9, %v6215_v3  ;;  %v11296_v12 = vunpack.c.l.bf16 %v10520_v34 }
 0x4d8   : > { %11293 = vst [vmem:[#allocation29_spill] sm:$0xff] %v10737_v44  ;;  %11294 = vst [vmem:[#allocation30_spill] sm:$0xff] %v10740_v11  ;;  %v6222_v24 = vrot.slane %v11295_v29, 1  ;;  %v10747_v35 = vsel %vm573_vm0, %v6215_v3, %v6217_v45  ;;  %v10750_v47 = vsel %vm573_vm0, %v6219_v32, %v6220_v6  ;;  %v11299_v21 = vunpack.c.h.bf16 %v10520_v34 }
 0x4d9   : > { %v5882_v40 = vadd.f32 %v5881_v41, %v5880_v43  ;;  %v5983_v0 = vrot.slane %v5982_v61, 1  ;;  %v6224_v28 = vrot.slane %v11296_v12, 1  ;;  %11297 = vst [vmem:[#allocation31_spill] sm:$0xff] %v10747_v35  ;;  %11298 = vst [vmem:[#allocation32_spill] sm:$0xff] %v10750_v47  ;;  %v11300_v60 = vunpack.c.l.bf16 %v10564_v54 }
 0x4da   : > { %v6225_v62 = vrot.slane %v11299_v21, 1  ;;  %v11301_v55 = vunpack.c.l.bf16 %v10567_v27  ;;  %v11302_v29 = vunpack.c.h.bf16 %v10567_v27  ;;  %v11303_v3 = vunpack.c.l.bf16 %v10577_v2  ;;  %v11318_v27 = vld [vmem:[#allocation8_spill] sm:$0xff] }
 0x4db   : > { %v6227_v9 = vrot.slane %v11300_v60, 1  ;;  %v10756_v43 = vmul.f32 0.00390625, %v5882_v40  ;;  %v5984_v7 = vadd.f32 %v5983_v0, %v5982_v61  ;;  %v11304_v32 = vunpack.c.l.bf16 %v10547_v19 }
 0x4dc   : > { %v6229_v41 = vrot.slane %v11301_v55, 1  ;;  %v6230_v12 = vrot.slane %v11302_v29, 1  ;;  %v6232_v45 = vrot.slane %v11303_v3, 1  ;;  %v11305_v34 = vunpack.c.h.bf16 %v10547_v19 }
 0x4dd   : > { %v6234_v20 = vrot.slane %v11304_v32, 1  ;;  %v11306_v54 = vunpack.c.l.bf16 %v10581_v8  ;;  %v5985_v60 = vmul.f32 0.00390625, %v5984_v7  ;;  %v5986_v61 = vmul.f32 %v10756_v43, %v10756_v43  ;;  %v11307_v8 = vld [vmem:[#allocation5_spill] sm:$0xff] }
 0x4de   : > { %v6235_v21 = vrot.slane %v11305_v34, 1  ;;  %v10837_v29 = vsel %vm573_vm0, %v6220_v6, %v6222_v24  ;;  %v10840_v7 = vsel %vm573_vm0, %v6224_v28, %v6225_v62  ;;  %v10843_v19 = vsel %vm573_vm0, %v6225_v62, %v6227_v9  ;;  %v11323_v62 = vld [vmem:[#allocation13_spill] sm:$0xff] }
 0x4df   : > { %v6237_v40 = vrot.slane %v11306_v54, 1  ;;  %v5987_v55 = vsub.f32 %v5985_v60, %v5986_v61  ;;  %v11308_v60 = vld [vmem:[#allocation3_spill] sm:$0xff]  ;;  %11313 = vst [vmem:[#allocation5_spill] sm:$0xff] %v10837_v29  ;;  %11315 = vst [vmem:[#allocation33_spill] sm:$0xff] %v10843_v19  ;;  %v10846_v0 = vsel %vm573_vm0, %v6229_v41, %v6230_v12  ;;  %v10849_v2 = vsel %vm573_vm0, %v6230_v12, %v6232_v45 }
 0x4e0   : > { %11314 = vst [vmem:[#allocation3_spill] sm:$0xff] %v10840_v7  ;;  %11316 = vst [vmem:[#allocation34_spill] sm:$0xff] %v10846_v0  ;;  %v11319_v47 = vunpack.c.l.bf16 %v11318_v27  ;;  %v10856_v24 = vsel %vm573_vm0, %v6234_v20, %v6235_v21  ;;  %v11324_v9 = vunpack.c.l.bf16 %v11323_v62  ;;  %v11325_v0 = vld [vmem:[#allocation6_spill] sm:$0xff]  ;;  %v11335_v62 = vld [vmem:[#allocation11_spill] sm:$0xff] }
 0x4e1   : > { %v6020_v4 = vadd.f32 1e-05, %v5987_v55  ;;  %11317 = vst [vmem:[#allocation35_spill] sm:$0xff] %v10849_v2  ;;  %v11320_v55 = vunpack.c.h.bf16 %v11318_v27  ;;  %11321 = vst [vmem:[#allocation8_spill] sm:$0xff] %v10856_v24  ;;  %v10859_v28 = vsel %vm573_vm0, %v6235_v21, %v6237_v40  ;;  %v11327_v12 = vunpack.c.h.bf16 %v11325_v0  ;;  %v11328_v2 = vld [vmem:[#allocation14_spill] sm:$0xff]  ;;  %v11330_v27 = vld [vmem:[#allocation16_spill] sm:$0xff] }
 0x4e2   : > { %v6239_v54 = vrot.slane %v11319_v47, 1  ;;  %11322 = vst [vmem:[#allocation36_spill] sm:$0xff] %v10859_v28  ;;  %v6242_v41 = vrot.slane %v11324_v9, 1  ;;  %v11329_v47 = vunpack.c.l.bf16 %v11328_v2  ;;  %v11332_v20 = vunpack.c.h.bf16 %v11330_v27  ;;  %v11333_v21 = vld [vmem:[#allocation17_spill] sm:$0xff]  ;;  %v11340_v2 = vld [vmem:[#allocation19_spill] sm:$0xff] }
 0x4e3   : > { %7674 = vrsqrt.f32 %v6020_v4  ;;  %v6240_v6 = vrot.slane %v11320_v55, 1  ;;  %v11326_v4 = vunpack.c.l.bf16 %v11325_v0  ;;  %v6245_v45 = vrot.slane %v11327_v12, 1  ;;  %v11338_v0 = vld [vmem:[#allocation18_spill] sm:$0xff] }
 0x4e4   : > { %v6247_v7 = vrot.slane %v11329_v47, 1  ;;  %v11331_v55 = vunpack.c.l.bf16 %v11330_v27  ;;  %v6250_v24 = vrot.slane %v11332_v20, 1  ;;  %v11334_v40 = vunpack.c.l.bf16 %v11333_v21  ;;  %v11343_v27 = vld [vmem:[#allocation21_spill] sm:$0xff]  ;;  %v11345_v21 = vld [vmem:[#allocation15_spill] sm:$0xff] }
 0x4e5   : > { %v6244_v19 = vrot.slane %v11326_v4, 1  ;;  %v11336_v9 = vunpack.c.l.bf16 %v11335_v62  ;;  %v11337_v4 = vunpack.c.h.bf16 %v11335_v62  ;;  %v11339_v12 = vunpack.c.l.bf16 %v11338_v0  ;;  %v11348_v62 = vld [vmem:[#allocation22_spill] sm:$0xff]  ;;  %v11350_v0 = vld [vmem:[#allocation23_spill] sm:$0xff] }
 0x4e6   : > { %v6249_v29 = vrot.slane %v11331_v55, 1  ;;  %v6252_v28 = vrot.slane %v11334_v40, 1  ;;  %v11341_v47 = vunpack.c.l.bf16 %v11340_v2  ;;  %v11342_v55 = vunpack.c.h.bf16 %v11340_v2 }
 0x4e7   : > { %v6254_v35 = vrot.slane %v11336_v9, 1  ;;  %v6255_v11 = vrot.slane %v11337_v4, 1  ;;  %v6257_v44 = vrot.slane %v11339_v12, 1  ;;  %v11344_v20 = vunpack.c.l.bf16 %v11343_v27  ;;  %v11354_v27 = vld [vmem:[#allocation20_spill] sm:$0xff] }
 0x4e8   : > { %v6259_v26 = vrot.slane %v11341_v47, 1  ;;  %v6260_v51 = vrot.slane %v11342_v55, 1  ;;  %v11346_v40 = vunpack.c.l.bf16 %v11345_v21  ;;  %v11347_v9 = vunpack.c.h.bf16 %v11345_v21 }
 0x4e9   : > { %v6262_v25 = vrot.slane %v11344_v20, 1  ;;  %v11349_v4 = vunpack.c.l.bf16 %v11348_v62  ;;  %v11351_v12 = vunpack.c.l.bf16 %v11350_v0  ;;  %v11352_v47 = vunpack.c.h.bf16 %v11350_v0 }
 0x4ea   : > { %v6264_v58 = vrot.slane %v11346_v40, 1  ;;  %v6265_v52 = vrot.slane %v11347_v9, 1  ;;  %v11353_v2 = vunpack.c.l.bf16 %v10685_v49  ;;  %v11355_v20 = vunpack.c.l.bf16 %v11354_v27 }
 0x4eb   : > { %v6267_v22 = vrot.slane %v11349_v4, 1  ;;  %v6269_v34 = vrot.slane %v11351_v12, 1  ;;  %v6270_v32 = vrot.slane %v11352_v47, 1  ;;  %v11356_v40 = vunpack.c.h.bf16 %v11354_v27 }
 0x4ec   : > { %v6272_v55 = vrot.slane %v11353_v2, 1  ;;  %v6274_v3 = vrot.slane %v11355_v20, 1  ;;  %v11357_v21 = vunpack.c.l.bf16 %v10691_v42  ;;  %v10906_v62 = vsel %vm573_vm0, %v6239_v54, %v6240_v6 }
 0x4ed   : > { %v6275_v61 = vrot.slane %v11356_v40, 1  ;;  %v10909_v4 = vsel %vm573_vm0, %v6240_v6, %v6242_v41  ;;  %v10912_v0 = vsel %vm573_vm0, %v6244_v19, %v6245_v45  ;;  %v10915_v49 = vsel %vm573_vm0, %v6245_v45, %v6247_v7 }
 0x4ee   : > { %v6277_v9 = vrot.slane %v11357_v21, 1  ;;  %v10918_v12 = vsel %vm573_vm0, %v6249_v29, %v6250_v24  ;;  %v10921_v47 = vsel %vm573_vm0, %v6250_v24, %v6252_v28  ;;  %v10924_v42 = vsel %vm573_vm0, %v6254_v35, %v6255_v11  ;;  %v7675_v24 = vpop.eup %7674 }
 0x4ef   : > { %v10927_v54 = vsel %vm573_vm0, %v6255_v11, %v6257_v44  ;;  %v10930_v6 = vsel %vm573_vm0, %v6259_v26, %v6260_v51  ;;  %v10933_v19 = vsel %vm573_vm0, %v6260_v51, %v6262_v25  ;;  %v10936_v7 = vsel %vm573_vm0, %v6264_v58, %v6265_v52 }
 0x4f0   : > { %v10939_v29 = vsel %vm573_vm0, %v6265_v52, %v6267_v22  ;;  %v10942_v28 = vsel %vm573_vm0, %v6269_v34, %v6270_v32  ;;  %v10945_v35 = vsel %vm573_vm0, %v6270_v32, %v6272_v55  ;;  %v10948_v44 = vsel %vm573_vm0, %v6274_v3, %v6275_v61 }
 0x4f1   : > { %11358 = vst [vmem:[#allocation13_spill] sm:$0xff] %v10948_v44  ;;  %v10951_v26 = vsel %vm573_vm0, %v6275_v61, %v6277_v9  ;;  %v11360_v58 = vsub.f32 %v10327_v36, %v10756_v43  ;;  %v11361_v22 = vsub.f32 %v10333_v1, %v10756_v43  ;;  %v11362_v51 = vsub.f32 %v10325_v14, %v10756_v43 }
 0x4f2   : > { %11359 = vst [vmem:[#allocation6_spill] sm:$0xff] %v10951_v26  ;;  %v11363_v3 = vsub.f32 %v10331_v30, %v10756_v43  ;;  %v11364_v34 = vsub.f32 %v10354_v15, %v10756_v43  ;;  %v11365_v36 = vsub.f32 %v10363_v39, %v10756_v43  ;;  %v11366_v1 = vsub.f32 %v10352_v16, %v10756_v43  ;;  %v11402_v26 = vld [vmem:[#allocation29_spill] sm:$0xff] }
 0x4f3   : > { %v6022_v25 = vmul.f32 %v7675_v24, %v11360_v58  ;;  %v6023_v52 = vmul.f32 %v7675_v24, %v11361_v22  ;;  %v6024_v11 = vmul.f32 %v7675_v24, %v11362_v51  ;;  %v11367_v14 = vsub.f32 %v10361_v57, %v10756_v43 }
 0x4f4   : > { %v6025_v32 = vmul.f32 %v7675_v24, %v11363_v3  ;;  %v6026_v61 = vmul.f32 %v7675_v24, %v11364_v34  ;;  %v6027_v41 = vmul.f32 %v7675_v24, %v11365_v36  ;;  %v6028_v45 = vmul.f32 %v7675_v24, %v11366_v1 }
 0x4f5   : > { %v6029_v2 = vmul.f32 %v7675_v24, %v11367_v14  ;;  %v11368_v30 = vsub.f32 %v10382_v37, %v10756_v43  ;;  %v11369_v15 = vsub.f32 %v10391_v31, %v10756_v43  ;;  %v11370_v39 = vsub.f32 %v10380_v13, %v10756_v43 }
 0x4f6   : > { %v11371_v16 = vsub.f32 %v10389_v59, %v10756_v43  ;;  %v11372_v57 = vsub.f32 %v10410_v38, %v10756_v43  ;;  %v11373_v37 = vsub.f32 %v10419_v10, %v10756_v43  ;;  %v11374_v31 = vsub.f32 %v10408_v48, %v10756_v43 }
 0x4f7   : > { %v6030_v55 = vmul.f32 %v7675_v24, %v11368_v30  ;;  %v6031_v27 = vmul.f32 %v7675_v24, %v11369_v15  ;;  %v6032_v20 = vmul.f32 %v7675_v24, %v11370_v39  ;;  %v11375_v13 = vsub.f32 %v10417_v46, %v10756_v43 }
 0x4f8   : > { %v6033_v40 = vmul.f32 %v7675_v24, %v11371_v16  ;;  %v6034_v21 = vmul.f32 %v7675_v24, %v11372_v57  ;;  %v6035_v9 = vmul.f32 %v7675_v24, %v11373_v37  ;;  %v6036_v58 = vmul.f32 %v7675_v24, %v11374_v31  ;;  %v11387_v37 = vld [vmem:[#allocation4_spill] sm:$0xff] }
 0x4f9   : > { %v6037_v22 = vmul.f32 %v7675_v24, %v11375_v13  ;;  %v11376_v59 = vsub.f32 %v10438_v50, %v10756_v43  ;;  %v11377_v38 = vsub.f32 %v10447_v17, %v10756_v43  ;;  %v11378_v10 = vsub.f32 %v10436_v18, %v10756_v43 }
 0x4fa   : > { %v11379_v48 = vsub.f32 %v10445_v23, %v10756_v43  ;;  %v11380_v46 = vsub.f32 %v10472_v63, %v10756_v43  ;;  %v11381_v50 = vsub.f32 %v10485_v5, %v10756_v43  ;;  %v11382_v17 = vsub.f32 %v10467_v33, %v10756_v43 }
 0x4fb   : > { %v6038_v51 = vmul.f32 %v7675_v24, %v11376_v59  ;;  %v6039_v3 = vmul.f32 %v7675_v24, %v11377_v38  ;;  %v6040_v34 = vmul.f32 %v7675_v24, %v11378_v10  ;;  %v11383_v18 = vsub.f32 %v10479_v53, %v10756_v43  ;;  %v11389_v53 = vld [vmem:[#allocation9_spill] sm:$0xff]  ;;  %v11391_v59 = vld [vmem:[#allocation12_spill] sm:$0xff] }
 0x4fc   : > { %v6041_v36 = vmul.f32 %v7675_v24, %v11379_v48  ;;  %v6042_v1 = vmul.f32 %v7675_v24, %v11380_v46  ;;  %v6043_v14 = vmul.f32 %v7675_v24, %v11381_v50  ;;  %v6044_v30 = vmul.f32 %v7675_v24, %v11382_v17  ;;  %v11395_v46 = vld [vmem:[#allocation10_spill] sm:$0xff] }
 0x4fd   : > { %v6045_v15 = vmul.f32 %v7675_v24, %v11383_v18  ;;  %v11384_v23 = vsub.f32 %v10534_v56, %v10756_v43  ;;  %v11385_v63 = vsub.f32 %v11307_v8, %v10756_v43  ;;  %v11386_v5 = vsub.f32 %v11308_v60, %v10756_v43  ;;  %v11393_v60 = vld [vmem:[#allocation7_spill] sm:$0xff]  ;;  %v11397_v18 = vld [vmem:[#allocation24_spill] sm:$0xff] }
 0x4fe   : > { %v11388_v33 = vsub.f32 %v11387_v37, %v10756_v43  ;;  %v11390_v56 = vsub.f32 %v11389_v53, %v10756_v43  ;;  %v11392_v8 = vsub.f32 %v11391_v59, %v10756_v43  ;;  %v11394_v10 = vsub.f32 %v11393_v60, %v10756_v43  ;;  %v11399_v37 = vld [vmem:[#allocation26_spill] sm:$0xff]  ;;  %v11400_v53 = vld [vmem:[#allocation27_spill] sm:$0xff]  ;;  %v11401_v59 = vld [vmem:[#allocation28_spill] sm:$0xff] }
 0x4ff   : > { %v6046_v39 = vmul.f32 %v7675_v24, %v11384_v23  ;;  %v6047_v16 = vmul.f32 %v7675_v24, %v11385_v63  ;;  %v6048_v57 = vmul.f32 %v7675_v24, %v11386_v5  ;;  %v11396_v50 = vsub.f32 %v11395_v46, %v10756_v43  ;;  %v11398_v63 = vld [vmem:[#allocation25_spill] sm:$0xff]  ;;  %v11404_v43 = vld [vmem:[#allocation31_spill] sm:$0xff]  ;;  %v11405_v46 = vld [vmem:[#allocation32_spill] sm:$0xff] }
 0x500   : > { %v6049_v31 = vmul.f32 %v7675_v24, %v11388_v33  ;;  %v6050_v13 = vmul.f32 %v7675_v24, %v11390_v56  ;;  %v6051_v38 = vmul.f32 %v7675_v24, %v11392_v8  ;;  %v6052_v48 = vmul.f32 %v7675_v24, %v11394_v10  ;;  %v11403_v10 = vld [vmem:[#allocation30_spill] sm:$0xff] }
 0x501   : > { %v6053_v17 = vmul.f32 %v7675_v24, %v11396_v50  ;;  %v6311_v23 = vadd.f32 %v11397_v18, %v6022_v25  ;;  %v6312_v5 = vadd.f32 %v11398_v63, %v6023_v52  ;;  %v6313_v33 = vadd.f32 %v11399_v37, %v6024_v11  ;;  %v11406_v50 = vld [vmem:[#allocation5_spill] sm:$0xff]  ;;  %v11407_v18 = vld [vmem:[#allocation3_spill] sm:$0xff] }
 0x502   : > { %v6314_v56 = vadd.f32 %v11400_v53, %v6025_v32  ;;  %v6315_v8 = vadd.f32 %v11401_v59, %v6026_v61  ;;  %v6316_v60 = vadd.f32 %v11402_v26, %v6027_v41  ;;  %v6317_v44 = vadd.f32 %v11403_v10, %v6028_v45  ;;  %v11408_v63 = vld [vmem:[#allocation33_spill] sm:$0xff]  ;;  %v11409_v26 = vld [vmem:[#allocation34_spill] sm:$0xff]  ;;  %v11410_v41 = vld [vmem:[#allocation35_spill] sm:$0xff] }
 0x503   : > { %v6318_v24 = vadd.f32 %v11404_v43, %v6029_v2  ;;  %v6319_v25 = vadd.f32 %v11405_v46, %v6030_v55  ;;  %v6320_v52 = vadd.f32 %v11406_v50, %v6031_v27  ;;  %v6321_v11 = vadd.f32 %v11407_v18, %v6032_v20  ;;  %6343 = vst.msk [vmem:[%s11041_s8] sm:$0xff] %vm654_vm3, %v6311_v23  ;;  %v11411_v2 = vld [vmem:[#allocation8_spill] sm:$0xff] }
 0x504   : > { %v6322_v32 = vadd.f32 %v11408_v63, %v6033_v40  ;;  %6344 = vst.msk [vmem:[%s11041_s8 + $0x8] sm:$0xff] %vm654_vm3, %v6312_v5  ;;  %6345 = vst.msk [vmem:[%s11041_s8 + $0x10] sm:$0xff] %vm654_vm3, %v6313_v33  ;;  %v6323_v61 = vadd.f32 %v11409_v26, %v6034_v21  ;;  %v6324_v45 = vadd.f32 %v11410_v41, %v6035_v9  ;;  %v11412_v27 = vld [vmem:[#allocation36_spill] sm:$0xff] }
 0x505   : > { %6346 = vst.msk [vmem:[%s11041_s8 + $0x18] sm:$0xff] %vm654_vm3, %v6314_v56  ;;  %v6325_v55 = vadd.f32 %v11411_v2, %v6036_v58  ;;  %v6326_v20 = vadd.f32 %v11412_v27, %v6037_v22  ;;  %6347 = vst.msk [vmem:[%s11041_s8 + $0x20] sm:$0xff] %vm654_vm3, %v6315_v8  ;;  %v6327_v40 = vadd.f32 %v10906_v62, %v6038_v51 }
 0x506   : > { %6348 = vst.msk [vmem:[%s11041_s8 + $0x28] sm:$0xff] %vm654_vm3, %v6316_v60  ;;  %6349 = vst.msk [vmem:[%s11041_s8 + $0x30] sm:$0xff] %vm654_vm3, %v6317_v44  ;;  %v6328_v21 = vadd.f32 %v10909_v4, %v6039_v3  ;;  %v6329_v9 = vadd.f32 %v10912_v0, %v6040_v34  ;;  %v6330_v58 = vadd.f32 %v10915_v49, %v6041_v36 }
 0x507   : > { %6350 = vst.msk [vmem:[%s11041_s8 + $0x38] sm:$0xff] %vm654_vm3, %v6318_v24  ;;  %6351 = vst.msk [vmem:[%s11041_s8 + $0x40] sm:$0xff] %vm654_vm3, %v6319_v25  ;;  %v6331_v62 = vadd.f32 %v10918_v12, %v6042_v1  ;;  %v6332_v4 = vadd.f32 %v10921_v47, %v6043_v14  ;;  %v6333_v0 = vadd.f32 %v10924_v42, %v6044_v30 }
 0x508   : > { %6352 = vst.msk [vmem:[%s11041_s8 + $0x48] sm:$0xff] %vm654_vm3, %v6320_v52  ;;  %6353 = vst.msk [vmem:[%s11041_s8 + $0x50] sm:$0xff] %vm654_vm3, %v6321_v11  ;;  %v6334_v49 = vadd.f32 %v10927_v54, %v6045_v15  ;;  %v6335_v12 = vadd.f32 %v10930_v6, %v6046_v39  ;;  %v6336_v47 = vadd.f32 %v10933_v19, %v6047_v16 }
 0x509   : > { %6354 = vst.msk [vmem:[%s11041_s8 + $0x58] sm:$0xff] %vm654_vm3, %v6322_v32  ;;  %6355 = vst.msk [vmem:[%s11041_s8 + $0x60] sm:$0xff] %vm654_vm3, %v6323_v61  ;;  %v6337_v42 = vadd.f32 %v10936_v7, %v6048_v57  ;;  %v6338_v54 = vadd.f32 %v10939_v29, %v6049_v31  ;;  %v6339_v6 = vadd.f32 %v10942_v28, %v6050_v13  ;;  %v11413_v7 = vld [vmem:[#allocation13_spill] sm:$0xff]  ;;  %v11414_v29 = vld [vmem:[#allocation6_spill] sm:$0xff] }
 0x50a   : > { %6356 = vst.msk [vmem:[%s11041_s8 + $0x68] sm:$0xff] %vm654_vm3, %v6324_v45  ;;  %6357 = vst.msk [vmem:[%s11041_s8 + $0x70] sm:$0xff] %vm654_vm3, %v6325_v55  ;;  %v6340_v19 = vadd.f32 %v10945_v35, %v6051_v38  ;;  %v6341_v44 = vadd.f32 %v11413_v7, %v6052_v48  ;;  %v6342_v22 = vadd.f32 %v11414_v29, %v6053_v17 }
 0x50b   : > { %6358 = vst.msk [vmem:[%s11041_s8 + $0x78] sm:$0xff] %vm654_vm3, %v6326_v20  ;;  %6359 = vst.msk [vmem:[%s11041_s8 + $0x80] sm:$0xff] %vm654_vm3, %v6327_v40 }
 0x50c   : > { %6360 = vst.msk [vmem:[%s11041_s8 + $0x88] sm:$0xff] %vm654_vm3, %v6328_v21  ;;  %6361 = vst.msk [vmem:[%s11041_s8 + $0x90] sm:$0xff] %vm654_vm3, %v6329_v9 }
 0x50d   : > { %6362 = vst.msk [vmem:[%s11041_s8 + $0x98] sm:$0xff] %vm654_vm3, %v6330_v58  ;;  %6363 = vst.msk [vmem:[%s11041_s8 + $0xa0] sm:$0xff] %vm654_vm3, %v6331_v62 }
 0x50e   : > { %6364 = vst.msk [vmem:[%s11041_s8 + $0xa8] sm:$0xff] %vm654_vm3, %v6332_v4  ;;  %6365 = vst.msk [vmem:[%s11041_s8 + $0xb0] sm:$0xff] %vm654_vm3, %v6333_v0 }
 0x50f   : > { %6366 = vst.msk [vmem:[%s11041_s8 + $0xb8] sm:$0xff] %vm654_vm3, %v6334_v49  ;;  %6367 = vst.msk [vmem:[%s11041_s8 + $0xc0] sm:$0xff] %vm654_vm3, %v6335_v12 }
 0x510   : > { %6368 = vst.msk [vmem:[%s11041_s8 + $0xc8] sm:$0xff] %vm654_vm3, %v6336_v47  ;;  %6369 = vst.msk [vmem:[%s11041_s8 + $0xd0] sm:$0xff] %vm654_vm3, %v6337_v42 }
 0x511   : > { %6370 = vst.msk [vmem:[%s11041_s8 + $0xd8] sm:$0xff] %vm654_vm3, %v6338_v54  ;;  %6371 = vst.msk [vmem:[%s11041_s8 + $0xe0] sm:$0xff] %vm654_vm3, %v6339_v6 }
 0x512   : > { %6372 = vst.msk [vmem:[%s11041_s8 + $0xe8] sm:$0xff] %vm654_vm3, %v6340_v19  ;;  %6373 = vst.msk [vmem:[%s11041_s8 + $0xf0] sm:$0xff] %vm654_vm3, %v6341_v44 }
 0x513   : > { %6374 = vst.msk [vmem:[%s11041_s8 + $0xf8] sm:$0xff] %vm654_vm3, %v6342_v22 }
 0x514 PF: > { %s13_s12 = sadd.s32 1, %s7735_s12  }
 0x515   : > { %p10_p4 = scmp.ge.s32.totalorder %s13_s12, 4  }
 0x517   :  { %12 = sbr.rel (!%p10_p4) target bundleno = 1 (0x1), region = 72 }

</bundles_post_ra>
